<compile_context>
chip_gen: v5e
topology: v5e:2x2
jax: 0.10.0
libtpu: 0.0.40
codegen_flags: <defaults>
</compile_context>

<pallas_src>
import math
import jax
import jax.numpy as jnp
from jax.experimental import pallas as pl
from jax.experimental.pallas import tpu as pltpu

# ---------------- model hyper-parameters (small, consistent with the module) --------
B = 8                # sequences forwarded per call (each with its own diffusion timestep)
S = 8                # sequence length
D = 16               # embedding dim ("d" in DiffusionLM.__init__)
H = 128              # bert hidden_size (scaled down from 768)
NH = 4               # attention heads (scaled down from 12)
HD = H // NH         # head dim
INTER = 4 * H        # bert intermediate_size
NLAYERS = 2          # encoder layers (scaled down from 12)
T = 32               # diffusion steps (scaled down from 2000)
TIME_EMBED = 4 * D   # time_embed_dim = 4*d
MAX_POS = 64         # position table size (>= S)
LN_EPS = 1e-12       # bert_config.layer_norm_eps
D_PAD = 128          # lane-dense padded output width for the final projection

BLOCK_B = 2                  # sequences processed per grid step
BLOCK_ROWS = BLOCK_B * S     # activation rows per grid step
NBLOCKS = B // BLOCK_B       # grid size; weights stay VMEM-resident across it


# ---------------------------------------------------------------------------
# in-kernel helpers (also reused by the pure-JAX reference)
# ---------------------------------------------------------------------------
def _ln(x, gamma, beta):
    mu = jnp.mean(x, axis=-1, keepdims=True)
    var = jnp.mean(jnp.square(x - mu), axis=-1, keepdims=True)
    return (x - mu) * jax.lax.rsqrt(var + LN_EPS) * gamma + beta


def _gelu(x):
    # TODO(synk): HF BERT default is exact erf-GELU; tanh approximation used here.
    c = math.sqrt(2.0 / math.pi)
    return 0.5 * x * (1.0 + jnp.tanh(c * (x + 0.044715 * x * x * x)))


def _mm(a, w_bf16):
    # bf16 MXU matmul with f32 accumulation (weights stored in bf16).
    return jnp.dot(a.astype(jnp.bfloat16), w_bf16,
                   preferred_element_type=jnp.float32)


def _stack_heads(a2d):
    """(BLOCK_ROWS, H) f32 -> (BLOCK_B*NH, S, HD) bf16 batched head slabs."""
    return jnp.stack(
        [a2d[b * S:(b + 1) * S, n * HD:(n + 1) * HD]
         for b in range(BLOCK_B) for n in range(NH)], axis=0).astype(jnp.bfloat16)


# ---------------------------------------------------------------------------
# Fused forward kernel: grid over row-blocks, weights resident in VMEM.
# ---------------------------------------------------------------------------
def _fused_forward_kernel(
        x_ref, temb_ref, pemb_ref,
        ip_w1_ref, ip_b1_ref, ip_w2_ref, ip_b2_ref,
        ln_g_ref, ln_b_ref,
        wqkv_ref, bqkv_ref, wo_ref, bo_ref, g1_ref, be1_ref,
        wi_ref, bi_ref, wd_ref, bd_ref, g2_ref, be2_ref,
        op_w1_ref, op_b1_ref, op_w2_ref, op_b2_ref,
        o_ref):
    blk = pl.program_id(0)

    # ---- input_projection: Linear(D,H) -> Tanh -> Linear(H,H) --------------
    x = x_ref[...]                                                   # (ROWS, D) f32
    hm = jnp.tanh(_mm(x, ip_w1_ref[...]) + ip_b1_ref[...])
    up = _mm(hm, ip_w2_ref[...]) + ip_b2_ref[...]                    # (ROWS, H)

    # ---- + timestep emb + position emb (broadcast in-kernel), LayerNorm ----
    pemb = pemb_ref[...]                                             # (S, H)
    add_chunks = []
    for j in range(BLOCK_B):                                         # per sequence in block
        te = temb_ref[pl.ds(blk * BLOCK_B + j, 1), :]                # (1, H) -> bcast
        add_chunks.append(pemb + te)                                 # (S, H)
    add_emb = jnp.concatenate(add_chunks, axis=0)                    # (ROWS, H)
    h = _ln(up + add_emb, ln_g_ref[...], ln_b_ref[...])
    # TODO(synk): nn.Dropout after LayerNorm is stochastic in train mode; eval identity.

    # ---- NLAYERS BERT encoder layers (unrolled; stacked weights resident) ---
    for l in range(NLAYERS):
        # fused QKV projection (1/sqrt(HD) scale pre-folded into the Q block)
        qkv = _mm(h, wqkv_ref[l]) + bqkv_ref[l]                      # (ROWS, 3H) f32
        q3 = _stack_heads(qkv[:, 0:H])                               # (BB*NH, S, HD) bf16
        k3 = _stack_heads(qkv[:, H:2 * H])
        v3 = _stack_heads(qkv[:, 2 * H:3 * H])

        # one batched QK^T, one softmax pass, one batched PV
        s = jnp.einsum('bqd,bkd->bqk', q3, k3,
                       preferred_element_type=jnp.float32)           # (BB*NH, S, S)
        m = jnp.max(s, axis=-1, keepdims=True)
        e = jnp.exp(s - m)
        p = e * pl.reciprocal(jnp.sum(e, axis=-1, keepdims=True), approx=True)
        # TODO(synk): attention-prob dropout omitted (eval identity).
        ctx = jnp.einsum('bqk,bkd->bqd', p.astype(jnp.bfloat16), v3,
                         preferred_element_type=jnp.float32)         # (BB*NH, S, HD)

        # fold head-concat into Wo: accumulate per-head (S,HD)@(HD,H) partial products
        wo_l = wo_ref[l]                                             # (H, H) bf16
        ctx_b = ctx.astype(jnp.bfloat16)
        attn_rows = []
        for b in range(BLOCK_B):
            acc = jnp.dot(ctx_b[b * NH], wo_l[0:HD, :],
                          preferred_element_type=jnp.float32)        # (S, H)
            for n in range(1, NH):
                acc = acc + jnp.dot(ctx_b[b * NH + n],
                                    wo_l[n * HD:(n + 1) * HD, :],
                                    preferred_element_type=jnp.float32)
            attn_rows.append(acc)
        attn_out = jnp.concatenate(attn_rows, axis=0) + bo_ref[l]    # (ROWS, H)

        h1 = _ln(attn_out + h, g1_ref[l], be1_ref[l])
        ff = _gelu(_mm(h1, wi_ref[l]) + bi_ref[l])
        ffo = _mm(ff, wd_ref[l]) + bd_ref[l]
        h = _ln(ffo + h1, g2_ref[l], be2_ref[l])

    # ---- output_projection: Linear(H,H) -> Tanh -> Linear(H, D[pad->128]) ---
    t = jnp.tanh(_mm(h, op_w1_ref[...]) + op_b1_ref[...])
    # lane-dense (ROWS, 128) store; real D columns sliced in the wrapper.
    o_ref[...] = _mm(t, op_w2_ref[...]) + op_b2_ref[...]


# ---------------------------------------------------------------------------
# pallas_call wrapper: 1-D grid over row-blocks, weights resident via constant index_map.
# ---------------------------------------------------------------------------
_WEIGHT_ORDER = ("ip_w1", "ip_b1", "ip_w2", "ip_b2", "ln_g", "ln_b",
                 "wqkv", "bqkv", "wo", "bo", "g1", "be1",
                 "wi", "bi", "wd", "bd", "g2", "be2",
                 "op_w1", "op_b1", "op_w2p", "op_b2p")


def _resident_spec(arr):
    # Full-array block with a constant index_map: DMA'd once, stays in VMEM for all steps.
    nd = arr.ndim
    return pl.BlockSpec(arr.shape, lambda i, _nd=nd: (0,) * _nd)


def _cost_estimate(args):
    macs_per_row = (D * H + H * H
                    + NLAYERS * (3 * H * H + 2 * NH * S * HD + H * H + 2 * H * INTER)
                    + H * H + H * D_PAD)
    flops = 2 * B * S * macs_per_row
    trans = B * S * (2 * H + NLAYERS * (NH * S + INTER))       # tanh + exp + gelu-tanh
    bytes_accessed = (sum(int(a.size) * a.dtype.itemsize for a in args)
                      + B * S * D_PAD * 4)
    return pl.CostEstimate(flops=int(flops), transcendentals=int(trans),
                           bytes_accessed=int(bytes_accessed))


def fused_forward(x2, temb, pemb, kp):
    weights = [kp[name] for name in _WEIGHT_ORDER]
    args = [x2, temb, pemb] + weights
    in_specs = ([pl.BlockSpec((BLOCK_ROWS, D), lambda i: (i, 0))]   # activations stream
                + [_resident_spec(a) for a in args[1:]])            # temb/pos/weights resident
    return pl.pallas_call(
        _fused_forward_kernel,
        out_shape=jax.ShapeDtypeStruct((B * S, D_PAD), jnp.float32),
        grid_spec=pltpu.PrefetchScalarGridSpec(
            num_scalar_prefetch=0,
            grid=(NBLOCKS,),
            in_specs=in_specs,
            out_specs=pl.BlockSpec((BLOCK_ROWS, D_PAD), lambda i: (i, 0)),
        ),
        compiler_params=pltpu.CompilerParams(dimension_semantics=("arbitrary",)),
        cost_estimate=_cost_estimate(args),
    )(*args)


# ---------------------------------------------------------------------------
# parameter setup (deterministic) — glue, mirrors DiffusionLM.__init__
# ---------------------------------------------------------------------------
def _dense(key, shape, scale=0.02):
    return scale * jax.random.normal(key, shape, jnp.float32)


def init_raw_params(key):
    keys = iter(jax.random.split(key, 64))
    p = {
        # input_projection: Linear(D,H) -> Tanh -> Linear(H,H)
        "ip_w1": _dense(next(keys), (D, H)), "ip_b1": jnp.zeros((1, H), jnp.float32),
        "ip_w2": _dense(next(keys), (H, H)), "ip_b2": jnp.zeros((1, H), jnp.float32),
        # top-level LayerNorm
        "ln_g": jnp.ones((1, H), jnp.float32), "ln_b": jnp.zeros((1, H), jnp.float32),
        # time_embedding MLP: Linear(D, 4D) -> SiLU -> Linear(4D, H)
        "te_w1": _dense(next(keys), (D, TIME_EMBED)),
        "te_b1": jnp.zeros((TIME_EMBED,), jnp.float32),
        "te_w2": _dense(next(keys), (TIME_EMBED, H)),
        "te_b2": jnp.zeros((H,), jnp.float32),
        # position embedding table
        "pos_table": _dense(next(keys), (MAX_POS, H)),
        # output_projection: Linear(H,H) -> Tanh -> Linear(H,D)
        "op_w1": _dense(next(keys), (H, H)), "op_b1": jnp.zeros((1, H), jnp.float32),
        "op_w2": _dense(next(keys), (H, D)), "op_b2": jnp.zeros((1, D), jnp.float32),
    }
    layers = []
    for _ in range(NLAYERS):
        layers.append({
            "wq": _dense(next(keys), (H, H)), "bq": jnp.zeros((1, H), jnp.float32),
            "wk": _dense(next(keys), (H, H)), "bk": jnp.zeros((1, H), jnp.float32),
            "wv": _dense(next(keys), (H, H)), "bv": jnp.zeros((1, H), jnp.float32),
            "wo": _dense(next(keys), (H, H)), "bo": jnp.zeros((1, H), jnp.float32),
            "g1": jnp.ones((1, H), jnp.float32), "be1": jnp.zeros((1, H), jnp.float32),
            "wi": _dense(next(keys), (H, INTER)), "bi": jnp.zeros((1, INTER), jnp.float32),
            "wd": _dense(next(keys), (INTER, H)), "bd": jnp.zeros((1, H), jnp.float32),
            "g2": jnp.ones((1, H), jnp.float32), "be2": jnp.zeros((1, H), jnp.float32),
        })
    p["layers"] = layers
    return p


def prepare_kernel_params(raw):
    """One-time param prep: stack layers, fuse QKV, fold attention scale into Q,
    cast matmul weights to bf16, pad final projection to a lane-dense width."""
    bf16 = jnp.bfloat16
    scale = 1.0 / math.sqrt(HD)
    ls = raw["layers"]
    stack = lambda name: jnp.stack([l[name] for l in ls])
    return {
        "ip_w1": raw["ip_w1"].astype(bf16), "ip_b1": raw["ip_b1"],
        "ip_w2": raw["ip_w2"].astype(bf16), "ip_b2": raw["ip_b2"],
        "ln_g": raw["ln_g"], "ln_b": raw["ln_b"],
        "wqkv": jnp.stack([jnp.concatenate(
            [l["wq"] * scale, l["wk"], l["wv"]], axis=1) for l in ls]).astype(bf16),
        "bqkv": jnp.stack([jnp.concatenate(
            [l["bq"] * scale, l["bk"], l["bv"]], axis=1) for l in ls]),
        "wo": stack("wo").astype(bf16), "bo": stack("bo"),
        "g1": stack("g1"), "be1": stack("be1"),
        "wi": stack("wi").astype(bf16), "bi": stack("bi"),
        "wd": stack("wd").astype(bf16), "bd": stack("bd"),
        "g2": stack("g2"), "be2": stack("be2"),
        "op_w1": raw["op_w1"].astype(bf16), "op_b1": raw["op_b1"],
        "op_w2p": jnp.zeros((H, D_PAD), jnp.float32)
                     .at[:, :D].set(raw["op_w2"]).astype(bf16),
        "op_b2p": jnp.zeros((1, D_PAD), jnp.float32).at[:, :D].set(raw["op_b2"]),
    }


def sinusoidal_timestep_embedding(timesteps, dim, max_period=10000.0):
    half = dim // 2
    freqs = jnp.exp(-math.log(max_period) *
                    jnp.arange(half, dtype=jnp.float32) / half)
    args = timesteps.astype(jnp.float32)[:, None] * freqs[None, :]
    return jnp.concatenate([jnp.cos(args), jnp.sin(args)], axis=-1)


def precompute_timestep_table(raw):
    # mirrors DiffusionLM.get_timestep_embeddings (done at __init__ time, not hot path)
    ts = sinusoidal_timestep_embedding(jnp.arange(T), D)                 # (T, D)
    h = ts @ raw["te_w1"] + raw["te_b1"]
    h = h * jax.nn.sigmoid(h)                                            # SiLU
    return h @ raw["te_w2"] + raw["te_b2"]                               # (T, H)


# ---------------------------------------------------------------------------
# forward = DiffusionLM.forward
# ---------------------------------------------------------------------------
def diffusion_lm_forward(kernel_params, timestep_table, pos_table,
                         embeddings, timesteps):
    # wrapper glue (embedding-table lookups only); broadcasting happens in-kernel
    temb = timestep_table[timesteps]                       # (B, H)
    pemb = pos_table[:S]                                   # (S, H)
    x2 = embeddings.reshape(B * S, D)                      # (B*S, D)

    out = fused_forward(x2, temb, pemb, kernel_params)     # (B*S, 128) lane-dense
    return out[:, :D].reshape(B, S, D)


# ---------------------------------------------------------------------------
# pure-JAX f32 reference (for a numerical sanity check)
# ---------------------------------------------------------------------------
def reference_forward(raw, timestep_table, embeddings, timesteps):
    scale = 1.0 / math.sqrt(HD)
    temb = timestep_table[timesteps][:, None, :]            # (B,1,H)
    pemb = raw["pos_table"][:S][None]                       # (1,S,H)
    h = jnp.tanh(embeddings @ raw["ip_w1"] + raw["ip_b1"])
    up = h @ raw["ip_w2"] + raw["ip_b2"]
    h = _ln(up + temb + pemb, raw["ln_g"], raw["ln_b"])
    for lp in raw["layers"]:
        q = (h @ lp["wq"] + lp["bq"]).reshape(B, S, NH, HD).transpose(0, 2, 1, 3)
        k = (h @ lp["wk"] + lp["bk"]).reshape(B, S, NH, HD).transpose(0, 2, 1, 3)
        v = (h @ lp["wv"] + lp["bv"]).reshape(B, S, NH, HD).transpose(0, 2, 1, 3)
        s = jnp.einsum("bhqd,bhkd->bhqk", q, k) * scale
        p = jax.nn.softmax(s, axis=-1)
        ctx = jnp.einsum("bhqk,bhkd->bhqd", p, v)
        ctx = ctx.transpose(0, 2, 1, 3).reshape(B, S, H)
        attn = ctx @ lp["wo"] + lp["bo"]
        h1 = _ln(attn + h, lp["g1"], lp["be1"])
        ff = _gelu(h1 @ lp["wi"] + lp["bi"])
        h = _ln(ff @ lp["wd"] + lp["bd"] + h1, lp["g2"], lp["be2"])
    t = jnp.tanh(h @ raw["op_w1"] + raw["op_b1"])
    return t @ raw["op_w2"] + raw["op_b2"]


if __name__ == "__main__":
    key = jax.random.PRNGKey(0)
    kp_key, ke, kt = jax.random.split(key, 3)

    raw_params = init_raw_params(kp_key)
    kernel_params = prepare_kernel_params(raw_params)
    timestep_table = precompute_timestep_table(raw_params)

    embeddings = jax.random.normal(ke, (B, S, D), jnp.float32)
    timesteps = jax.random.randint(kt, (B,), 0, T)

    out = diffusion_lm_forward(kernel_params, timestep_table,
                               raw_params["pos_table"], embeddings, timesteps)
    out = jax.block_until_ready(out)
    assert out.shape == (B, S, D) and out.dtype == jnp.float32
    assert bool(jnp.all(jnp.isfinite(out)))

    # loose tolerance: kernel uses bf16 matmul operands + approx softmax reciprocal
    ref = reference_forward(raw_params, timestep_table, embeddings, timesteps)
    max_err = float(jnp.max(jnp.abs(out - ref)))
    assert max_err < 5e-2, f"max |err| vs f32 reference = {max_err}"

    print("KERNEL_OK")
</pallas_src>

<mosaic_0001>
module attributes {stable_mosaic.version = 11 : i64} {
  func.func @_fused_forward_kernel(%arg0: i32, %arg1: memref<16x16xf32, #tpu.memory_space<vmem>>, %arg2: memref<8x128xf32, #tpu.memory_space<vmem>>, %arg3: memref<8x128xf32, #tpu.memory_space<vmem>>, %arg4: memref<16x128xbf16, #tpu.memory_space<vmem>>, %arg5: memref<1x128xf32, #tpu.memory_space<vmem>>, %arg6: memref<128x128xbf16, #tpu.memory_space<vmem>>, %arg7: memref<1x128xf32, #tpu.memory_space<vmem>>, %arg8: memref<1x128xf32, #tpu.memory_space<vmem>>, %arg9: memref<1x128xf32, #tpu.memory_space<vmem>>, %arg10: memref<2x128x384xbf16, #tpu.memory_space<vmem>>, %arg11: memref<2x1x384xf32, #tpu.memory_space<vmem>>, %arg12: memref<2x128x128xbf16, #tpu.memory_space<vmem>>, %arg13: memref<2x1x128xf32, #tpu.memory_space<vmem>>, %arg14: memref<2x1x128xf32, #tpu.memory_space<vmem>>, %arg15: memref<2x1x128xf32, #tpu.memory_space<vmem>>, %arg16: memref<2x128x512xbf16, #tpu.memory_space<vmem>>, %arg17: memref<2x1x512xf32, #tpu.memory_space<vmem>>, %arg18: memref<2x512x128xbf16, #tpu.memory_space<vmem>>, %arg19: memref<2x1x128xf32, #tpu.memory_space<vmem>>, %arg20: memref<2x1x128xf32, #tpu.memory_space<vmem>>, %arg21: memref<2x1x128xf32, #tpu.memory_space<vmem>>, %arg22: memref<128x128xbf16, #tpu.memory_space<vmem>>, %arg23: memref<1x128xf32, #tpu.memory_space<vmem>>, %arg24: memref<128x128xbf16, #tpu.memory_space<vmem>>, %arg25: memref<1x128xf32, #tpu.memory_space<vmem>>, %arg26: memref<16x128xf32, #tpu.memory_space<vmem>>) attributes {dimension_semantics = [#tpu.dimension_semantics<arbitrary>], iteration_bounds = array<i64: 4>, scalar_prefetch = 0 : i64, scratch_operands = 0 : i64, tpu.core_type = #tpu.core_type<tc>, window_params = [{transform_indices = @transform_0, window_bounds = array<i64: 16, 16>}, {pipeline_mode = #tpu.pipeline_mode<synchronous>, transform_indices = @transform_1, window_bounds = array<i64: 8, 128>}, {pipeline_mode = #tpu.pipeline_mode<synchronous>, transform_indices = @transform_2, window_bounds = array<i64: 8, 128>}, {pipeline_mode = #tpu.pipeline_mode<synchronous>, transform_indices = @transform_3, window_bounds = array<i64: 16, 128>}, {pipeline_mode = #tpu.pipeline_mode<synchronous>, transform_indices = @transform_4, window_bounds = array<i64: 1, 128>}, {pipeline_mode = #tpu.pipeline_mode<synchronous>, transform_indices = @transform_5, window_bounds = array<i64: 128, 128>}, {pipeline_mode = #tpu.pipeline_mode<synchronous>, transform_indices = @transform_6, window_bounds = array<i64: 1, 128>}, {pipeline_mode = #tpu.pipeline_mode<synchronous>, transform_indices = @transform_7, window_bounds = array<i64: 1, 128>}, {pipeline_mode = #tpu.pipeline_mode<synchronous>, transform_indices = @transform_8, window_bounds = array<i64: 1, 128>}, {pipeline_mode = #tpu.pipeline_mode<synchronous>, transform_indices = @transform_9, window_bounds = array<i64: 2, 128, 384>}, {pipeline_mode = #tpu.pipeline_mode<synchronous>, transform_indices = @transform_10, window_bounds = array<i64: 2, 1, 384>}, {pipeline_mode = #tpu.pipeline_mode<synchronous>, transform_indices = @transform_11, window_bounds = array<i64: 2, 128, 128>}, {pipeline_mode = #tpu.pipeline_mode<synchronous>, transform_indices = @transform_12, window_bounds = array<i64: 2, 1, 128>}, {pipeline_mode = #tpu.pipeline_mode<synchronous>, transform_indices = @transform_13, window_bounds = array<i64: 2, 1, 128>}, {pipeline_mode = #tpu.pipeline_mode<synchronous>, transform_indices = @transform_14, window_bounds = array<i64: 2, 1, 128>}, {pipeline_mode = #tpu.pipeline_mode<synchronous>, transform_indices = @transform_15, window_bounds = array<i64: 2, 128, 512>}, {pipeline_mode = #tpu.pipeline_mode<synchronous>, transform_indices = @transform_16, window_bounds = array<i64: 2, 1, 512>}, {pipeline_mode = #tpu.pipeline_mode<synchronous>, transform_indices = @transform_17, window_bounds = array<i64: 2, 512, 128>}, {pipeline_mode = #tpu.pipeline_mode<synchronous>, transform_indices = @transform_18, window_bounds = array<i64: 2, 1, 128>}, {pipeline_mode = #tpu.pipeline_mode<synchronous>, transform_indices = @transform_19, window_bounds = array<i64: 2, 1, 128>}, {pipeline_mode = #tpu.pipeline_mode<synchronous>, transform_indices = @transform_20, window_bounds = array<i64: 2, 1, 128>}, {pipeline_mode = #tpu.pipeline_mode<synchronous>, transform_indices = @transform_21, window_bounds = array<i64: 128, 128>}, {pipeline_mode = #tpu.pipeline_mode<synchronous>, transform_indices = @transform_22, window_bounds = array<i64: 1, 128>}, {pipeline_mode = #tpu.pipeline_mode<synchronous>, transform_indices = @transform_23, window_bounds = array<i64: 128, 128>}, {pipeline_mode = #tpu.pipeline_mode<synchronous>, transform_indices = @transform_24, window_bounds = array<i64: 1, 128>}, {transform_indices = @transform_25, window_bounds = array<i64: 16, 128>}]} {
    %c0 = arith.constant 0 : index
    %c0_0 = arith.constant 0 : index
    %0 = vector.load %arg1[%c0, %c0_0] : memref<16x16xf32, #tpu.memory_space<vmem>>, vector<16x16xf32>
    %c0_1 = arith.constant 0 : index
    %c0_2 = arith.constant 0 : index
    %1 = vector.load %arg4[%c0_1, %c0_2] : memref<16x128xbf16, #tpu.memory_space<vmem>>, vector<16x128xbf16>
    %2 = arith.truncf %0 : vector<16x16xf32> to vector<16x16xbf16>
    %cst = arith.constant dense<0.000000e+00> : vector<16x128xf32>
    %3 = tpu.matmul %2, %1, %cst {dimension_numbers = #tpu.dot_dimension_numbers<[1], [0], [0], [1], [0, 0, 1, 1], [], []>} : vector<16x16xbf16>, vector<16x128xbf16>, vector<16x128xf32> -> vector<16x128xf32>
    %c0_3 = arith.constant 0 : index
    %c0_4 = arith.constant 0 : index
    %4 = vector.load %arg5[%c0_3, %c0_4] : memref<1x128xf32, #tpu.memory_space<vmem>>, vector<1x128xf32>
    %5 = vector.broadcast %4 : vector<1x128xf32> to vector<16x128xf32>
    %6 = arith.addf %3, %5 : vector<16x128xf32>
    %7 = math.tanh %6 : vector<16x128xf32>
    %c0_5 = arith.constant 0 : index
    %c0_6 = arith.constant 0 : index
    %8 = vector.load %arg6[%c0_5, %c0_6] : memref<128x128xbf16, #tpu.memory_space<vmem>>, vector<128x128xbf16>
    %9 = arith.truncf %7 : vector<16x128xf32> to vector<16x128xbf16>
    %cst_7 = arith.constant dense<0.000000e+00> : vector<16x128xf32>
    %10 = tpu.matmul %9, %8, %cst_7 {dimension_numbers = #tpu.dot_dimension_numbers<[1], [0], [0], [1], [0, 0, 1, 1], [], []>} : vector<16x128xbf16>, vector<128x128xbf16>, vector<16x128xf32> -> vector<16x128xf32>
    %c0_8 = arith.constant 0 : index
    %c0_9 = arith.constant 0 : index
    %11 = vector.load %arg7[%c0_8, %c0_9] : memref<1x128xf32, #tpu.memory_space<vmem>>, vector<1x128xf32>
    %12 = vector.broadcast %11 : vector<1x128xf32> to vector<16x128xf32>
    %13 = arith.addf %10, %12 : vector<16x128xf32>
    %c0_10 = arith.constant 0 : index
    %c0_11 = arith.constant 0 : index
    %14 = vector.load %arg3[%c0_10, %c0_11] : memref<8x128xf32, #tpu.memory_space<vmem>>, vector<8x128xf32>
    %c2_i32 = arith.constant 2 : i32
    %15 = arith.muli %arg0, %c2_i32 : i32
    %c0_i32 = arith.constant 0 : i32
    %16 = arith.addi %15, %c0_i32 : i32
    %17 = arith.index_cast %16 : i32 to index
    %c0_12 = arith.constant 0 : index
    %18 = vector.load %arg2[%17, %c0_12] : memref<8x128xf32, #tpu.memory_space<vmem>>, vector<1x128xf32>
    %19 = vector.broadcast %18 : vector<1x128xf32> to vector<8x128xf32>
    %20 = arith.addf %14, %19 : vector<8x128xf32>
    %c2_i32_13 = arith.constant 2 : i32
    %21 = arith.muli %arg0, %c2_i32_13 : i32
    %c1_i32 = arith.constant 1 : i32
    %22 = arith.addi %21, %c1_i32 : i32
    %23 = arith.index_cast %22 : i32 to index
    %c0_14 = arith.constant 0 : index
    %24 = vector.load %arg2[%23, %c0_14] : memref<8x128xf32, #tpu.memory_space<vmem>>, vector<1x128xf32>
    %25 = vector.broadcast %24 : vector<1x128xf32> to vector<8x128xf32>
    %26 = arith.addf %14, %25 : vector<8x128xf32>
    %27 = tpu.concatenate %20, %26 in 0 : vector<8x128xf32>, vector<8x128xf32> -> vector<16x128xf32>
    %28 = arith.addf %13, %27 : vector<16x128xf32>
    %c0_15 = arith.constant 0 : index
    %c0_16 = arith.constant 0 : index
    %29 = vector.load %arg8[%c0_15, %c0_16] : memref<1x128xf32, #tpu.memory_space<vmem>>, vector<1x128xf32>
    %c0_17 = arith.constant 0 : index
    %c0_18 = arith.constant 0 : index
    %30 = vector.load %arg9[%c0_17, %c0_18] : memref<1x128xf32, #tpu.memory_space<vmem>>, vector<1x128xf32>
    %cst_19 = arith.constant dense<0.000000e+00> : vector<16xf32>
    %31 = vector.multi_reduction <add>, %28, %cst_19 [1] : vector<16x128xf32> to vector<16xf32>
    %32 = vector.shape_cast %31 : vector<16xf32> to vector<16x1xf32>
    %cst_20 = arith.constant 1.280000e+02 : f32
    %33 = vector.broadcast %cst_20 : f32 to vector<16x1xf32>
    %34 = arith.divf %32, %33 : vector<16x1xf32>
    %35 = vector.broadcast %34 : vector<16x1xf32> to vector<16x128xf32>
    %36 = arith.subf %28, %35 : vector<16x128xf32>
    %37 = arith.mulf %36, %36 : vector<16x128xf32>
    %cst_21 = arith.constant dense<0.000000e+00> : vector<16xf32>
    %38 = vector.multi_reduction <add>, %37, %cst_21 [1] : vector<16x128xf32> to vector<16xf32>
    %39 = vector.shape_cast %38 : vector<16xf32> to vector<16x1xf32>
    %cst_22 = arith.constant 1.280000e+02 : f32
    %40 = vector.broadcast %cst_22 : f32 to vector<16x1xf32>
    %41 = arith.divf %39, %40 : vector<16x1xf32>
    %42 = vector.broadcast %34 : vector<16x1xf32> to vector<16x128xf32>
    %43 = arith.subf %28, %42 : vector<16x128xf32>
    %cst_23 = arith.constant 9.99999996E-13 : f32
    %44 = vector.broadcast %cst_23 : f32 to vector<16x1xf32>
    %45 = arith.addf %41, %44 : vector<16x1xf32>
    %46 = math.rsqrt %45 : vector<16x1xf32>
    %47 = vector.broadcast %46 : vector<16x1xf32> to vector<16x128xf32>
    %48 = arith.mulf %43, %47 : vector<16x128xf32>
    %49 = vector.broadcast %29 : vector<1x128xf32> to vector<16x128xf32>
    %50 = arith.mulf %48, %49 : vector<16x128xf32>
    %51 = vector.broadcast %30 : vector<1x128xf32> to vector<16x128xf32>
    %52 = arith.addf %50, %51 : vector<16x128xf32>
    %c0_24 = arith.constant 0 : index
    %c0_25 = arith.constant 0 : index
    %c0_26 = arith.constant 0 : index
    %53 = vector.load %arg10[%c0_24, %c0_25, %c0_26] : memref<2x128x384xbf16, #tpu.memory_space<vmem>>, vector<1x128x384xbf16>
    %54 = vector.shape_cast %53 : vector<1x128x384xbf16> to vector<128x384xbf16>
    %55 = arith.truncf %52 : vector<16x128xf32> to vector<16x128xbf16>
    %cst_27 = arith.constant dense<0.000000e+00> : vector<16x384xf32>
    %56 = tpu.matmul %55, %54, %cst_27 {dimension_numbers = #tpu.dot_dimension_numbers<[1], [0], [0], [1], [0, 0, 1, 1], [], []>} : vector<16x128xbf16>, vector<128x384xbf16>, vector<16x384xf32> -> vector<16x384xf32>
    %c0_28 = arith.constant 0 : index
    %c0_29 = arith.constant 0 : index
    %c0_30 = arith.constant 0 : index
    %57 = vector.load %arg11[%c0_28, %c0_29, %c0_30] : memref<2x1x384xf32, #tpu.memory_space<vmem>>, vector<1x1x384xf32>
    %58 = vector.shape_cast %57 : vector<1x1x384xf32> to vector<1x384xf32>
    %59 = vector.broadcast %58 : vector<1x384xf32> to vector<16x384xf32>
    %60 = arith.addf %56, %59 : vector<16x384xf32>
    %61 = vector.extract_strided_slice %60 {offsets = [0, 0], sizes = [16, 128], strides = [1, 1]} : vector<16x384xf32> to vector<16x128xf32>
    %62 = vector.extract_strided_slice %61 {offsets = [0, 0], sizes = [8, 32], strides = [1, 1]} : vector<16x128xf32> to vector<8x32xf32>
    %63 = vector.extract_strided_slice %61 {offsets = [0, 32], sizes = [8, 32], strides = [1, 1]} : vector<16x128xf32> to vector<8x32xf32>
    %64 = vector.extract_strided_slice %61 {offsets = [0, 64], sizes = [8, 32], strides = [1, 1]} : vector<16x128xf32> to vector<8x32xf32>
    %65 = vector.extract_strided_slice %61 {offsets = [0, 96], sizes = [8, 32], strides = [1, 1]} : vector<16x128xf32> to vector<8x32xf32>
    %66 = vector.extract_strided_slice %61 {offsets = [8, 0], sizes = [8, 32], strides = [1, 1]} : vector<16x128xf32> to vector<8x32xf32>
    %67 = vector.extract_strided_slice %61 {offsets = [8, 32], sizes = [8, 32], strides = [1, 1]} : vector<16x128xf32> to vector<8x32xf32>
    %68 = vector.extract_strided_slice %61 {offsets = [8, 64], sizes = [8, 32], strides = [1, 1]} : vector<16x128xf32> to vector<8x32xf32>
    %69 = vector.extract_strided_slice %61 {offsets = [8, 96], sizes = [8, 32], strides = [1, 1]} : vector<16x128xf32> to vector<8x32xf32>
    %70 = vector.shape_cast %62 : vector<8x32xf32> to vector<1x8x32xf32>
    %71 = vector.shape_cast %63 : vector<8x32xf32> to vector<1x8x32xf32>
    %72 = vector.shape_cast %64 : vector<8x32xf32> to vector<1x8x32xf32>
    %73 = vector.shape_cast %65 : vector<8x32xf32> to vector<1x8x32xf32>
    %74 = vector.shape_cast %66 : vector<8x32xf32> to vector<1x8x32xf32>
    %75 = vector.shape_cast %67 : vector<8x32xf32> to vector<1x8x32xf32>
    %76 = vector.shape_cast %68 : vector<8x32xf32> to vector<1x8x32xf32>
    %77 = vector.shape_cast %69 : vector<8x32xf32> to vector<1x8x32xf32>
    %78 = tpu.concatenate %70, %71, %72, %73, %74, %75, %76, %77 in 0 : vector<1x8x32xf32>, vector<1x8x32xf32>, vector<1x8x32xf32>, vector<1x8x32xf32>, vector<1x8x32xf32>, vector<1x8x32xf32>, vector<1x8x32xf32>, vector<1x8x32xf32> -> vector<8x8x32xf32>
    %79 = arith.truncf %78 : vector<8x8x32xf32> to vector<8x8x32xbf16>
    %80 = vector.extract_strided_slice %60 {offsets = [0, 128], sizes = [16, 128], strides = [1, 1]} : vector<16x384xf32> to vector<16x128xf32>
    %81 = vector.extract_strided_slice %80 {offsets = [0, 0], sizes = [8, 32], strides = [1, 1]} : vector<16x128xf32> to vector<8x32xf32>
    %82 = vector.extract_strided_slice %80 {offsets = [0, 32], sizes = [8, 32], strides = [1, 1]} : vector<16x128xf32> to vector<8x32xf32>
    %83 = vector.extract_strided_slice %80 {offsets = [0, 64], sizes = [8, 32], strides = [1, 1]} : vector<16x128xf32> to vector<8x32xf32>
    %84 = vector.extract_strided_slice %80 {offsets = [0, 96], sizes = [8, 32], strides = [1, 1]} : vector<16x128xf32> to vector<8x32xf32>
    %85 = vector.extract_strided_slice %80 {offsets = [8, 0], sizes = [8, 32], strides = [1, 1]} : vector<16x128xf32> to vector<8x32xf32>
    %86 = vector.extract_strided_slice %80 {offsets = [8, 32], sizes = [8, 32], strides = [1, 1]} : vector<16x128xf32> to vector<8x32xf32>
    %87 = vector.extract_strided_slice %80 {offsets = [8, 64], sizes = [8, 32], strides = [1, 1]} : vector<16x128xf32> to vector<8x32xf32>
    %88 = vector.extract_strided_slice %80 {offsets = [8, 96], sizes = [8, 32], strides = [1, 1]} : vector<16x128xf32> to vector<8x32xf32>
    %89 = vector.shape_cast %81 : vector<8x32xf32> to vector<1x8x32xf32>
    %90 = vector.shape_cast %82 : vector<8x32xf32> to vector<1x8x32xf32>
    %91 = vector.shape_cast %83 : vector<8x32xf32> to vector<1x8x32xf32>
    %92 = vector.shape_cast %84 : vector<8x32xf32> to vector<1x8x32xf32>
    %93 = vector.shape_cast %85 : vector<8x32xf32> to vector<1x8x32xf32>
    %94 = vector.shape_cast %86 : vector<8x32xf32> to vector<1x8x32xf32>
    %95 = vector.shape_cast %87 : vector<8x32xf32> to vector<1x8x32xf32>
    %96 = vector.shape_cast %88 : vector<8x32xf32> to vector<1x8x32xf32>
    %97 = tpu.concatenate %89, %90, %91, %92, %93, %94, %95, %96 in 0 : vector<1x8x32xf32>, vector<1x8x32xf32>, vector<1x8x32xf32>, vector<1x8x32xf32>, vector<1x8x32xf32>, vector<1x8x32xf32>, vector<1x8x32xf32>, vector<1x8x32xf32> -> vector<8x8x32xf32>
    %98 = arith.truncf %97 : vector<8x8x32xf32> to vector<8x8x32xbf16>
    %99 = vector.extract_strided_slice %60 {offsets = [0, 256], sizes = [16, 128], strides = [1, 1]} : vector<16x384xf32> to vector<16x128xf32>
    %100 = vector.extract_strided_slice %99 {offsets = [0, 0], sizes = [8, 32], strides = [1, 1]} : vector<16x128xf32> to vector<8x32xf32>
    %101 = vector.extract_strided_slice %99 {offsets = [0, 32], sizes = [8, 32], strides = [1, 1]} : vector<16x128xf32> to vector<8x32xf32>
    %102 = vector.extract_strided_slice %99 {offsets = [0, 64], sizes = [8, 32], strides = [1, 1]} : vector<16x128xf32> to vector<8x32xf32>
    %103 = vector.extract_strided_slice %99 {offsets = [0, 96], sizes = [8, 32], strides = [1, 1]} : vector<16x128xf32> to vector<8x32xf32>
    %104 = vector.extract_strided_slice %99 {offsets = [8, 0], sizes = [8, 32], strides = [1, 1]} : vector<16x128xf32> to vector<8x32xf32>
    %105 = vector.extract_strided_slice %99 {offsets = [8, 32], sizes = [8, 32], strides = [1, 1]} : vector<16x128xf32> to vector<8x32xf32>
    %106 = vector.extract_strided_slice %99 {offsets = [8, 64], sizes = [8, 32], strides = [1, 1]} : vector<16x128xf32> to vector<8x32xf32>
    %107 = vector.extract_strided_slice %99 {offsets = [8, 96], sizes = [8, 32], strides = [1, 1]} : vector<16x128xf32> to vector<8x32xf32>
    %108 = vector.shape_cast %100 : vector<8x32xf32> to vector<1x8x32xf32>
    %109 = vector.shape_cast %101 : vector<8x32xf32> to vector<1x8x32xf32>
    %110 = vector.shape_cast %102 : vector<8x32xf32> to vector<1x8x32xf32>
    %111 = vector.shape_cast %103 : vector<8x32xf32> to vector<1x8x32xf32>
    %112 = vector.shape_cast %104 : vector<8x32xf32> to vector<1x8x32xf32>
    %113 = vector.shape_cast %105 : vector<8x32xf32> to vector<1x8x32xf32>
    %114 = vector.shape_cast %106 : vector<8x32xf32> to vector<1x8x32xf32>
    %115 = vector.shape_cast %107 : vector<8x32xf32> to vector<1x8x32xf32>
    %116 = tpu.concatenate %108, %109, %110, %111, %112, %113, %114, %115 in 0 : vector<1x8x32xf32>, vector<1x8x32xf32>, vector<1x8x32xf32>, vector<1x8x32xf32>, vector<1x8x32xf32>, vector<1x8x32xf32>, vector<1x8x32xf32>, vector<1x8x32xf32> -> vector<8x8x32xf32>
    %117 = arith.truncf %116 : vector<8x8x32xf32> to vector<8x8x32xbf16>
    "tpu.trace_start"() <{level = 10 : i32, message = "bqd,bkd->bqk"}> : () -> ()
    %cst_31 = arith.constant dense<0.000000e+00> : vector<8x8x8xf32>
    %118 = tpu.matmul %79, %98, %cst_31 {dimension_numbers = #tpu.dot_dimension_numbers<[2], [2], [1], [1], [0, 0, 0, 1, 1, 1], [0], [0]>} : vector<8x8x32xbf16>, vector<8x8x32xbf16>, vector<8x8x8xf32> -> vector<8x8x8xf32>
    "tpu.trace_stop"() : () -> ()
    %cst_32 = arith.constant dense<0xFF800000> : vector<8x8xf32>
    %119 = vector.multi_reduction <maximumf>, %118, %cst_32 [2] : vector<8x8x8xf32> to vector<8x8xf32>
    %120 = vector.shape_cast %119 : vector<8x8xf32> to vector<8x8x1xf32>
    %121 = vector.broadcast %120 : vector<8x8x1xf32> to vector<8x8x8xf32>
    %122 = arith.subf %118, %121 : vector<8x8x8xf32>
    %123 = math.exp %122 : vector<8x8x8xf32>
    %cst_33 = arith.constant dense<0.000000e+00> : vector<8x8xf32>
    %124 = vector.multi_reduction <add>, %123, %cst_33 [2] : vector<8x8x8xf32> to vector<8x8xf32>
    %125 = vector.shape_cast %124 : vector<8x8xf32> to vector<8x8x1xf32>
    %126 = tpu.reciprocal %125 {approx = true} : vector<8x8x1xf32> -> vector<8x8x1xf32>
    %127 = vector.broadcast %126 : vector<8x8x1xf32> to vector<8x8x8xf32>
    %128 = arith.mulf %123, %127 : vector<8x8x8xf32>
    %129 = arith.truncf %128 : vector<8x8x8xf32> to vector<8x8x8xbf16>
    "tpu.trace_start"() <{level = 10 : i32, message = "bqk,bkd->bqd"}> : () -> ()
    %cst_34 = arith.constant dense<0.000000e+00> : vector<8x8x32xf32>
    %130 = tpu.matmul %129, %117, %cst_34 {dimension_numbers = #tpu.dot_dimension_numbers<[2], [1], [1], [2], [0, 0, 0, 1, 1, 2], [0], [0]>} : vector<8x8x8xbf16>, vector<8x8x32xbf16>, vector<8x8x32xf32> -> vector<8x8x32xf32>
    "tpu.trace_stop"() : () -> ()
    %c0_35 = arith.constant 0 : index
    %c0_36 = arith.constant 0 : index
    %c0_37 = arith.constant 0 : index
    %131 = vector.load %arg12[%c0_35, %c0_36, %c0_37] : memref<2x128x128xbf16, #tpu.memory_space<vmem>>, vector<1x128x128xbf16>
    %132 = vector.shape_cast %131 : vector<1x128x128xbf16> to vector<128x128xbf16>
    %133 = arith.truncf %130 : vector<8x8x32xf32> to vector<8x8x32xbf16>
    %134 = vector.extract_strided_slice %133 {offsets = [0, 0, 0], sizes = [1, 8, 32], strides = [1, 1, 1]} : vector<8x8x32xbf16> to vector<1x8x32xbf16>
    %135 = vector.shape_cast %134 : vector<1x8x32xbf16> to vector<8x32xbf16>
    %136 = vector.extract_strided_slice %132 {offsets = [0, 0], sizes = [32, 128], strides = [1, 1]} : vector<128x128xbf16> to vector<32x128xbf16>
    %cst_38 = arith.constant dense<0.000000e+00> : vector<8x128xf32>
    %137 = tpu.matmul %135, %136, %cst_38 {dimension_numbers = #tpu.dot_dimension_numbers<[1], [0], [0], [1], [0, 0, 1, 1], [], []>} : vector<8x32xbf16>, vector<32x128xbf16>, vector<8x128xf32> -> vector<8x128xf32>
    %138 = vector.extract_strided_slice %133 {offsets = [1, 0, 0], sizes = [1, 8, 32], strides = [1, 1, 1]} : vector<8x8x32xbf16> to vector<1x8x32xbf16>
    %139 = vector.shape_cast %138 : vector<1x8x32xbf16> to vector<8x32xbf16>
    %140 = vector.extract_strided_slice %132 {offsets = [32, 0], sizes = [32, 128], strides = [1, 1]} : vector<128x128xbf16> to vector<32x128xbf16>
    %cst_39 = arith.constant dense<0.000000e+00> : vector<8x128xf32>
    %141 = tpu.matmul %139, %140, %cst_39 {dimension_numbers = #tpu.dot_dimension_numbers<[1], [0], [0], [1], [0, 0, 1, 1], [], []>} : vector<8x32xbf16>, vector<32x128xbf16>, vector<8x128xf32> -> vector<8x128xf32>
    %142 = arith.addf %137, %141 : vector<8x128xf32>
    %143 = vector.extract_strided_slice %133 {offsets = [2, 0, 0], sizes = [1, 8, 32], strides = [1, 1, 1]} : vector<8x8x32xbf16> to vector<1x8x32xbf16>
    %144 = vector.shape_cast %143 : vector<1x8x32xbf16> to vector<8x32xbf16>
    %145 = vector.extract_strided_slice %132 {offsets = [64, 0], sizes = [32, 128], strides = [1, 1]} : vector<128x128xbf16> to vector<32x128xbf16>
    %cst_40 = arith.constant dense<0.000000e+00> : vector<8x128xf32>
    %146 = tpu.matmul %144, %145, %cst_40 {dimension_numbers = #tpu.dot_dimension_numbers<[1], [0], [0], [1], [0, 0, 1, 1], [], []>} : vector<8x32xbf16>, vector<32x128xbf16>, vector<8x128xf32> -> vector<8x128xf32>
    %147 = arith.addf %142, %146 : vector<8x128xf32>
    %148 = vector.extract_strided_slice %133 {offsets = [3, 0, 0], sizes = [1, 8, 32], strides = [1, 1, 1]} : vector<8x8x32xbf16> to vector<1x8x32xbf16>
    %149 = vector.shape_cast %148 : vector<1x8x32xbf16> to vector<8x32xbf16>
    %150 = vector.extract_strided_slice %132 {offsets = [96, 0], sizes = [32, 128], strides = [1, 1]} : vector<128x128xbf16> to vector<32x128xbf16>
    %cst_41 = arith.constant dense<0.000000e+00> : vector<8x128xf32>
    %151 = tpu.matmul %149, %150, %cst_41 {dimension_numbers = #tpu.dot_dimension_numbers<[1], [0], [0], [1], [0, 0, 1, 1], [], []>} : vector<8x32xbf16>, vector<32x128xbf16>, vector<8x128xf32> -> vector<8x128xf32>
    %152 = arith.addf %147, %151 : vector<8x128xf32>
    %153 = vector.extract_strided_slice %133 {offsets = [4, 0, 0], sizes = [1, 8, 32], strides = [1, 1, 1]} : vector<8x8x32xbf16> to vector<1x8x32xbf16>
    %154 = vector.shape_cast %153 : vector<1x8x32xbf16> to vector<8x32xbf16>
    %155 = vector.extract_strided_slice %132 {offsets = [0, 0], sizes = [32, 128], strides = [1, 1]} : vector<128x128xbf16> to vector<32x128xbf16>
    %cst_42 = arith.constant dense<0.000000e+00> : vector<8x128xf32>
    %156 = tpu.matmul %154, %155, %cst_42 {dimension_numbers = #tpu.dot_dimension_numbers<[1], [0], [0], [1], [0, 0, 1, 1], [], []>} : vector<8x32xbf16>, vector<32x128xbf16>, vector<8x128xf32> -> vector<8x128xf32>
    %157 = vector.extract_strided_slice %133 {offsets = [5, 0, 0], sizes = [1, 8, 32], strides = [1, 1, 1]} : vector<8x8x32xbf16> to vector<1x8x32xbf16>
    %158 = vector.shape_cast %157 : vector<1x8x32xbf16> to vector<8x32xbf16>
    %159 = vector.extract_strided_slice %132 {offsets = [32, 0], sizes = [32, 128], strides = [1, 1]} : vector<128x128xbf16> to vector<32x128xbf16>
    %cst_43 = arith.constant dense<0.000000e+00> : vector<8x128xf32>
    %160 = tpu.matmul %158, %159, %cst_43 {dimension_numbers = #tpu.dot_dimension_numbers<[1], [0], [0], [1], [0, 0, 1, 1], [], []>} : vector<8x32xbf16>, vector<32x128xbf16>, vector<8x128xf32> -> vector<8x128xf32>
    %161 = arith.addf %156, %160 : vector<8x128xf32>
    %162 = vector.extract_strided_slice %133 {offsets = [6, 0, 0], sizes = [1, 8, 32], strides = [1, 1, 1]} : vector<8x8x32xbf16> to vector<1x8x32xbf16>
    %163 = vector.shape_cast %162 : vector<1x8x32xbf16> to vector<8x32xbf16>
    %164 = vector.extract_strided_slice %132 {offsets = [64, 0], sizes = [32, 128], strides = [1, 1]} : vector<128x128xbf16> to vector<32x128xbf16>
    %cst_44 = arith.constant dense<0.000000e+00> : vector<8x128xf32>
    %165 = tpu.matmul %163, %164, %cst_44 {dimension_numbers = #tpu.dot_dimension_numbers<[1], [0], [0], [1], [0, 0, 1, 1], [], []>} : vector<8x32xbf16>, vector<32x128xbf16>, vector<8x128xf32> -> vector<8x128xf32>
    %166 = arith.addf %161, %165 : vector<8x128xf32>
    %167 = vector.extract_strided_slice %133 {offsets = [7, 0, 0], sizes = [1, 8, 32], strides = [1, 1, 1]} : vector<8x8x32xbf16> to vector<1x8x32xbf16>
    %168 = vector.shape_cast %167 : vector<1x8x32xbf16> to vector<8x32xbf16>
    %169 = vector.extract_strided_slice %132 {offsets = [96, 0], sizes = [32, 128], strides = [1, 1]} : vector<128x128xbf16> to vector<32x128xbf16>
    %cst_45 = arith.constant dense<0.000000e+00> : vector<8x128xf32>
    %170 = tpu.matmul %168, %169, %cst_45 {dimension_numbers = #tpu.dot_dimension_numbers<[1], [0], [0], [1], [0, 0, 1, 1], [], []>} : vector<8x32xbf16>, vector<32x128xbf16>, vector<8x128xf32> -> vector<8x128xf32>
    %171 = arith.addf %166, %170 : vector<8x128xf32>
    %172 = tpu.concatenate %152, %171 in 0 : vector<8x128xf32>, vector<8x128xf32> -> vector<16x128xf32>
    %c0_46 = arith.constant 0 : index
    %c0_47 = arith.constant 0 : index
    %c0_48 = arith.constant 0 : index
    %173 = vector.load %arg13[%c0_46, %c0_47, %c0_48] : memref<2x1x128xf32, #tpu.memory_space<vmem>>, vector<1x1x128xf32>
    %174 = vector.shape_cast %173 : vector<1x1x128xf32> to vector<1x128xf32>
    %175 = vector.broadcast %174 : vector<1x128xf32> to vector<16x128xf32>
    %176 = arith.addf %172, %175 : vector<16x128xf32>
    %177 = arith.addf %176, %52 : vector<16x128xf32>
    %c0_49 = arith.constant 0 : index
    %c0_50 = arith.constant 0 : index
    %c0_51 = arith.constant 0 : index
    %178 = vector.load %arg14[%c0_49, %c0_50, %c0_51] : memref<2x1x128xf32, #tpu.memory_space<vmem>>, vector<1x1x128xf32>
    %179 = vector.shape_cast %178 : vector<1x1x128xf32> to vector<1x128xf32>
    %c0_52 = arith.constant 0 : index
    %c0_53 = arith.constant 0 : index
    %c0_54 = arith.constant 0 : index
    %180 = vector.load %arg15[%c0_52, %c0_53, %c0_54] : memref<2x1x128xf32, #tpu.memory_space<vmem>>, vector<1x1x128xf32>
    %181 = vector.shape_cast %180 : vector<1x1x128xf32> to vector<1x128xf32>
    %cst_55 = arith.constant dense<0.000000e+00> : vector<16xf32>
    %182 = vector.multi_reduction <add>, %177, %cst_55 [1] : vector<16x128xf32> to vector<16xf32>
    %183 = vector.shape_cast %182 : vector<16xf32> to vector<16x1xf32>
    %cst_56 = arith.constant 1.280000e+02 : f32
    %184 = vector.broadcast %cst_56 : f32 to vector<16x1xf32>
    %185 = arith.divf %183, %184 : vector<16x1xf32>
    %186 = vector.broadcast %185 : vector<16x1xf32> to vector<16x128xf32>
    %187 = arith.subf %177, %186 : vector<16x128xf32>
    %188 = arith.mulf %187, %187 : vector<16x128xf32>
    %cst_57 = arith.constant dense<0.000000e+00> : vector<16xf32>
    %189 = vector.multi_reduction <add>, %188, %cst_57 [1] : vector<16x128xf32> to vector<16xf32>
    %190 = vector.shape_cast %189 : vector<16xf32> to vector<16x1xf32>
    %cst_58 = arith.constant 1.280000e+02 : f32
    %191 = vector.broadcast %cst_58 : f32 to vector<16x1xf32>
    %192 = arith.divf %190, %191 : vector<16x1xf32>
    %193 = vector.broadcast %185 : vector<16x1xf32> to vector<16x128xf32>
    %194 = arith.subf %177, %193 : vector<16x128xf32>
    %cst_59 = arith.constant 9.99999996E-13 : f32
    %195 = vector.broadcast %cst_59 : f32 to vector<16x1xf32>
    %196 = arith.addf %192, %195 : vector<16x1xf32>
    %197 = math.rsqrt %196 : vector<16x1xf32>
    %198 = vector.broadcast %197 : vector<16x1xf32> to vector<16x128xf32>
    %199 = arith.mulf %194, %198 : vector<16x128xf32>
    %200 = vector.broadcast %179 : vector<1x128xf32> to vector<16x128xf32>
    %201 = arith.mulf %199, %200 : vector<16x128xf32>
    %202 = vector.broadcast %181 : vector<1x128xf32> to vector<16x128xf32>
    %203 = arith.addf %201, %202 : vector<16x128xf32>
    %c0_60 = arith.constant 0 : index
    %c0_61 = arith.constant 0 : index
    %c0_62 = arith.constant 0 : index
    %204 = vector.load %arg16[%c0_60, %c0_61, %c0_62] : memref<2x128x512xbf16, #tpu.memory_space<vmem>>, vector<1x128x512xbf16>
    %205 = vector.shape_cast %204 : vector<1x128x512xbf16> to vector<128x512xbf16>
    %206 = arith.truncf %203 : vector<16x128xf32> to vector<16x128xbf16>
    %cst_63 = arith.constant dense<0.000000e+00> : vector<16x512xf32>
    %207 = tpu.matmul %206, %205, %cst_63 {dimension_numbers = #tpu.dot_dimension_numbers<[1], [0], [0], [1], [0, 0, 1, 1], [], []>} : vector<16x128xbf16>, vector<128x512xbf16>, vector<16x512xf32> -> vector<16x512xf32>
    %c0_64 = arith.constant 0 : index
    %c0_65 = arith.constant 0 : index
    %c0_66 = arith.constant 0 : index
    %208 = vector.load %arg17[%c0_64, %c0_65, %c0_66] : memref<2x1x512xf32, #tpu.memory_space<vmem>>, vector<1x1x512xf32>
    %209 = vector.shape_cast %208 : vector<1x1x512xf32> to vector<1x512xf32>
    %210 = vector.broadcast %209 : vector<1x512xf32> to vector<16x512xf32>
    %211 = arith.addf %207, %210 : vector<16x512xf32>
    %cst_67 = arith.constant 5.000000e-01 : f32
    %212 = vector.broadcast %cst_67 : f32 to vector<16x512xf32>
    %213 = arith.mulf %212, %211 : vector<16x512xf32>
    %cst_68 = arith.constant 4.471500e-02 : f32
    %214 = vector.broadcast %cst_68 : f32 to vector<16x512xf32>
    %215 = arith.mulf %214, %211 : vector<16x512xf32>
    %216 = arith.mulf %215, %211 : vector<16x512xf32>
    %217 = arith.mulf %216, %211 : vector<16x512xf32>
    %218 = arith.addf %211, %217 : vector<16x512xf32>
    %cst_69 = arith.constant 0.797884583 : f32
    %219 = vector.broadcast %cst_69 : f32 to vector<16x512xf32>
    %220 = arith.mulf %219, %218 : vector<16x512xf32>
    %221 = math.tanh %220 : vector<16x512xf32>
    %cst_70 = arith.constant 1.000000e+00 : f32
    %222 = vector.broadcast %cst_70 : f32 to vector<16x512xf32>
    %223 = arith.addf %222, %221 : vector<16x512xf32>
    %224 = arith.mulf %213, %223 : vector<16x512xf32>
    %c0_71 = arith.constant 0 : index
    %c0_72 = arith.constant 0 : index
    %c0_73 = arith.constant 0 : index
    %225 = vector.load %arg18[%c0_71, %c0_72, %c0_73] : memref<2x512x128xbf16, #tpu.memory_space<vmem>>, vector<1x512x128xbf16>
    %226 = vector.shape_cast %225 : vector<1x512x128xbf16> to vector<512x128xbf16>
    %227 = arith.truncf %224 : vector<16x512xf32> to vector<16x512xbf16>
    %cst_74 = arith.constant dense<0.000000e+00> : vector<16x128xf32>
    %228 = tpu.matmul %227, %226, %cst_74 {dimension_numbers = #tpu.dot_dimension_numbers<[1], [0], [0], [1], [0, 0, 1, 1], [], []>} : vector<16x512xbf16>, vector<512x128xbf16>, vector<16x128xf32> -> vector<16x128xf32>
    %c0_75 = arith.constant 0 : index
    %c0_76 = arith.constant 0 : index
    %c0_77 = arith.constant 0 : index
    %229 = vector.load %arg19[%c0_75, %c0_76, %c0_77] : memref<2x1x128xf32, #tpu.memory_space<vmem>>, vector<1x1x128xf32>
    %230 = vector.shape_cast %229 : vector<1x1x128xf32> to vector<1x128xf32>
    %231 = vector.broadcast %230 : vector<1x128xf32> to vector<16x128xf32>
    %232 = arith.addf %228, %231 : vector<16x128xf32>
    %233 = arith.addf %232, %203 : vector<16x128xf32>
    %c0_78 = arith.constant 0 : index
    %c0_79 = arith.constant 0 : index
    %c0_80 = arith.constant 0 : index
    %234 = vector.load %arg20[%c0_78, %c0_79, %c0_80] : memref<2x1x128xf32, #tpu.memory_space<vmem>>, vector<1x1x128xf32>
    %235 = vector.shape_cast %234 : vector<1x1x128xf32> to vector<1x128xf32>
    %c0_81 = arith.constant 0 : index
    %c0_82 = arith.constant 0 : index
    %c0_83 = arith.constant 0 : index
    %236 = vector.load %arg21[%c0_81, %c0_82, %c0_83] : memref<2x1x128xf32, #tpu.memory_space<vmem>>, vector<1x1x128xf32>
    %237 = vector.shape_cast %236 : vector<1x1x128xf32> to vector<1x128xf32>
    %cst_84 = arith.constant dense<0.000000e+00> : vector<16xf32>
    %238 = vector.multi_reduction <add>, %233, %cst_84 [1] : vector<16x128xf32> to vector<16xf32>
    %239 = vector.shape_cast %238 : vector<16xf32> to vector<16x1xf32>
    %cst_85 = arith.constant 1.280000e+02 : f32
    %240 = vector.broadcast %cst_85 : f32 to vector<16x1xf32>
    %241 = arith.divf %239, %240 : vector<16x1xf32>
    %242 = vector.broadcast %241 : vector<16x1xf32> to vector<16x128xf32>
    %243 = arith.subf %233, %242 : vector<16x128xf32>
    %244 = arith.mulf %243, %243 : vector<16x128xf32>
    %cst_86 = arith.constant dense<0.000000e+00> : vector<16xf32>
    %245 = vector.multi_reduction <add>, %244, %cst_86 [1] : vector<16x128xf32> to vector<16xf32>
    %246 = vector.shape_cast %245 : vector<16xf32> to vector<16x1xf32>
    %cst_87 = arith.constant 1.280000e+02 : f32
    %247 = vector.broadcast %cst_87 : f32 to vector<16x1xf32>
    %248 = arith.divf %246, %247 : vector<16x1xf32>
    %249 = vector.broadcast %241 : vector<16x1xf32> to vector<16x128xf32>
    %250 = arith.subf %233, %249 : vector<16x128xf32>
    %cst_88 = arith.constant 9.99999996E-13 : f32
    %251 = vector.broadcast %cst_88 : f32 to vector<16x1xf32>
    %252 = arith.addf %248, %251 : vector<16x1xf32>
    %253 = math.rsqrt %252 : vector<16x1xf32>
    %254 = vector.broadcast %253 : vector<16x1xf32> to vector<16x128xf32>
    %255 = arith.mulf %250, %254 : vector<16x128xf32>
    %256 = vector.broadcast %235 : vector<1x128xf32> to vector<16x128xf32>
    %257 = arith.mulf %255, %256 : vector<16x128xf32>
    %258 = vector.broadcast %237 : vector<1x128xf32> to vector<16x128xf32>
    %259 = arith.addf %257, %258 : vector<16x128xf32>
    %c1 = arith.constant 1 : index
    %c0_89 = arith.constant 0 : index
    %c0_90 = arith.constant 0 : index
    %260 = vector.load %arg10[%c1, %c0_89, %c0_90] : memref<2x128x384xbf16, #tpu.memory_space<vmem>>, vector<1x128x384xbf16>
    %261 = vector.shape_cast %260 : vector<1x128x384xbf16> to vector<128x384xbf16>
    %262 = arith.truncf %259 : vector<16x128xf32> to vector<16x128xbf16>
    %cst_91 = arith.constant dense<0.000000e+00> : vector<16x384xf32>
    %263 = tpu.matmul %262, %261, %cst_91 {dimension_numbers = #tpu.dot_dimension_numbers<[1], [0], [0], [1], [0, 0, 1, 1], [], []>} : vector<16x128xbf16>, vector<128x384xbf16>, vector<16x384xf32> -> vector<16x384xf32>
    %c1_92 = arith.constant 1 : index
    %c0_93 = arith.constant 0 : index
    %c0_94 = arith.constant 0 : index
    %264 = vector.load %arg11[%c1_92, %c0_93, %c0_94] : memref<2x1x384xf32, #tpu.memory_space<vmem>>, vector<1x1x384xf32>
    %265 = vector.shape_cast %264 : vector<1x1x384xf32> to vector<1x384xf32>
    %266 = vector.broadcast %265 : vector<1x384xf32> to vector<16x384xf32>
    %267 = arith.addf %263, %266 : vector<16x384xf32>
    %268 = vector.extract_strided_slice %267 {offsets = [0, 0], sizes = [16, 128], strides = [1, 1]} : vector<16x384xf32> to vector<16x128xf32>
    %269 = vector.extract_strided_slice %268 {offsets = [0, 0], sizes = [8, 32], strides = [1, 1]} : vector<16x128xf32> to vector<8x32xf32>
    %270 = vector.extract_strided_slice %268 {offsets = [0, 32], sizes = [8, 32], strides = [1, 1]} : vector<16x128xf32> to vector<8x32xf32>
    %271 = vector.extract_strided_slice %268 {offsets = [0, 64], sizes = [8, 32], strides = [1, 1]} : vector<16x128xf32> to vector<8x32xf32>
    %272 = vector.extract_strided_slice %268 {offsets = [0, 96], sizes = [8, 32], strides = [1, 1]} : vector<16x128xf32> to vector<8x32xf32>
    %273 = vector.extract_strided_slice %268 {offsets = [8, 0], sizes = [8, 32], strides = [1, 1]} : vector<16x128xf32> to vector<8x32xf32>
    %274 = vector.extract_strided_slice %268 {offsets = [8, 32], sizes = [8, 32], strides = [1, 1]} : vector<16x128xf32> to vector<8x32xf32>
    %275 = vector.extract_strided_slice %268 {offsets = [8, 64], sizes = [8, 32], strides = [1, 1]} : vector<16x128xf32> to vector<8x32xf32>
    %276 = vector.extract_strided_slice %268 {offsets = [8, 96], sizes = [8, 32], strides = [1, 1]} : vector<16x128xf32> to vector<8x32xf32>
    %277 = vector.shape_cast %269 : vector<8x32xf32> to vector<1x8x32xf32>
    %278 = vector.shape_cast %270 : vector<8x32xf32> to vector<1x8x32xf32>
    %279 = vector.shape_cast %271 : vector<8x32xf32> to vector<1x8x32xf32>
    %280 = vector.shape_cast %272 : vector<8x32xf32> to vector<1x8x32xf32>
    %281 = vector.shape_cast %273 : vector<8x32xf32> to vector<1x8x32xf32>
    %282 = vector.shape_cast %274 : vector<8x32xf32> to vector<1x8x32xf32>
    %283 = vector.shape_cast %275 : vector<8x32xf32> to vector<1x8x32xf32>
    %284 = vector.shape_cast %276 : vector<8x32xf32> to vector<1x8x32xf32>
    %285 = tpu.concatenate %277, %278, %279, %280, %281, %282, %283, %284 in 0 : vector<1x8x32xf32>, vector<1x8x32xf32>, vector<1x8x32xf32>, vector<1x8x32xf32>, vector<1x8x32xf32>, vector<1x8x32xf32>, vector<1x8x32xf32>, vector<1x8x32xf32> -> vector<8x8x32xf32>
    %286 = arith.truncf %285 : vector<8x8x32xf32> to vector<8x8x32xbf16>
    %287 = vector.extract_strided_slice %267 {offsets = [0, 128], sizes = [16, 128], strides = [1, 1]} : vector<16x384xf32> to vector<16x128xf32>
    %288 = vector.extract_strided_slice %287 {offsets = [0, 0], sizes = [8, 32], strides = [1, 1]} : vector<16x128xf32> to vector<8x32xf32>
    %289 = vector.extract_strided_slice %287 {offsets = [0, 32], sizes = [8, 32], strides = [1, 1]} : vector<16x128xf32> to vector<8x32xf32>
    %290 = vector.extract_strided_slice %287 {offsets = [0, 64], sizes = [8, 32], strides = [1, 1]} : vector<16x128xf32> to vector<8x32xf32>
    %291 = vector.extract_strided_slice %287 {offsets = [0, 96], sizes = [8, 32], strides = [1, 1]} : vector<16x128xf32> to vector<8x32xf32>
    %292 = vector.extract_strided_slice %287 {offsets = [8, 0], sizes = [8, 32], strides = [1, 1]} : vector<16x128xf32> to vector<8x32xf32>
    %293 = vector.extract_strided_slice %287 {offsets = [8, 32], sizes = [8, 32], strides = [1, 1]} : vector<16x128xf32> to vector<8x32xf32>
    %294 = vector.extract_strided_slice %287 {offsets = [8, 64], sizes = [8, 32], strides = [1, 1]} : vector<16x128xf32> to vector<8x32xf32>
    %295 = vector.extract_strided_slice %287 {offsets = [8, 96], sizes = [8, 32], strides = [1, 1]} : vector<16x128xf32> to vector<8x32xf32>
    %296 = vector.shape_cast %288 : vector<8x32xf32> to vector<1x8x32xf32>
    %297 = vector.shape_cast %289 : vector<8x32xf32> to vector<1x8x32xf32>
    %298 = vector.shape_cast %290 : vector<8x32xf32> to vector<1x8x32xf32>
    %299 = vector.shape_cast %291 : vector<8x32xf32> to vector<1x8x32xf32>
    %300 = vector.shape_cast %292 : vector<8x32xf32> to vector<1x8x32xf32>
    %301 = vector.shape_cast %293 : vector<8x32xf32> to vector<1x8x32xf32>
    %302 = vector.shape_cast %294 : vector<8x32xf32> to vector<1x8x32xf32>
    %303 = vector.shape_cast %295 : vector<8x32xf32> to vector<1x8x32xf32>
    %304 = tpu.concatenate %296, %297, %298, %299, %300, %301, %302, %303 in 0 : vector<1x8x32xf32>, vector<1x8x32xf32>, vector<1x8x32xf32>, vector<1x8x32xf32>, vector<1x8x32xf32>, vector<1x8x32xf32>, vector<1x8x32xf32>, vector<1x8x32xf32> -> vector<8x8x32xf32>
    %305 = arith.truncf %304 : vector<8x8x32xf32> to vector<8x8x32xbf16>
    %306 = vector.extract_strided_slice %267 {offsets = [0, 256], sizes = [16, 128], strides = [1, 1]} : vector<16x384xf32> to vector<16x128xf32>
    %307 = vector.extract_strided_slice %306 {offsets = [0, 0], sizes = [8, 32], strides = [1, 1]} : vector<16x128xf32> to vector<8x32xf32>
    %308 = vector.extract_strided_slice %306 {offsets = [0, 32], sizes = [8, 32], strides = [1, 1]} : vector<16x128xf32> to vector<8x32xf32>
    %309 = vector.extract_strided_slice %306 {offsets = [0, 64], sizes = [8, 32], strides = [1, 1]} : vector<16x128xf32> to vector<8x32xf32>
    %310 = vector.extract_strided_slice %306 {offsets = [0, 96], sizes = [8, 32], strides = [1, 1]} : vector<16x128xf32> to vector<8x32xf32>
    %311 = vector.extract_strided_slice %306 {offsets = [8, 0], sizes = [8, 32], strides = [1, 1]} : vector<16x128xf32> to vector<8x32xf32>
    %312 = vector.extract_strided_slice %306 {offsets = [8, 32], sizes = [8, 32], strides = [1, 1]} : vector<16x128xf32> to vector<8x32xf32>
    %313 = vector.extract_strided_slice %306 {offsets = [8, 64], sizes = [8, 32], strides = [1, 1]} : vector<16x128xf32> to vector<8x32xf32>
    %314 = vector.extract_strided_slice %306 {offsets = [8, 96], sizes = [8, 32], strides = [1, 1]} : vector<16x128xf32> to vector<8x32xf32>
    %315 = vector.shape_cast %307 : vector<8x32xf32> to vector<1x8x32xf32>
    %316 = vector.shape_cast %308 : vector<8x32xf32> to vector<1x8x32xf32>
    %317 = vector.shape_cast %309 : vector<8x32xf32> to vector<1x8x32xf32>
    %318 = vector.shape_cast %310 : vector<8x32xf32> to vector<1x8x32xf32>
    %319 = vector.shape_cast %311 : vector<8x32xf32> to vector<1x8x32xf32>
    %320 = vector.shape_cast %312 : vector<8x32xf32> to vector<1x8x32xf32>
    %321 = vector.shape_cast %313 : vector<8x32xf32> to vector<1x8x32xf32>
    %322 = vector.shape_cast %314 : vector<8x32xf32> to vector<1x8x32xf32>
    %323 = tpu.concatenate %315, %316, %317, %318, %319, %320, %321, %322 in 0 : vector<1x8x32xf32>, vector<1x8x32xf32>, vector<1x8x32xf32>, vector<1x8x32xf32>, vector<1x8x32xf32>, vector<1x8x32xf32>, vector<1x8x32xf32>, vector<1x8x32xf32> -> vector<8x8x32xf32>
    %324 = arith.truncf %323 : vector<8x8x32xf32> to vector<8x8x32xbf16>
    "tpu.trace_start"() <{level = 10 : i32, message = "bqd,bkd->bqk"}> : () -> ()
    %cst_95 = arith.constant dense<0.000000e+00> : vector<8x8x8xf32>
    %325 = tpu.matmul %286, %305, %cst_95 {dimension_numbers = #tpu.dot_dimension_numbers<[2], [2], [1], [1], [0, 0, 0, 1, 1, 1], [0], [0]>} : vector<8x8x32xbf16>, vector<8x8x32xbf16>, vector<8x8x8xf32> -> vector<8x8x8xf32>
    "tpu.trace_stop"() : () -> ()
    %cst_96 = arith.constant dense<0xFF800000> : vector<8x8xf32>
    %326 = vector.multi_reduction <maximumf>, %325, %cst_96 [2] : vector<8x8x8xf32> to vector<8x8xf32>
    %327 = vector.shape_cast %326 : vector<8x8xf32> to vector<8x8x1xf32>
    %328 = vector.broadcast %327 : vector<8x8x1xf32> to vector<8x8x8xf32>
    %329 = arith.subf %325, %328 : vector<8x8x8xf32>
    %330 = math.exp %329 : vector<8x8x8xf32>
    %cst_97 = arith.constant dense<0.000000e+00> : vector<8x8xf32>
    %331 = vector.multi_reduction <add>, %330, %cst_97 [2] : vector<8x8x8xf32> to vector<8x8xf32>
    %332 = vector.shape_cast %331 : vector<8x8xf32> to vector<8x8x1xf32>
    %333 = tpu.reciprocal %332 {approx = true} : vector<8x8x1xf32> -> vector<8x8x1xf32>
    %334 = vector.broadcast %333 : vector<8x8x1xf32> to vector<8x8x8xf32>
    %335 = arith.mulf %330, %334 : vector<8x8x8xf32>
    %336 = arith.truncf %335 : vector<8x8x8xf32> to vector<8x8x8xbf16>
    "tpu.trace_start"() <{level = 10 : i32, message = "bqk,bkd->bqd"}> : () -> ()
    %cst_98 = arith.constant dense<0.000000e+00> : vector<8x8x32xf32>
    %337 = tpu.matmul %336, %324, %cst_98 {dimension_numbers = #tpu.dot_dimension_numbers<[2], [1], [1], [2], [0, 0, 0, 1, 1, 2], [0], [0]>} : vector<8x8x8xbf16>, vector<8x8x32xbf16>, vector<8x8x32xf32> -> vector<8x8x32xf32>
    "tpu.trace_stop"() : () -> ()
    %c1_99 = arith.constant 1 : index
    %c0_100 = arith.constant 0 : index
    %c0_101 = arith.constant 0 : index
    %338 = vector.load %arg12[%c1_99, %c0_100, %c0_101] : memref<2x128x128xbf16, #tpu.memory_space<vmem>>, vector<1x128x128xbf16>
    %339 = vector.shape_cast %338 : vector<1x128x128xbf16> to vector<128x128xbf16>
    %340 = arith.truncf %337 : vector<8x8x32xf32> to vector<8x8x32xbf16>
    %341 = vector.extract_strided_slice %340 {offsets = [0, 0, 0], sizes = [1, 8, 32], strides = [1, 1, 1]} : vector<8x8x32xbf16> to vector<1x8x32xbf16>
    %342 = vector.shape_cast %341 : vector<1x8x32xbf16> to vector<8x32xbf16>
    %343 = vector.extract_strided_slice %339 {offsets = [0, 0], sizes = [32, 128], strides = [1, 1]} : vector<128x128xbf16> to vector<32x128xbf16>
    %cst_102 = arith.constant dense<0.000000e+00> : vector<8x128xf32>
    %344 = tpu.matmul %342, %343, %cst_102 {dimension_numbers = #tpu.dot_dimension_numbers<[1], [0], [0], [1], [0, 0, 1, 1], [], []>} : vector<8x32xbf16>, vector<32x128xbf16>, vector<8x128xf32> -> vector<8x128xf32>
    %345 = vector.extract_strided_slice %340 {offsets = [1, 0, 0], sizes = [1, 8, 32], strides = [1, 1, 1]} : vector<8x8x32xbf16> to vector<1x8x32xbf16>
    %346 = vector.shape_cast %345 : vector<1x8x32xbf16> to vector<8x32xbf16>
    %347 = vector.extract_strided_slice %339 {offsets = [32, 0], sizes = [32, 128], strides = [1, 1]} : vector<128x128xbf16> to vector<32x128xbf16>
    %cst_103 = arith.constant dense<0.000000e+00> : vector<8x128xf32>
    %348 = tpu.matmul %346, %347, %cst_103 {dimension_numbers = #tpu.dot_dimension_numbers<[1], [0], [0], [1], [0, 0, 1, 1], [], []>} : vector<8x32xbf16>, vector<32x128xbf16>, vector<8x128xf32> -> vector<8x128xf32>
    %349 = arith.addf %344, %348 : vector<8x128xf32>
    %350 = vector.extract_strided_slice %340 {offsets = [2, 0, 0], sizes = [1, 8, 32], strides = [1, 1, 1]} : vector<8x8x32xbf16> to vector<1x8x32xbf16>
    %351 = vector.shape_cast %350 : vector<1x8x32xbf16> to vector<8x32xbf16>
    %352 = vector.extract_strided_slice %339 {offsets = [64, 0], sizes = [32, 128], strides = [1, 1]} : vector<128x128xbf16> to vector<32x128xbf16>
    %cst_104 = arith.constant dense<0.000000e+00> : vector<8x128xf32>
    %353 = tpu.matmul %351, %352, %cst_104 {dimension_numbers = #tpu.dot_dimension_numbers<[1], [0], [0], [1], [0, 0, 1, 1], [], []>} : vector<8x32xbf16>, vector<32x128xbf16>, vector<8x128xf32> -> vector<8x128xf32>
    %354 = arith.addf %349, %353 : vector<8x128xf32>
    %355 = vector.extract_strided_slice %340 {offsets = [3, 0, 0], sizes = [1, 8, 32], strides = [1, 1, 1]} : vector<8x8x32xbf16> to vector<1x8x32xbf16>
    %356 = vector.shape_cast %355 : vector<1x8x32xbf16> to vector<8x32xbf16>
    %357 = vector.extract_strided_slice %339 {offsets = [96, 0], sizes = [32, 128], strides = [1, 1]} : vector<128x128xbf16> to vector<32x128xbf16>
    %cst_105 = arith.constant dense<0.000000e+00> : vector<8x128xf32>
    %358 = tpu.matmul %356, %357, %cst_105 {dimension_numbers = #tpu.dot_dimension_numbers<[1], [0], [0], [1], [0, 0, 1, 1], [], []>} : vector<8x32xbf16>, vector<32x128xbf16>, vector<8x128xf32> -> vector<8x128xf32>
    %359 = arith.addf %354, %358 : vector<8x128xf32>
    %360 = vector.extract_strided_slice %340 {offsets = [4, 0, 0], sizes = [1, 8, 32], strides = [1, 1, 1]} : vector<8x8x32xbf16> to vector<1x8x32xbf16>
    %361 = vector.shape_cast %360 : vector<1x8x32xbf16> to vector<8x32xbf16>
    %362 = vector.extract_strided_slice %339 {offsets = [0, 0], sizes = [32, 128], strides = [1, 1]} : vector<128x128xbf16> to vector<32x128xbf16>
    %cst_106 = arith.constant dense<0.000000e+00> : vector<8x128xf32>
    %363 = tpu.matmul %361, %362, %cst_106 {dimension_numbers = #tpu.dot_dimension_numbers<[1], [0], [0], [1], [0, 0, 1, 1], [], []>} : vector<8x32xbf16>, vector<32x128xbf16>, vector<8x128xf32> -> vector<8x128xf32>
    %364 = vector.extract_strided_slice %340 {offsets = [5, 0, 0], sizes = [1, 8, 32], strides = [1, 1, 1]} : vector<8x8x32xbf16> to vector<1x8x32xbf16>
    %365 = vector.shape_cast %364 : vector<1x8x32xbf16> to vector<8x32xbf16>
    %366 = vector.extract_strided_slice %339 {offsets = [32, 0], sizes = [32, 128], strides = [1, 1]} : vector<128x128xbf16> to vector<32x128xbf16>
    %cst_107 = arith.constant dense<0.000000e+00> : vector<8x128xf32>
    %367 = tpu.matmul %365, %366, %cst_107 {dimension_numbers = #tpu.dot_dimension_numbers<[1], [0], [0], [1], [0, 0, 1, 1], [], []>} : vector<8x32xbf16>, vector<32x128xbf16>, vector<8x128xf32> -> vector<8x128xf32>
    %368 = arith.addf %363, %367 : vector<8x128xf32>
    %369 = vector.extract_strided_slice %340 {offsets = [6, 0, 0], sizes = [1, 8, 32], strides = [1, 1, 1]} : vector<8x8x32xbf16> to vector<1x8x32xbf16>
    %370 = vector.shape_cast %369 : vector<1x8x32xbf16> to vector<8x32xbf16>
    %371 = vector.extract_strided_slice %339 {offsets = [64, 0], sizes = [32, 128], strides = [1, 1]} : vector<128x128xbf16> to vector<32x128xbf16>
    %cst_108 = arith.constant dense<0.000000e+00> : vector<8x128xf32>
    %372 = tpu.matmul %370, %371, %cst_108 {dimension_numbers = #tpu.dot_dimension_numbers<[1], [0], [0], [1], [0, 0, 1, 1], [], []>} : vector<8x32xbf16>, vector<32x128xbf16>, vector<8x128xf32> -> vector<8x128xf32>
    %373 = arith.addf %368, %372 : vector<8x128xf32>
    %374 = vector.extract_strided_slice %340 {offsets = [7, 0, 0], sizes = [1, 8, 32], strides = [1, 1, 1]} : vector<8x8x32xbf16> to vector<1x8x32xbf16>
    %375 = vector.shape_cast %374 : vector<1x8x32xbf16> to vector<8x32xbf16>
    %376 = vector.extract_strided_slice %339 {offsets = [96, 0], sizes = [32, 128], strides = [1, 1]} : vector<128x128xbf16> to vector<32x128xbf16>
    %cst_109 = arith.constant dense<0.000000e+00> : vector<8x128xf32>
    %377 = tpu.matmul %375, %376, %cst_109 {dimension_numbers = #tpu.dot_dimension_numbers<[1], [0], [0], [1], [0, 0, 1, 1], [], []>} : vector<8x32xbf16>, vector<32x128xbf16>, vector<8x128xf32> -> vector<8x128xf32>
    %378 = arith.addf %373, %377 : vector<8x128xf32>
    %379 = tpu.concatenate %359, %378 in 0 : vector<8x128xf32>, vector<8x128xf32> -> vector<16x128xf32>
    %c1_110 = arith.constant 1 : index
    %c0_111 = arith.constant 0 : index
    %c0_112 = arith.constant 0 : index
    %380 = vector.load %arg13[%c1_110, %c0_111, %c0_112] : memref<2x1x128xf32, #tpu.memory_space<vmem>>, vector<1x1x128xf32>
    %381 = vector.shape_cast %380 : vector<1x1x128xf32> to vector<1x128xf32>
    %382 = vector.broadcast %381 : vector<1x128xf32> to vector<16x128xf32>
    %383 = arith.addf %379, %382 : vector<16x128xf32>
    %384 = arith.addf %383, %259 : vector<16x128xf32>
    %c1_113 = arith.constant 1 : index
    %c0_114 = arith.constant 0 : index
    %c0_115 = arith.constant 0 : index
    %385 = vector.load %arg14[%c1_113, %c0_114, %c0_115] : memref<2x1x128xf32, #tpu.memory_space<vmem>>, vector<1x1x128xf32>
    %386 = vector.shape_cast %385 : vector<1x1x128xf32> to vector<1x128xf32>
    %c1_116 = arith.constant 1 : index
    %c0_117 = arith.constant 0 : index
    %c0_118 = arith.constant 0 : index
    %387 = vector.load %arg15[%c1_116, %c0_117, %c0_118] : memref<2x1x128xf32, #tpu.memory_space<vmem>>, vector<1x1x128xf32>
    %388 = vector.shape_cast %387 : vector<1x1x128xf32> to vector<1x128xf32>
    %cst_119 = arith.constant dense<0.000000e+00> : vector<16xf32>
    %389 = vector.multi_reduction <add>, %384, %cst_119 [1] : vector<16x128xf32> to vector<16xf32>
    %390 = vector.shape_cast %389 : vector<16xf32> to vector<16x1xf32>
    %cst_120 = arith.constant 1.280000e+02 : f32
    %391 = vector.broadcast %cst_120 : f32 to vector<16x1xf32>
    %392 = arith.divf %390, %391 : vector<16x1xf32>
    %393 = vector.broadcast %392 : vector<16x1xf32> to vector<16x128xf32>
    %394 = arith.subf %384, %393 : vector<16x128xf32>
    %395 = arith.mulf %394, %394 : vector<16x128xf32>
    %cst_121 = arith.constant dense<0.000000e+00> : vector<16xf32>
    %396 = vector.multi_reduction <add>, %395, %cst_121 [1] : vector<16x128xf32> to vector<16xf32>
    %397 = vector.shape_cast %396 : vector<16xf32> to vector<16x1xf32>
    %cst_122 = arith.constant 1.280000e+02 : f32
    %398 = vector.broadcast %cst_122 : f32 to vector<16x1xf32>
    %399 = arith.divf %397, %398 : vector<16x1xf32>
    %400 = vector.broadcast %392 : vector<16x1xf32> to vector<16x128xf32>
    %401 = arith.subf %384, %400 : vector<16x128xf32>
    %cst_123 = arith.constant 9.99999996E-13 : f32
    %402 = vector.broadcast %cst_123 : f32 to vector<16x1xf32>
    %403 = arith.addf %399, %402 : vector<16x1xf32>
    %404 = math.rsqrt %403 : vector<16x1xf32>
    %405 = vector.broadcast %404 : vector<16x1xf32> to vector<16x128xf32>
    %406 = arith.mulf %401, %405 : vector<16x128xf32>
    %407 = vector.broadcast %386 : vector<1x128xf32> to vector<16x128xf32>
    %408 = arith.mulf %406, %407 : vector<16x128xf32>
    %409 = vector.broadcast %388 : vector<1x128xf32> to vector<16x128xf32>
    %410 = arith.addf %408, %409 : vector<16x128xf32>
    %c1_124 = arith.constant 1 : index
    %c0_125 = arith.constant 0 : index
    %c0_126 = arith.constant 0 : index
    %411 = vector.load %arg16[%c1_124, %c0_125, %c0_126] : memref<2x128x512xbf16, #tpu.memory_space<vmem>>, vector<1x128x512xbf16>
    %412 = vector.shape_cast %411 : vector<1x128x512xbf16> to vector<128x512xbf16>
    %413 = arith.truncf %410 : vector<16x128xf32> to vector<16x128xbf16>
    %cst_127 = arith.constant dense<0.000000e+00> : vector<16x512xf32>
    %414 = tpu.matmul %413, %412, %cst_127 {dimension_numbers = #tpu.dot_dimension_numbers<[1], [0], [0], [1], [0, 0, 1, 1], [], []>} : vector<16x128xbf16>, vector<128x512xbf16>, vector<16x512xf32> -> vector<16x512xf32>
    %c1_128 = arith.constant 1 : index
    %c0_129 = arith.constant 0 : index
    %c0_130 = arith.constant 0 : index
    %415 = vector.load %arg17[%c1_128, %c0_129, %c0_130] : memref<2x1x512xf32, #tpu.memory_space<vmem>>, vector<1x1x512xf32>
    %416 = vector.shape_cast %415 : vector<1x1x512xf32> to vector<1x512xf32>
    %417 = vector.broadcast %416 : vector<1x512xf32> to vector<16x512xf32>
    %418 = arith.addf %414, %417 : vector<16x512xf32>
    %cst_131 = arith.constant 5.000000e-01 : f32
    %419 = vector.broadcast %cst_131 : f32 to vector<16x512xf32>
    %420 = arith.mulf %419, %418 : vector<16x512xf32>
    %cst_132 = arith.constant 4.471500e-02 : f32
    %421 = vector.broadcast %cst_132 : f32 to vector<16x512xf32>
    %422 = arith.mulf %421, %418 : vector<16x512xf32>
    %423 = arith.mulf %422, %418 : vector<16x512xf32>
    %424 = arith.mulf %423, %418 : vector<16x512xf32>
    %425 = arith.addf %418, %424 : vector<16x512xf32>
    %cst_133 = arith.constant 0.797884583 : f32
    %426 = vector.broadcast %cst_133 : f32 to vector<16x512xf32>
    %427 = arith.mulf %426, %425 : vector<16x512xf32>
    %428 = math.tanh %427 : vector<16x512xf32>
    %cst_134 = arith.constant 1.000000e+00 : f32
    %429 = vector.broadcast %cst_134 : f32 to vector<16x512xf32>
    %430 = arith.addf %429, %428 : vector<16x512xf32>
    %431 = arith.mulf %420, %430 : vector<16x512xf32>
    %c1_135 = arith.constant 1 : index
    %c0_136 = arith.constant 0 : index
    %c0_137 = arith.constant 0 : index
    %432 = vector.load %arg18[%c1_135, %c0_136, %c0_137] : memref<2x512x128xbf16, #tpu.memory_space<vmem>>, vector<1x512x128xbf16>
    %433 = vector.shape_cast %432 : vector<1x512x128xbf16> to vector<512x128xbf16>
    %434 = arith.truncf %431 : vector<16x512xf32> to vector<16x512xbf16>
    %cst_138 = arith.constant dense<0.000000e+00> : vector<16x128xf32>
    %435 = tpu.matmul %434, %433, %cst_138 {dimension_numbers = #tpu.dot_dimension_numbers<[1], [0], [0], [1], [0, 0, 1, 1], [], []>} : vector<16x512xbf16>, vector<512x128xbf16>, vector<16x128xf32> -> vector<16x128xf32>
    %c1_139 = arith.constant 1 : index
    %c0_140 = arith.constant 0 : index
    %c0_141 = arith.constant 0 : index
    %436 = vector.load %arg19[%c1_139, %c0_140, %c0_141] : memref<2x1x128xf32, #tpu.memory_space<vmem>>, vector<1x1x128xf32>
    %437 = vector.shape_cast %436 : vector<1x1x128xf32> to vector<1x128xf32>
    %438 = vector.broadcast %437 : vector<1x128xf32> to vector<16x128xf32>
    %439 = arith.addf %435, %438 : vector<16x128xf32>
    %440 = arith.addf %439, %410 : vector<16x128xf32>
    %c1_142 = arith.constant 1 : index
    %c0_143 = arith.constant 0 : index
    %c0_144 = arith.constant 0 : index
    %441 = vector.load %arg20[%c1_142, %c0_143, %c0_144] : memref<2x1x128xf32, #tpu.memory_space<vmem>>, vector<1x1x128xf32>
    %442 = vector.shape_cast %441 : vector<1x1x128xf32> to vector<1x128xf32>
    %c1_145 = arith.constant 1 : index
    %c0_146 = arith.constant 0 : index
    %c0_147 = arith.constant 0 : index
    %443 = vector.load %arg21[%c1_145, %c0_146, %c0_147] : memref<2x1x128xf32, #tpu.memory_space<vmem>>, vector<1x1x128xf32>
    %444 = vector.shape_cast %443 : vector<1x1x128xf32> to vector<1x128xf32>
    %cst_148 = arith.constant dense<0.000000e+00> : vector<16xf32>
    %445 = vector.multi_reduction <add>, %440, %cst_148 [1] : vector<16x128xf32> to vector<16xf32>
    %446 = vector.shape_cast %445 : vector<16xf32> to vector<16x1xf32>
    %cst_149 = arith.constant 1.280000e+02 : f32
    %447 = vector.broadcast %cst_149 : f32 to vector<16x1xf32>
    %448 = arith.divf %446, %447 : vector<16x1xf32>
    %449 = vector.broadcast %448 : vector<16x1xf32> to vector<16x128xf32>
    %450 = arith.subf %440, %449 : vector<16x128xf32>
    %451 = arith.mulf %450, %450 : vector<16x128xf32>
    %cst_150 = arith.constant dense<0.000000e+00> : vector<16xf32>
    %452 = vector.multi_reduction <add>, %451, %cst_150 [1] : vector<16x128xf32> to vector<16xf32>
    %453 = vector.shape_cast %452 : vector<16xf32> to vector<16x1xf32>
    %cst_151 = arith.constant 1.280000e+02 : f32
    %454 = vector.broadcast %cst_151 : f32 to vector<16x1xf32>
    %455 = arith.divf %453, %454 : vector<16x1xf32>
    %456 = vector.broadcast %448 : vector<16x1xf32> to vector<16x128xf32>
    %457 = arith.subf %440, %456 : vector<16x128xf32>
    %cst_152 = arith.constant 9.99999996E-13 : f32
    %458 = vector.broadcast %cst_152 : f32 to vector<16x1xf32>
    %459 = arith.addf %455, %458 : vector<16x1xf32>
    %460 = math.rsqrt %459 : vector<16x1xf32>
    %461 = vector.broadcast %460 : vector<16x1xf32> to vector<16x128xf32>
    %462 = arith.mulf %457, %461 : vector<16x128xf32>
    %463 = vector.broadcast %442 : vector<1x128xf32> to vector<16x128xf32>
    %464 = arith.mulf %462, %463 : vector<16x128xf32>
    %465 = vector.broadcast %444 : vector<1x128xf32> to vector<16x128xf32>
    %466 = arith.addf %464, %465 : vector<16x128xf32>
    %c0_153 = arith.constant 0 : index
    %c0_154 = arith.constant 0 : index
    %467 = vector.load %arg22[%c0_153, %c0_154] : memref<128x128xbf16, #tpu.memory_space<vmem>>, vector<128x128xbf16>
    %468 = arith.truncf %466 : vector<16x128xf32> to vector<16x128xbf16>
    %cst_155 = arith.constant dense<0.000000e+00> : vector<16x128xf32>
    %469 = tpu.matmul %468, %467, %cst_155 {dimension_numbers = #tpu.dot_dimension_numbers<[1], [0], [0], [1], [0, 0, 1, 1], [], []>} : vector<16x128xbf16>, vector<128x128xbf16>, vector<16x128xf32> -> vector<16x128xf32>
    %c0_156 = arith.constant 0 : index
    %c0_157 = arith.constant 0 : index
    %470 = vector.load %arg23[%c0_156, %c0_157] : memref<1x128xf32, #tpu.memory_space<vmem>>, vector<1x128xf32>
    %471 = vector.broadcast %470 : vector<1x128xf32> to vector<16x128xf32>
    %472 = arith.addf %469, %471 : vector<16x128xf32>
    %473 = math.tanh %472 : vector<16x128xf32>
    %c0_158 = arith.constant 0 : index
    %c0_159 = arith.constant 0 : index
    %474 = vector.load %arg24[%c0_158, %c0_159] : memref<128x128xbf16, #tpu.memory_space<vmem>>, vector<128x128xbf16>
    %475 = arith.truncf %473 : vector<16x128xf32> to vector<16x128xbf16>
    %cst_160 = arith.constant dense<0.000000e+00> : vector<16x128xf32>
    %476 = tpu.matmul %475, %474, %cst_160 {dimension_numbers = #tpu.dot_dimension_numbers<[1], [0], [0], [1], [0, 0, 1, 1], [], []>} : vector<16x128xbf16>, vector<128x128xbf16>, vector<16x128xf32> -> vector<16x128xf32>
    %c0_161 = arith.constant 0 : index
    %c0_162 = arith.constant 0 : index
    %477 = vector.load %arg25[%c0_161, %c0_162] : memref<1x128xf32, #tpu.memory_space<vmem>>, vector<1x128xf32>
    %478 = vector.broadcast %477 : vector<1x128xf32> to vector<16x128xf32>
    %479 = arith.addf %476, %478 : vector<16x128xf32>
    %c0_163 = arith.constant 0 : index
    %c0_164 = arith.constant 0 : index
    %480 = vector.load %arg26[%c0_163, %c0_164] : memref<16x128xf32, #tpu.memory_space<vmem>>, vector<16x128xf32>
    tpu.vector_store %arg26[%c0_163, %c0_164], %479 {strides = array<i32>} : memref<16x128xf32, #tpu.memory_space<vmem>>, vector<16x128xf32>,
    return
  }
  func.func @transform_0(%arg0: i32) -> (i32, i32) {
    %c0_i32 = arith.constant 0 : i32
    %c0_i32_0 = arith.constant 0 : i32
    return %arg0, %c0_i32 : i32, i32
  }
  func.func @transform_1(%arg0: i32) -> (i32, i32) {
    %c0_i32 = arith.constant 0 : i32
    %c0_i32_0 = arith.constant 0 : i32
    %c0_i32_1 = arith.constant 0 : i32
    return %c0_i32, %c0_i32_0 : i32, i32
  }
  func.func @transform_2(%arg0: i32) -> (i32, i32) {
    %c0_i32 = arith.constant 0 : i32
    %c0_i32_0 = arith.constant 0 : i32
    %c0_i32_1 = arith.constant 0 : i32
    return %c0_i32, %c0_i32_0 : i32, i32
  }
  func.func @transform_3(%arg0: i32) -> (i32, i32) {
    %c0_i32 = arith.constant 0 : i32
    %c0_i32_0 = arith.constant 0 : i32
    %c0_i32_1 = arith.constant 0 : i32
    return %c0_i32, %c0_i32_0 : i32, i32
  }
  func.func @transform_4(%arg0: i32) -> (i32, i32) {
    %c0_i32 = arith.constant 0 : i32
    %c0_i32_0 = arith.constant 0 : i32
    %c0_i32_1 = arith.constant 0 : i32
    return %c0_i32, %c0_i32_0 : i32, i32
  }
  func.func @transform_5(%arg0: i32) -> (i32, i32) {
    %c0_i32 = arith.constant 0 : i32
    %c0_i32_0 = arith.constant 0 : i32
    %c0_i32_1 = arith.constant 0 : i32
    return %c0_i32, %c0_i32_0 : i32, i32
  }
  func.func @transform_6(%arg0: i32) -> (i32, i32) {
    %c0_i32 = arith.constant 0 : i32
    %c0_i32_0 = arith.constant 0 : i32
    %c0_i32_1 = arith.constant 0 : i32
    return %c0_i32, %c0_i32_0 : i32, i32
  }
  func.func @transform_7(%arg0: i32) -> (i32, i32) {
    %c0_i32 = arith.constant 0 : i32
    %c0_i32_0 = arith.constant 0 : i32
    %c0_i32_1 = arith.constant 0 : i32
    return %c0_i32, %c0_i32_0 : i32, i32
  }
  func.func @transform_8(%arg0: i32) -> (i32, i32) {
    %c0_i32 = arith.constant 0 : i32
    %c0_i32_0 = arith.constant 0 : i32
    %c0_i32_1 = arith.constant 0 : i32
    return %c0_i32, %c0_i32_0 : i32, i32
  }
  func.func @transform_9(%arg0: i32) -> (i32, i32, i32) {
    %c0_i32 = arith.constant 0 : i32
    %c0_i32_0 = arith.constant 0 : i32
    %c0_i32_1 = arith.constant 0 : i32
    %c0_i32_2 = arith.constant 0 : i32
    return %c0_i32, %c0_i32_0, %c0_i32_1 : i32, i32, i32
  }
  func.func @transform_10(%arg0: i32) -> (i32, i32, i32) {
    %c0_i32 = arith.constant 0 : i32
    %c0_i32_0 = arith.constant 0 : i32
    %c0_i32_1 = arith.constant 0 : i32
    %c0_i32_2 = arith.constant 0 : i32
    return %c0_i32, %c0_i32_0, %c0_i32_1 : i32, i32, i32
  }
  func.func @transform_11(%arg0: i32) -> (i32, i32, i32) {
    %c0_i32 = arith.constant 0 : i32
    %c0_i32_0 = arith.constant 0 : i32
    %c0_i32_1 = arith.constant 0 : i32
    %c0_i32_2 = arith.constant 0 : i32
    return %c0_i32, %c0_i32_0, %c0_i32_1 : i32, i32, i32
  }
  func.func @transform_12(%arg0: i32) -> (i32, i32, i32) {
    %c0_i32 = arith.constant 0 : i32
    %c0_i32_0 = arith.constant 0 : i32
    %c0_i32_1 = arith.constant 0 : i32
    %c0_i32_2 = arith.constant 0 : i32
    return %c0_i32, %c0_i32_0, %c0_i32_1 : i32, i32, i32
  }
  func.func @transform_13(%arg0: i32) -> (i32, i32, i32) {
    %c0_i32 = arith.constant 0 : i32
    %c0_i32_0 = arith.constant 0 : i32
    %c0_i32_1 = arith.constant 0 : i32
    %c0_i32_2 = arith.constant 0 : i32
    return %c0_i32, %c0_i32_0, %c0_i32_1 : i32, i32, i32
  }
  func.func @transform_14(%arg0: i32) -> (i32, i32, i32) {
    %c0_i32 = arith.constant 0 : i32
    %c0_i32_0 = arith.constant 0 : i32
    %c0_i32_1 = arith.constant 0 : i32
    %c0_i32_2 = arith.constant 0 : i32
    return %c0_i32, %c0_i32_0, %c0_i32_1 : i32, i32, i32
  }
  func.func @transform_15(%arg0: i32) -> (i32, i32, i32) {
    %c0_i32 = arith.constant 0 : i32
    %c0_i32_0 = arith.constant 0 : i32
    %c0_i32_1 = arith.constant 0 : i32
    %c0_i32_2 = arith.constant 0 : i32
    return %c0_i32, %c0_i32_0, %c0_i32_1 : i32, i32, i32
  }
  func.func @transform_16(%arg0: i32) -> (i32, i32, i32) {
    %c0_i32 = arith.constant 0 : i32
    %c0_i32_0 = arith.constant 0 : i32
    %c0_i32_1 = arith.constant 0 : i32
    %c0_i32_2 = arith.constant 0 : i32
    return %c0_i32, %c0_i32_0, %c0_i32_1 : i32, i32, i32
  }
  func.func @transform_17(%arg0: i32) -> (i32, i32, i32) {
    %c0_i32 = arith.constant 0 : i32
    %c0_i32_0 = arith.constant 0 : i32
    %c0_i32_1 = arith.constant 0 : i32
    %c0_i32_2 = arith.constant 0 : i32
    return %c0_i32, %c0_i32_0, %c0_i32_1 : i32, i32, i32
  }
  func.func @transform_18(%arg0: i32) -> (i32, i32, i32) {
    %c0_i32 = arith.constant 0 : i32
    %c0_i32_0 = arith.constant 0 : i32
    %c0_i32_1 = arith.constant 0 : i32
    %c0_i32_2 = arith.constant 0 : i32
    return %c0_i32, %c0_i32_0, %c0_i32_1 : i32, i32, i32
  }
  func.func @transform_19(%arg0: i32) -> (i32, i32, i32) {
    %c0_i32 = arith.constant 0 : i32
    %c0_i32_0 = arith.constant 0 : i32
    %c0_i32_1 = arith.constant 0 : i32
    %c0_i32_2 = arith.constant 0 : i32
    return %c0_i32, %c0_i32_0, %c0_i32_1 : i32, i32, i32
  }
  func.func @transform_20(%arg0: i32) -> (i32, i32, i32) {
    %c0_i32 = arith.constant 0 : i32
    %c0_i32_0 = arith.constant 0 : i32
    %c0_i32_1 = arith.constant 0 : i32
    %c0_i32_2 = arith.constant 0 : i32
    return %c0_i32, %c0_i32_0, %c0_i32_1 : i32, i32, i32
  }
  func.func @transform_21(%arg0: i32) -> (i32, i32) {
    %c0_i32 = arith.constant 0 : i32
    %c0_i32_0 = arith.constant 0 : i32
    %c0_i32_1 = arith.constant 0 : i32
    return %c0_i32, %c0_i32_0 : i32, i32
  }
  func.func @transform_22(%arg0: i32) -> (i32, i32) {
    %c0_i32 = arith.constant 0 : i32
    %c0_i32_0 = arith.constant 0 : i32
    %c0_i32_1 = arith.constant 0 : i32
    return %c0_i32, %c0_i32_0 : i32, i32
  }
  func.func @transform_23(%arg0: i32) -> (i32, i32) {
    %c0_i32 = arith.constant 0 : i32
    %c0_i32_0 = arith.constant 0 : i32
    %c0_i32_1 = arith.constant 0 : i32
    return %c0_i32, %c0_i32_0 : i32, i32
  }
  func.func @transform_24(%arg0: i32) -> (i32, i32) {
    %c0_i32 = arith.constant 0 : i32
    %c0_i32_0 = arith.constant 0 : i32
    %c0_i32_1 = arith.constant 0 : i32
    return %c0_i32, %c0_i32_0 : i32, i32
  }
  func.func @transform_25(%arg0: i32) -> (i32, i32) {
    %c0_i32 = arith.constant 0 : i32
    %c0_i32_0 = arith.constant 0 : i32
    return %arg0, %c0_i32 : i32, i32
  }
}

</mosaic_0001>

<bundles_post_ra>
// kernel: tpu_custom_call.1
= control target key start
LH: loop header
LB: loop body
LE: loop exit
PB: predicated region body
PF: predicated region fallthrough
CT: control target
= control target key end

     0   :  { %s7726_s0 = inlined_call_operand.vmem [shape: f32[64,16], index: 0, kind: input, shape index: {}]   ;;  %s7727_s1 = inlined_call_operand.vmem [shape: f32[8,128], index: 1, kind: input, shape index: {}]   ;;  %s7728_s2 = inlined_call_operand.vmem [shape: f32[8,128], index: 2, kind: input, shape index: {}]   ;;  %s7729_s3 = inlined_call_operand.hbm [shape: bf16[16,128], index: 3, kind: input, shape index: {}]   ;;  %s7730_s4 = inlined_call_operand.hbm [shape: f32[1,128], index: 4, kind: input, shape index: {}]   ;;  %s7731_s5 = inlined_call_operand.vmem [shape: bf16[128,128], index: 5, kind: input, shape index: {}]   ;;  %s7732_s6 = inlined_call_operand.hbm [shape: f32[1,128], index: 6, kind: input, shape index: {}]   ;;  %s7733_s7 = inlined_call_operand.hbm [shape: f32[1,128], index: 7, kind: input, shape index: {}]   ;;  %s7734_s8 = inlined_call_operand.hbm [shape: f32[1,128], index: 8, kind: input, shape index: {}]   ;;  %s7735_s9 = inlined_call_operand.hbm [shape: bf16[2,128,384], index: 9, kind: input, shape index: {}]   ;;  %s7736_s10 = inlined_call_operand.hbm [shape: f32[2,1,384], index: 10, kind: input, shape index: {}]   ;;  %s7737_s11 = inlined_call_operand.hbm [shape: bf16[2,128,128], index: 11, kind: input, shape index: {}]   ;;  %s7738_s12 = inlined_call_operand.vmem [shape: f32[2,1,128], index: 12, kind: input, shape index: {}]   ;;  %s7739_s13 = inlined_call_operand.vmem [shape: f32[2,1,128], index: 13, kind: input, shape index: {}]   ;;  %s7740_s14 = inlined_call_operand.hbm [shape: f32[2,1,128], index: 14, kind: input, shape index: {}]   ;;  %s7741_s15 = inlined_call_operand.hbm [shape: bf16[2,128,512], index: 15, kind: input, shape index: {}]   ;;  %s7742_s16 = inlined_call_operand.vmem [shape: f32[2,1,512], index: 16, kind: input, shape index: {}]   ;;  %s7743_s17 = inlined_call_operand.hbm [shape: bf16[2,512,128], index: 17, kind: input, shape index: {}]   ;;  %s7744_s18 = inlined_call_operand.vmem [shape: f32[2,1,128], index: 18, kind: input, shape index: {}]   ;;  %s7745_s19 = inlined_call_operand.vmem [shape: f32[2,1,128], index: 19, kind: input, shape index: {}]   ;;  %s7746_s20 = inlined_call_operand.vmem [shape: f32[2,1,128], index: 20, kind: input, shape index: {}]   ;;  %s7747_s21 = inlined_call_operand.hbm [shape: bf16[128,128], index: 21, kind: input, shape index: {}]   ;;  %s7748_s22 = inlined_call_operand.vmem [shape: f32[1,128], index: 22, kind: input, shape index: {}]   ;;  %s7749_s23 = inlined_call_operand.hbm [shape: bf16[128,128], index: 23, kind: input, shape index: {}]   ;;  %s7750_s24 = inlined_call_operand.vmem [shape: f32[1,128], index: 24, kind: input, shape index: {}]   ;;  %s7751_s25 = inlined_call_operand.hbm [shape: f32[64,128], index: 25, kind: output, shape index: {}]  }
   0x1   :  { %7763 = sst [smem:[#allocation40_spill]] %s7726_s0 }
   0x2   :  { %7764 = sst [smem:[#allocation41_spill]] %s7727_s1 }
   0x3   :  { %7765 = sst [smem:[#allocation42_spill]] %s7728_s2 }
   0x4   :  { %7766 = sst [smem:[#allocation43_spill]] %s7729_s3 }
   0x5   :  { %7767 = sst [smem:[#allocation44_spill]] %s7730_s4 }
   0x6   :  { %7768 = sst [smem:[#allocation45_spill]] %s7731_s5 }
   0x7   :  { %7769 = sst [smem:[#allocation46_spill]] %s7732_s6 }
   0x8   :  { %7770 = sst [smem:[#allocation47_spill]] %s7733_s7 }
   0x9   :  { %7771 = sst [smem:[#allocation48_spill]] %s7734_s8 }
   0xa   :  { %7772 = sst [smem:[#allocation49_spill]] %s7735_s9 }
   0xb   :  { %7773 = sst [smem:[#allocation50_spill]] %s7737_s11 }
   0xc   :  { %7774 = sst [smem:[#allocation51_spill]] %s7741_s15 }
   0xd   :  { %7775 = sst [smem:[#allocation52_spill]] %s7748_s22 }
   0xe   :  { %7776 = sst [smem:[#allocation53_spill]] %s7750_s24 }
   0xf   :  { %7777 = sst [smem:[#allocation54_spill]] %s7751_s25 }
  0x10   :  { %30 = vsyncpa [#allocation3], 0 }
  0x11   :  { %31 = vsyncpa [#allocation6], 0 }
  0x12   :  { %32 = vsyncpa [#allocation9], 0 }
  0x13   :  { %33 = vsyncpa [#allocation12], 0 }
  0x14   :  { %34 = vsyncpa [#allocation15], 0 }
  0x15   :  { %35 = vsyncpa [#allocation18], 0 }
  0x16   :  { %36 = vsyncpa [#allocation21], 0 }
  0x17   :  { %37 = vsyncpa [#allocation4], 0 }
  0x18   :  { %39 = vsyncpa [#allocation4 + $0x1], 0  ;;  %s7059_s29 = smov 0   ;;  %s7061_s2 = smov 0  }
  0x19   :  { %s7063_s6 = smov 0   ;;  %s7065_s30 = smov 0  }
  0x1a LB: > { %7778 = sst [smem:[#allocation32_spill]] %s6887_s29  ;;  %s7080_s7 = sadd.s32 4294967295, %s6899_s30   ;;  %s6899_s30 = sphi %s7065_s30, %s7811_s30   ;;  %s6895_s6 = sphi %s7063_s6, %s7814_s6   ;;  %s6891_s2 = sphi %s7061_s2, %s7813_s2   ;;  %s6887_s29 = sphi %s7059_s29, %s7812_s29  }
  0x1b   : > { %7779 = sst [smem:[#allocation33_spill]] %s6891_s2  ;;  %s4886_s3 = sadd.s32 4294967294, %s6899_s30  }
  0x1c   : > { %7780 = sst [smem:[#allocation34_spill]] %s6895_s6  ;;  %s7084_s26 = sadd.s32 1, %s6899_s30  }
  0x1d   : > { %7781 = sst [smem:[#allocation35_spill]] %s6899_s30  ;;  %s582_s1 = sadd.s32 1, %s6895_s6 }
  0x1e   : > { %7782 = sst [smem:[#allocation36_spill]] %s7084_s26  ;;  %s579_s8 = ssub.s32 %s6899_s30, %s7084_s26 }
  0x1f   : > { %p592_p0 = scmp.ne.s32.totalorder %s6895_s6, %s6891_s2  ;;  %p580_p1 = scmp.eq.s32.totalorder %s579_s8, 0 }
  0x20   : > { %p593_p2 = scmp.eq.s32.totalorder %s7080_s7, 3  ;;  %p598_p3 = scmp.ne.s32.totalorder %s6891_s2, %s6887_s29 }
  0x21   : > { %p599_p4 = scmp.eq.s32.totalorder %s4886_s3, 3  ;;  %p4887_p7 = scmp.ge.s32.totalorder %s6899_s30, 1 }
  0x22   : > { %s7095_s27 = scalar_select %p580_p1, %s6895_s6, %s582_s1  }
  0x23   : > { %p7097_p5 = por %p593_p2, %p592_p0  ;;  %p7101_p6 = por %p599_p4, %p598_p3 }
  0x24   : > { %7783 = sst [smem:[#allocation37_spill]] %s7095_s27  ;;  %p606_p8 = scmp.lt.s32.totalorder %s6899_s30, 5 }
  0x25   : > { %s7784_s4 = scalar_select %p7097_p5, 1, 0 }
  0x26   : > { %s7786_s28 = scalar_select %p7101_p6, 1, 0 }
  0x27   : > { %7785 = sst [smem:[#allocation38_spill]] %s7784_s4  ;;  %p6166_p9 = scmp.eq.s32.totalorder %s7080_s7, 0 }
  0x28   : > { %7787 = sst [smem:[#allocation39_spill]] %s7786_s28  ;;  %p7108_p10 = pnand %p4887_p7, %p606_p8 }
  0x29   : > { %s7789_s3 = sld [smem:[#allocation44_spill]]  ;;  %s6901_s8 = smov [#allocation5]  }
  0x2a   : > { %p6122_p11 = pneg %p7108_p10  ;;  %s640_s27 = sshll.u32 %s6901_s8, 4  ;;  %s641_s27 = int_to_ptr.vmem [resolvable:$true] %s640_s27 }
  0x2b   : > { %s7790_s28 = sld [smem:[#allocation47_spill]]  ;;  %s6902_s4 = smov [#allocation8]  }
  0x2c   : > { %p7122_p12 = pnand %p6166_p9, %p6122_p11  ;;  %s667_s8 = sshll.u32 %s6902_s4, 4  ;;  %s668_s8 = int_to_ptr.vmem [resolvable:$true] %s667_s8 }
  0x2d   : > { %s6903_s6 = smov [#allocation11]   ;;  %s6905_s24 = smov 12  }
  0x2e   : > { %s690_s26 = sshll.u32 %s6903_s6, 4  ;;  %s7793_s11 = sld [smem:[#allocation50_spill]]  ;;  %s691_s26 = int_to_ptr.vmem [resolvable:$true] %s690_s26 }
  0x2f   : > { %s638_s1 = sshll.u32 %s7789_s3, 4  ;;  %s7792_s3 = sld [smem:[#allocation49_spill]]  ;;  %s639_s1 = int_to_ptr.hbm [resolvable:$true] %s638_s1 }
  0x30   : > { %6128 = dma.hbm_to_vmem [thread:$0]  (!%p7122_p12), %s639_s1, 16, %s641_s27, [#allocation6]  }
  0x31   : > { %s665_s29 = sshll.u32 %s7790_s28, 4  ;;  %s6904_s28 = smov 192   ;;  %s666_s29 = int_to_ptr.hbm [resolvable:$true] %s665_s29 }
  0x32   : > { %6134 = dma.hbm_to_vmem [thread:$0]  (!%p7122_p12), %s666_s29, 16, %s668_s8, [#allocation9]  }
  0x33   : > { %s6906_s4 = smov [#allocation14]   ;;  %s7794_s15 = sld [smem:[#allocation51_spill]] }
  0x34   : > { %s716_s5 = sshll.u32 %s7793_s11, 4  ;;  %s718_s27 = sshll.u32 %s6906_s4, 4  ;;  %s717_s5 = int_to_ptr.hbm [resolvable:$true] %s716_s5  ;;  %s719_s27 = int_to_ptr.vmem [resolvable:$true] %s718_s27 }
  0x35   : > { %s688_s25 = sshll.u32 %s7792_s3, 4  ;;  %s6907_s3 = smov 64   ;;  %s689_s25 = int_to_ptr.hbm [resolvable:$true] %s688_s25 }
  0x36   : > { %6140 = dma.hbm_to_vmem [thread:$0]  (!%p7122_p12), %s689_s25, 6144, %s691_s26, [#allocation12], %s6904_s28, %s6904_s28, %s6905_s24  }
  0x37   : > { %s6908_s8 = smov 4   ;;  %s6909_s22 = smov [#allocation17]  }
  0x38   : > { %6146 = dma.hbm_to_vmem [thread:$0]  (!%p7122_p12), %s717_s5, 2048, %s719_s27, [#allocation15], %s6907_s3, %s6907_s3, %s6908_s8  }
  0x39   : > { %s750_s29 = sshll.u32 %s7794_s15, 4  ;;  %s752_s24 = sshll.u32 %s6909_s22, 4  ;;  %s751_s29 = int_to_ptr.hbm [resolvable:$true] %s750_s29  ;;  %s753_s24 = int_to_ptr.vmem [resolvable:$true] %s752_s24 }
  0x3a   : > { %s790_s6 = sshll.u32 %s7747_s21, 4  ;;  %s6910_s26 = smov 256   ;;  %s791_s6 = int_to_ptr.hbm [resolvable:$true] %s790_s6 }
  0x3b   : > { %s6911_s28 = smov 16   ;;  %s6912_s4 = smov [#allocation20]  }
  0x3c   : > { %6152 = dma.hbm_to_vmem [thread:$0]  (!%p7122_p12), %s751_s29, 8192, %s753_s24, [#allocation18], %s6910_s26, %s6910_s26, %s6911_s28  }
  0x3d   : > { %s792_s1 = sshll.u32 %s6912_s4, 4  ;;  %s7795_s5 = sld [smem:[#allocation43_spill]]  ;;  %s793_s1 = int_to_ptr.vmem [resolvable:$true] %s792_s1 }
  0x3e   : > { %6158 = dma.hbm_to_vmem [thread:$0]  (!%p7122_p12), %s791_s6, 1024, %s793_s1, [#allocation21], %s6907_s3, %s6907_s3, %s6908_s8  }
  0x3f   : > { %s7796_s2 = sld [smem:[#allocation46_spill]]  ;;  %s6913_s29 = smov [#allocation2]  }
  0x40   : > { %s625_s24 = sshll.u32 %s6913_s29, 4  ;;  %s6914_s11 = smov [#allocation7]   ;;  %s626_s24 = int_to_ptr.vmem [resolvable:$true] %s625_s24 }
  0x41   : > { %s655_s26 = sshll.u32 %s6914_s11, 4  ;;  %s702_s25 = sshll.u32 %s7736_s10, 4  ;;  %s656_s26 = int_to_ptr.vmem [resolvable:$true] %s655_s26  ;;  %s703_s25 = int_to_ptr.hbm [resolvable:$true] %s702_s25 }
  0x42   : > { %s6917_s11 = smov 48   ;;  %s6918_s4 = smov 3  }
  0x43   : > { %s623_s27 = sshll.u32 %s7795_s5, 4  ;;  %s7797_s5 = sld [smem:[#allocation48_spill]]  ;;  %s624_s27 = int_to_ptr.hbm [resolvable:$true] %s623_s27 }
  0x44   : > { %6125 = dma.hbm_to_vmem [thread:$0]  (!%p7122_p12), %s624_s27, 128, %s626_s24, [#allocation3], %s6907_s3, %s6907_s3, %s6908_s8  }
  0x45   : > { %s653_s15 = sshll.u32 %s7796_s2, 4  ;;  %s6915_s2 = smov [#allocation10]   ;;  %s654_s15 = int_to_ptr.hbm [resolvable:$true] %s653_s15 }
  0x46   : > { %6131 = dma.hbm_to_vmem [thread:$0]  (!%p7122_p12), %s654_s15, 16, %s656_s26, [#allocation6]  }
  0x47   : > { %s679_s29 = sshll.u32 %s6915_s2, 4  ;;  %s6916_s27 = smov [#allocation13]   ;;  %s680_s29 = int_to_ptr.vmem [resolvable:$true] %s679_s29 }
  0x48   : > { %s704_s24 = sshll.u32 %s6916_s27, 4  ;;  %s736_s0 = sshll.u32 %s7740_s14, 4  ;;  %s705_s24 = int_to_ptr.vmem [resolvable:$true] %s704_s24  ;;  %s737_s0 = int_to_ptr.hbm [resolvable:$true] %s736_s0 }
  0x49   : > { %s677_s6 = sshll.u32 %s7797_s5, 4  ;;  %s6919_s5 = smov [#allocation16]   ;;  %s678_s6 = int_to_ptr.hbm [resolvable:$true] %s677_s6 }
  0x4a   : > { %6137 = dma.hbm_to_vmem [thread:$0]  (!%p7122_p12), %s678_s6, 16, %s680_s29, [#allocation9]  }
  0x4b   : > { %6143 = dma.hbm_to_vmem [thread:$0]  (!%p7122_p12), %s703_s25, 96, %s705_s24, [#allocation12], %s6917_s11, %s6917_s11, %s6918_s4  }
  0x4c   : > { %s738_s1 = sshll.u32 %s6919_s5, 4  ;;  %s6920_s22 = smov 1   ;;  %s739_s1 = int_to_ptr.vmem [resolvable:$true] %s738_s1 }
  0x4d   : > { %6149 = dma.hbm_to_vmem [thread:$0]  (!%p7122_p12), %s737_s0, 32, %s739_s1, [#allocation15], %s6911_s28, %s6911_s28, %s6920_s22  }
  0x4e   : > { %s767_s29 = sshll.u32 %s7743_s17, 4  ;;  %s6921_s25 = smov [#allocation19]   ;;  %s768_s29 = int_to_ptr.hbm [resolvable:$true] %s767_s29 }
  0x4f   : > { %s769_s27 = sshll.u32 %s6921_s25, 4  ;;  %s807_s4 = sshll.u32 %s7749_s23, 4  ;;  %s770_s27 = int_to_ptr.vmem [resolvable:$true] %s769_s27  ;;  %s808_s4 = int_to_ptr.hbm [resolvable:$true] %s807_s4 }
  0x50   : > { %6155 = dma.hbm_to_vmem [thread:$0]  (!%p7122_p12), %s768_s29, 8192, %s770_s27, [#allocation18], %s6907_s3, %s6907_s3, %s6908_s8  }
  0x51   : > { %s6922_s15 = smov [#allocation22]   ;;  %837 = sbr.rel (%p7108_p10) target bundleno = 4604 (0x11fc), region = 120 }
  0x52   : > { %s809_s28 = sshll.u32 %s6922_s15, 4  ;;  %s810_s28 = int_to_ptr.vmem [resolvable:$true] %s809_s28 }
  0x53   : > { %6161 = dma.hbm_to_vmem [thread:$0]  (!%p7122_p12), %s808_s4, 1024, %s810_s28, [#allocation21], %s6907_s3, %s6907_s3, %s6908_s8  }
  0x56   : > { %6854 = dma.done.wait (%p6166_p9), [#allocation3], 128  }
  0x57   : > { %6856 = vsyncadd (%p6166_p9), [#allocation3], 4294967168 }
  0x58   : > { %6858 = dma.done.wait (%p6166_p9), [#allocation6], 32  }
  0x59   : > { %6860 = vsyncadd (%p6166_p9), [#allocation6], 4294967264 }
  0x5a   : > { %6862 = dma.done.wait (%p6166_p9), [#allocation9], 32  }
  0x5b   : > { %6864 = vsyncadd (%p6166_p9), [#allocation9], 4294967264 }
  0x5c   : > { %6866 = dma.done.wait (%p6166_p9), [#allocation12], 6240  }
  0x5d   : > { %6868 = vsyncadd (%p6166_p9), [#allocation12], 4294961056 }
  0x5e   : > { %6870 = dma.done.wait (%p6166_p9), [#allocation15], 2080  }
  0x5f   : > { %6872 = vsyncadd (%p6166_p9), [#allocation15], 4294965216 }
  0x60   : > { %6874 = dma.done.wait (%p6166_p9), [#allocation18], 16384  }
  0x61   : > { %6876 = vsyncadd (%p6166_p9), [#allocation18], 4294950912 }
  0x62   : > { %6878 = dma.done.wait (%p6166_p9), [#allocation21], 2048  }
  0x63   : > { %6880 = vsyncadd (%p6166_p9), [#allocation21], 4294965248  ;;  %s7234_s30 = sshll.u32 %s7080_s7, 1  ;;  %s7798_s0 = sld [smem:[#allocation40_spill]]  ;;  %v5850_v0 = vld [vmem:[#allocation2] sm:$0xff]  ;;  %vm989_vm0 = vcmask 130048  }
  0x64   : > { %p967_p13 = scmp.lt.s32.totalorder %s7234_s30, 7  ;;  %s7799_s6 = sld [smem:[#allocation45_spill]]  ;;  %1000 = vmatpush.bf16.msra.mxu1 %v5850_v0  ;;  %v6273_v13 = vld [vmem:[#allocation5] ss:$0 sm:$0xff]  ;;  %v6274_v22 = vld [vmem:[#allocation7] ss:$0 sm:$0xff] }
  0x65   : > { %s7802_s24 = sld [smem:[#allocation42_spill]]  ;;  %v6923_v32 = vmov 128.0   ;;  %v5045_v47 = vld [vmem:[#allocation11 + $0xa8] sm:$0xf]  ;;  %v5881_v48 = vld [vmem:[#allocation11 + $0xb0] sm:$0xf0] }
  0x66   : > { %s968_s9 = scalar_select %p967_p13, %s7234_s30, 7  ;;  %v5880_v49 = vld [vmem:[#allocation11 + $0xac] sm:$0xf]  ;;  %v5046_v50 = vor.u32 %v5881_v48, %v5045_v47  ;;  %v5047_v51 = vld [vmem:[#allocation11 + $0xb4] sm:$0xf0]  ;;  %vm1459_vm8 = vcmask 261120  }
  0x67   : > { %v5053_v52 = vld [vmem:[#allocation11 + $0xb0] sm:$0xf]  ;;  %v5882_v53 = vld [vmem:[#allocation11 + $0xb8] sm:$0xf0]  ;;  %v5050_v54 = vor.u32 %v5880_v49, %v5047_v51  ;;  %v5877_v58 = vld [vmem:[#allocation11 + $0x94] sm:$0xf] }
  0x68   : > { %s4918_s3 = sshll.u32 %s968_s9, 3  ;;  %v5054_v55 = vor.u32 %v5882_v53, %v5053_v52  ;;  %1333 = vmatpush.bf16.msra.mxu2 %v5046_v50  ;;  %v5033_v56 = vld [vmem:[#allocation11 + $0x90] sm:$0xf]  ;;  %v5878_v57 = vld [vmem:[#allocation11 + $0x98] sm:$0xf0]  ;;  %s6925_s11 = smov 96  }
  0x69   : > { %s970_s5 = scalar_lea.vmem %s7798_s0, %s4918_s3  ;;  %1347 = vmatpush.bf16.msra.mxu3 %v5050_v54  ;;  %v5034_v59 = vor.u32 %v5878_v57, %v5033_v56  ;;  %v5035_v60 = vld [vmem:[#allocation11 + $0x9c] sm:$0xf0]  ;;  %v5041_v61 = vld [vmem:[#allocation11 + $0x98] sm:$0xf]  ;;  %v5879_v62 = vld [vmem:[#allocation11 + $0xa0] sm:$0xf0] }
  0x6a   : > { %v974_v1 = vld [vmem:[%s970_s5] sm:$0xff]  ;;  %v975_v2 = vld [vmem:[%s970_s5 + $0x8] sm:$0xff]  ;;  %s7800_s25 = smov %s7799_s6  ;;  %v5858_v4 = vld [vmem:[%s7799_s6 + $0x38] sm:$0xff]  ;;  %s7801_s6 = sld [smem:[#allocation41_spill]]  ;;  %1361 = vmatpush.bf16.msra.mxu0 %v5054_v55  ;;  %v5038_v63 = vor.u32 %v5877_v58, %v5035_v60  ;;  %v5042_v0 = vor.u32 %v5879_v62, %v5041_v61  ;;  %vm1712_vm9 = vcmask 1043456   ;;  %vm1612_vm10 = vcmask 64512  }
  0x6b   : > { %v978_v3 = vpack.c.bf16 %v975_v2, %v974_v1  ;;  %v5857_v5 = vld [vmem:[%s7800_s25 + $0x30] sm:$0xff]  ;;  %1078 = vmatpush.bf16.msrb.mxu1 %v5858_v4  ;;  %v5856_v6 = vld [vmem:[%s7800_s25 + $0x28] sm:$0xff]  ;;  %v5855_v7 = vld [vmem:[%s7800_s25 + $0x20] sm:$0xff]  ;;  %s6926_s4 = smov 32   ;;  %s7803_s0 = sld [smem:[#allocation33_spill]] }
  0x6c   : > { %v5854_v8 = vld [vmem:[%s7800_s25 + $0x18] sm:$0xff]  ;;  %v5853_v9 = vld [vmem:[%s7800_s25 + $0x10] sm:$0xff]  ;;  %v5852_v10 = vld [vmem:[%s7800_s25 + $0x8] sm:$0xff]  ;;  %1334 = vmatpush.bf16.msra.mxu2 %v5034_v59  ;;  %s7804_s22 = sld [smem:[#allocation52_spill]] }
  0x6d   : > { %4923 = vmatmul.msk.bf16.vlgmr.msra.gmra.mxu1 %vm989_vm0, %v978_v3  ;;  %v5851_v11 = vld [vmem:[%s7800_s25] sm:$0xff]  ;;  %1348 = vmatpush.bf16.msra.mxu3 %v5038_v63  ;;  %v5021_v1 = vld [vmem:[#allocation11 + $0x78] sm:$0xf]  ;;  %v5875_v2 = vld [vmem:[#allocation11 + $0x80] sm:$0xf0]  ;;  %s7807_s9 = sld [smem:[#allocation54_spill]] }
  0x6e   : > { %v1092_v21 = vld [vmem:[%s7802_s24] sm:$0xff]  ;;  %1362 = vmatpush.bf16.msra.mxu0 %v5042_v0  ;;  %v5874_v3 = vld [vmem:[#allocation11 + $0x7c] sm:$0xf]  ;;  %v5022_v4 = vor.u32 %v5875_v2, %v5021_v1  ;;  %v4961_v49 = vld [vmem:[#allocation11] sm:$0xf]  ;;  %s7805_s24 = sld [smem:[#allocation53_spill]] }
  0x6f   : > { %1079 = vmatpush.bf16.msrb.mxu1 %v5857_v5  ;;  %v5023_v5 = vld [vmem:[#allocation11 + $0x84] sm:$0xf0]  ;;  %v5860_v50 = vld [vmem:[#allocation11 + $0x8] sm:$0xf0]  ;;  %v5859_v51 = vld [vmem:[#allocation11 + $0x4] sm:$0xf] }
  0x70   : > { %s1094_s2 = scalar_lea.vmem %s7801_s6, %s7234_s30  ;;  %1335 = vmatpush.bf16.msra.mxu2 %v5022_v4  ;;  %v4962_v53 = vor.u32 %v5860_v50, %v4961_v49  ;;  %v4963_v54 = vld [vmem:[#allocation11 + $0xc] sm:$0xf0]  ;;  %v4969_v55 = vld [vmem:[#allocation11 + $0x8] sm:$0xf]  ;;  %v5861_v56 = vld [vmem:[#allocation11 + $0x10] sm:$0xf0] }
  0x71   : > { %v6275_v20 = vld [vmem:[%s1094_s2] ss:$0 sm:$0xff]  ;;  %v6276_v27 = vld [vmem:[%s1094_s2 + $0x1] ss:$0 sm:$0xff]  ;;  %v4966_v58 = vor.u32 %v5859_v51, %v4963_v54  ;;  %v4970_v59 = vor.u32 %v5861_v56, %v4969_v55  ;;  %s6924_s30 = smov 64   ;;  %s963_s6 = sand.u32 1, %s7803_s0  }
  0x72   : > { %v1097_v23 = vadd.f32 %v6275_v20, %v1092_v21  ;;  %v1102_v28 = vadd.f32 %v6276_v27, %v1092_v21  ;;  %v5869_v20 = vld [vmem:[#allocation11 + $0x50] sm:$0xf0]  ;;  %v5868_v21 = vld [vmem:[#allocation11 + $0x4c] sm:$0xf]  ;;  %s4916_s2 = sshll.u32 %s963_s6, 4  ;;  %s4678_s0 = scalar_lea.sflag [#allocation4], %s963_s6 }
  0x73   : > { %1080 = vmatpush.bf16.msrb.mxu1 %v5856_v6  ;;  %v5029_v6 = vld [vmem:[#allocation11 + $0x80] sm:$0xf] }
  0x77   : > { %1081 = vmatpush.bf16.msrb.mxu1 %v5855_v7  ;;  %v5876_v7 = vld [vmem:[#allocation11 + $0x88] sm:$0xf0] }
  0x7b   : > { %1082 = vmatpush.bf16.msrb.mxu1 %v5854_v8  ;;  %v5026_v8 = vor.u32 %v5874_v3, %v5023_v5 }
  0x7d   : > { %1349 = vmatpush.bf16.msra.mxu3 %v5026_v8 }
  0x7f   : > { %1083 = vmatpush.bf16.msrb.mxu1 %v5853_v9  ;;  %v5030_v9 = vor.u32 %v5876_v7, %v5029_v6 }
  0x81   : > { %1363 = vmatpush.bf16.msra.mxu0 %v5030_v9 }
  0x83   : > { %1084 = vmatpush.bf16.msrb.mxu1 %v5852_v10  ;;  %v5009_v10 = vld [vmem:[#allocation11 + $0x60] sm:$0xf] }
  0x87   : > { %1085 = vmatpush.bf16.msrb.mxu1 %v5851_v11  ;;  %v5872_v11 = vld [vmem:[#allocation11 + $0x68] sm:$0xf0] }
  0xea   : > { %v1002_v12 = vpop.f32.mrf.mxu1 }
  0xeb   : > { %v1003_v14 = vadd.f32 %v6273_v13, %v1002_v12  ;;  %v5871_v12 = vld [vmem:[#allocation11 + $0x64] sm:$0xf] }
  0xed   : > { %6293 = vtanh.f32 %v1003_v14  ;;  %v5011_v14 = vld [vmem:[#allocation11 + $0x6c] sm:$0xf0] }
  0xf2   : > { %v1004_v15 = vpop.f32.mrf.mxu1 }
  0xf3   : > { %v1005_v16 = vadd.f32 %v6273_v13, %v1004_v15  ;;  %v6294_v17 = vpop.eup %6293  ;;  %v5010_v13 = vor.u32 %v5872_v11, %v5009_v10  ;;  %v5017_v15 = vld [vmem:[#allocation11 + $0x68] sm:$0xf] }
  0xf5   : > { %6295 = vtanh.f32 %v1005_v16  ;;  %v5873_v16 = vld [vmem:[#allocation11 + $0x70] sm:$0xf0]  ;;  %1336 = vmatpush.bf16.msra.mxu2 %v5010_v13  ;;  %v6277_v13 = vld [vmem:[#allocation8] ss:$0 sm:$0xff] }
  0xf6   : > { %6297 = vrcp.f32 %v6923_v32  ;;  %v4987_v32 = vld [vmem:[#allocation11 + $0x3c] sm:$0xf0] }
  0xfb   : > { %v6296_v18 = vpop.eup %6295 }
  0xfc   : > { %v1025_v19 = vpack.c.bf16 %v6296_v18, %v6294_v17  ;;  %v6298_v33 = vpop.eup %6297  ;;  %v5014_v17 = vor.u32 %v5871_v12, %v5011_v14  ;;  %v5018_v18 = vor.u32 %v5873_v16, %v5017_v15 }
  0xfd   : > { %v1112_v34 = vmul.f32 128.0, %v6298_v33  ;;  %vm1116_vm1 = vweird.f32 %v6298_v33 }
  0xfe   : > { %1086 = vmatmul.bf16.vlgmr.msrb.gmra.mxu1 %v1025_v19  ;;  %1350 = vmatpush.bf16.msra.mxu3 %v5014_v17  ;;  %v4997_v19 = vld [vmem:[#allocation11 + $0x48] sm:$0xf] }
  0xff   : > { %v1113_v35 = vsub.f32 1.0, %v1112_v34  ;;  %1364 = vmatpush.bf16.msra.mxu0 %v5018_v18  ;;  %v5867_v34 = vld [vmem:[#allocation11 + $0x40] sm:$0xf0]  ;;  %v6278_v18 = vld [vmem:[#allocation10] ss:$0 sm:$0xff] }
 0x101   : > { %v1114_v36 = vmul.f32 %v6298_v33, %v1113_v35 }
 0x103   : > { %v1115_v37 = vadd.f32 %v6298_v33, %v1114_v36 }
 0x105   : > { %v7272_v38 = vsel %vm1116_vm1, %v6298_v33, %v1115_v37  ;;  %v4993_v33 = vld [vmem:[#allocation11 + $0x38] sm:$0xf] }
 0x106   : > { %v4994_v36 = vor.u32 %v5867_v34, %v4993_v33  ;;  %v4973_v37 = vld [vmem:[#allocation11 + $0x18] sm:$0xf] }
 0x17b   : > { %v1087_v24 = vpop.f32.mrf.mxu1 }
 0x17c   : > { %v1088_v25 = vadd.f32 %v6274_v22, %v1087_v24  ;;  %v5005_v24 = vld [vmem:[#allocation11 + $0x50] sm:$0xf] }
 0x17e   : > { %v1103_v26 = vadd.f32 %v1097_v23, %v1088_v25  ;;  %v4999_v23 = vld [vmem:[#allocation11 + $0x54] sm:$0xf0]  ;;  %v5870_v25 = vld [vmem:[#allocation11 + $0x58] sm:$0xf0] }
 0x17f   : > { %v5006_v27 = vor.u32 %v5870_v25, %v5005_v24 }
 0x180   : > { %1107 = vadd.xlane.f32.xlu0 %v1103_v26 }
 0x181   : > { %1365 = vmatpush.bf16.msra.mxu0 %v5006_v27 }
 0x183   : > { %v1089_v29 = vpop.f32.mrf.mxu1 }
 0x184   : > { %v1090_v30 = vadd.f32 %v6274_v22, %v1089_v29  ;;  %v4998_v22 = vor.u32 %v5869_v20, %v4997_v19  ;;  %v5866_v29 = vld [vmem:[#allocation11 + $0x38] sm:$0xf0] }
 0x185   : > { %1366 = vmatpush.bf16.msra.mxu0 %v4994_v36 }
 0x186   : > { %v1104_v31 = vadd.f32 %v1102_v28, %v1090_v30  ;;  %1337 = vmatpush.bf16.msra.mxu2 %v4998_v22  ;;  %v4985_v28 = vld [vmem:[#allocation11 + $0x30] sm:$0xf]  ;;  %v5865_v30 = vld [vmem:[#allocation11 + $0x34] sm:$0xf] }
 0x187   : > { %v4990_v35 = vor.u32 %v5865_v30, %v4987_v32 }
 0x188   : > { %1109 = vadd.xlane.f32.xlu0 %v1104_v31 }
 0x1f3   : > { %v1108_v39 = vpop.xlane.xlu0 %1107 }
 0x1f4   : > { %v1118_v40 = vmul.f32 %v7272_v38, %v1108_v39  ;;  %v5863_v39 = vld [vmem:[#allocation11 + $0x20] sm:$0xf0] }
 0x1f6   : > { %v7275_v41 = vsub.f32 %v1103_v26, %v1118_v40  ;;  %v5002_v26 = vor.u32 %v5868_v21, %v4999_v23  ;;  %v5862_v40 = vld [vmem:[#allocation11 + $0x1c] sm:$0xf] }
 0x1f8   : > { %v1122_v42 = vmul.f32 %v7275_v41, %v7275_v41  ;;  %1351 = vmatpush.bf16.msra.mxu3 %v5002_v26 }
 0x1fa   : > { %1124 = vadd.xlane.f32.xlu1 %v1122_v42  ;;  %v4974_v42 = vor.u32 %v5863_v39, %v4973_v37 }
 0x1fb   : > { %v1110_v43 = vpop.xlane.xlu0 %1109 }
 0x1fc   : > { %v1119_v44 = vmul.f32 %v7272_v38, %v1110_v43  ;;  %1352 = vmatpush.bf16.msra.mxu3 %v4990_v35  ;;  %v4975_v43 = vld [vmem:[#allocation11 + $0x24] sm:$0xf0] }
 0x1fd   : > { %v4978_v47 = vor.u32 %v5862_v40, %v4975_v43 }
 0x1fe   : > { %v7280_v45 = vsub.f32 %v1104_v31, %v1119_v44  ;;  %v4986_v31 = vor.u32 %v5866_v29, %v4985_v28  ;;  %v4981_v44 = vld [vmem:[#allocation11 + $0x20] sm:$0xf] }
 0x200   : > { %v1123_v46 = vmul.f32 %v7280_v45, %v7280_v45  ;;  %1338 = vmatpush.bf16.msra.mxu2 %v4986_v31  ;;  %1353 = vmatpush.bf16.msra.mxu3 %v4978_v47 }
 0x202   : > { %1126 = vadd.xlane.f32.xlu1 %v1123_v46  ;;  %v5864_v46 = vld [vmem:[#allocation11 + $0x28] sm:$0xf0] }
 0x203   : > { %v4982_v48 = vor.u32 %v5864_v46, %v4981_v44 }
 0x204   : > { %1339 = vmatpush.bf16.msra.mxu2 %v4974_v42  ;;  %1354 = vmatpush.bf16.msra.mxu3 %v4966_v58 }
 0x205   : > { %1367 = vmatpush.bf16.msra.mxu0 %v4982_v48 }
 0x208   : > { %1340 = vmatpush.bf16.msra.mxu2 %v4962_v53 }
 0x209   : > { %1368 = vmatpush.bf16.msra.mxu0 %v4970_v59 }
 0x26d   : > { %v1125_v52 = vpop.xlane.xlu1 %1124 }
 0x26e   : > { %v1128_v57 = vmul.f32 %v1125_v52, %v7272_v38 }
 0x270   : > { %v1130_v60 = vadd.f32 1e-12, %v1128_v57 }
 0x272   : > { %6299 = vrsqrt.f32 %v1130_v60  ;;  %vm1138_vm3 = vweird.f32 %v1130_v60 }
 0x275   : > { %v1127_v61 = vpop.xlane.xlu1 %1126 }
 0x276   : > { %v1129_v62 = vmul.f32 %v1127_v61, %v7272_v38 }
 0x278   : > { %v6300_v63 = vpop.eup %6299  ;;  %v1131_v0 = vadd.f32 1e-12, %v1129_v62 }
 0x279   : > { %v1133_v1 = vmul.f32 %v6300_v63, %v1130_v60  ;;  %vm1139_vm2 = vweird.f32 %v6300_v63 }
 0x27a   : > { %6301 = vrsqrt.f32 %v1131_v0  ;;  %vm1140_vm4 = vmor %vm1138_vm3, %vm1139_vm2  ;;  %vm1148_vm6 = vweird.f32 %v1131_v0 }
 0x27b   : > { %v1134_v2 = vmul.f32 %v6300_v63, %v1133_v1 }
 0x27d   : > { %v1135_v3 = vmul.f32 0.5, %v1134_v2 }
 0x27f   : > { %v1136_v4 = vsub.f32 1.5, %v1135_v3 }
 0x280   : > { %v6302_v5 = vpop.eup %6301 }
 0x281   : > { %v1137_v6 = vmul.f32 %v6300_v63, %v1136_v4  ;;  %v1143_v7 = vmul.f32 %v6302_v5, %v1131_v0  ;;  %vm1149_vm5 = vweird.f32 %v6302_v5 }
 0x282   : > { %vm1150_vm7 = vmor %vm1148_vm6, %vm1149_vm5 }
 0x283   : > { %v1144_v8 = vmul.f32 %v6302_v5, %v1143_v7  ;;  %v1141_v9 = vsel %vm1140_vm4, %v6300_v63, %v1137_v6 }
 0x284   : > { %v1152_v12 = vmul.f32 %v1141_v9, %v7275_v41  ;;  %v1197_v41 = vld [vmem:[#allocation13] sm:$0x7] }
 0x285   : > { %v1145_v10 = vmul.f32 0.5, %v1144_v8  ;;  %v1199_v23 = vperm.slane %v1197_v41, 0  ;;  %v1200_v24 = vperm.slane %v1197_v41, 1  ;;  %v1201_v28 = vperm.slane %v1197_v41, 2 }
 0x286   : > { %v1157_v17 = vmul.f32 %v6277_v13, %v1152_v12 }
 0x287   : > { %v1146_v11 = vsub.f32 1.5, %v1145_v10 }
 0x288   : > { %v7288_v20 = vadd.f32 %v6278_v18, %v1157_v17 }
 0x289   : > { %v1147_v14 = vmul.f32 %v6302_v5, %v1146_v11 }
 0x28b   : > { %v1151_v15 = vsel %vm1150_vm7, %v6302_v5, %v1147_v14 }
 0x28c   : > { %v1153_v16 = vmul.f32 %v1151_v15, %v7280_v45 }
 0x28e   : > { %v1158_v19 = vmul.f32 %v6277_v13, %v1153_v16 }
 0x290   : > { %v7290_v21 = vadd.f32 %v6278_v18, %v1158_v19 }
 0x292   : > { %v1196_v22 = vpack.c.bf16 %v7290_v21, %v7288_v20 }
 0x294   : > { %1341 = vmatmul.bf16.vlgmr.msra.gmra.mxu2 %v1196_v22  ;;  %1355 = vmatmul.bf16.vlgmr.msra.gmra.mxu3 %v1196_v22 }
 0x295   : > { %1369 = vmatmul.bf16.vlgmr.msra.gmra.mxu0 %v1196_v22 }
 0x312   : > { %v1370_v29 = vpop.f32.mrf.mxu0 }
 0x313   : > { %v7298_v32 = vadd.f32 %v1370_v29, %v1201_v28 }
 0x315   : > { %v1451_v37 = vpack.c.bf16 %v7298_v32, %v7298_v32 }
 0x317   : > { %v1342_v25 = vpop.f32.mrf.mxu2  ;;  %v1356_v26 = vpop.f32.mrf.mxu3  ;;  %v1714_v43 = vsel %vm1712_vm9, %v1451_v37, 0 }
 0x318   : > { %v1343_v27 = vadd.f32 %v1342_v25, %v1199_v23  ;;  %v1357_v45 = vadd.f32 %v1356_v26, %v1200_v24 }
 0x31a   : > { %1407 = vrot.lane.b32.xlu2 %v1357_v45, %s6924_s30  ;;  %1376 = vrot.lane.b32.xlu1 %v1343_v27, %s6925_s11  ;;  %v1423_v30 = vpack.c.bf16 %v1357_v45, %v1357_v45  ;;  %v1395_v39 = vpack.c.bf16 %v1343_v27, %v1343_v27  ;;  %v1372_v44 = vpop.f32.mrf.mxu0 }
 0x31b   : > { %1379 = vrot.lane.b32.xlu0 %v1343_v27, %s6924_s30  ;;  %v7310_v46 = vadd.f32 %v1372_v44, %v1201_v28 }
 0x31c   : > { %v1464_v31 = vsel %vm1459_vm8, %v1423_v30, 0 }
 0x31d   : > { %1473 = vmatpush.bf16.xpose.msra.mxu1 %v1464_v31  ;;  %v1455_v47 = vpack.c.bf16 %v7310_v46, %v7310_v46 }
 0x31f   : > { %v1344_v33 = vpop.f32.mrf.mxu2  ;;  %v1358_v34 = vpop.f32.mrf.mxu3  ;;  %v1790_v49 = vsel %vm1712_vm9, %v1455_v47, 0 }
 0x320   : > { %v1345_v35 = vadd.f32 %v1344_v33, %v1199_v23  ;;  %v1359_v36 = vadd.f32 %v1358_v34, %v1200_v24 }
 0x322   : > { %1404 = vrot.lane.b32.xlu2 %v1357_v45, %s6925_s11  ;;  %1386 = vrot.lane.b32.xlu1 %v1345_v35, %s6925_s11  ;;  %v1427_v40 = vpack.c.bf16 %v1359_v36, %v1359_v36  ;;  %v1399_v48 = vpack.c.bf16 %v1345_v35, %v1345_v35 }
 0x323   : > { %1389 = vrot.lane.b32.xlu0 %v1345_v35, %s6924_s30 }
 0x324   : > { %5055 = vmatmul.msk.bf16.vlgmr.msra.gmra.mxu1 %vm1459_vm8, %v1395_v39  ;;  %v1540_v42 = vsel %vm1459_vm8, %v1427_v40, 0  ;;  %v6253_v40 = vpack.i.bf16 %v7310_v46, %v7298_v32 }
 0x325   : > { %1549 = vmatpush.bf16.xpose.msrb.mxu1 %v1540_v42 }
 0x32a   : > { %1410 = vrot.lane.b32.xlu2 %v1357_v45, %s6926_s4 }
 0x32b   : > { %1420 = vrot.lane.b32.xlu0 %v1359_v36, %s6926_s4 }
 0x32d   : > { %1723 = vmatpush.bf16.msra.mxu1 %v1714_v43 }
 0x332   : > { %1417 = vrot.lane.b32.xlu2 %v1359_v36, %s6924_s30 }
 0x334   : > { %5059 = vmatmul.msk.bf16.vlgmr.msrb.gmra.mxu1 %vm1459_vm8, %v1399_v48 }
 0x335   : > { %1799 = vmatpush.bf16.msrb.mxu1 %v1790_v49 }
 0x33a   : > { %1414 = vrot.lane.b32.xlu2 %v1359_v36, %s6925_s11 }
 0x342   : > { %1382 = vrot.lane.b32.xlu2 %v1343_v27, %s6926_s4 }
 0x34a   : > { %1392 = vrot.lane.b32.xlu2 %v1345_v35, %s6926_s4 }
 0x374   : > { %v1408_v50 = vpop.permute.xlu2 %1407 }
 0x375   : > { %v1425_v51 = vpack.c.bf16 %v1408_v50, %v1408_v50 }
 0x377   : > { %v1502_v52 = vsel %vm1459_vm8, %v1425_v51, 0 }
 0x378   : > { %1511 = vmatpush.bf16.xpose.msrb.mxu3 %v1502_v52 }
 0x37c   : > { %v1405_v53 = vpop.permute.xlu2 %1404 }
 0x37d   : > { %v1424_v54 = vpack.c.bf16 %v1405_v53, %v1405_v53 }
 0x37f   : > { %v1483_v55 = vsel %vm1459_vm8, %v1424_v54, 0 }
 0x380   : > { %1492 = vmatpush.bf16.xpose.msrb.mxu2 %v1483_v55 }
 0x384   : > { %v1411_v56 = vpop.permute.xlu2 %1410 }
 0x385   : > { %v1426_v57 = vpack.c.bf16 %v1411_v56, %v1411_v56 }
 0x387   : > { %v1521_v58 = vsel %vm1459_vm8, %v1426_v57, 0 }
 0x388   : > { %1530 = vmatpush.bf16.xpose.msrb.mxu0 %v1521_v58 }
 0x38c   : > { %v1418_v59 = vpop.permute.xlu2 %1417  ;;  %v1377_v60 = vpop.permute.xlu1 %1376 }
 0x38d   : > { %v1429_v61 = vpack.c.bf16 %v1418_v59, %v1418_v59  ;;  %v1396_v62 = vpack.c.bf16 %v1377_v60, %v1377_v60  ;;  %v1380_v63 = vpop.permute.xlu0 %1379 }
 0x38e   : > { %v1397_v0 = vpack.c.bf16 %v1380_v63, %v1380_v63 }
 0x38f   : > { %v1578_v1 = vsel %vm1459_vm8, %v1429_v61, 0  ;;  %5056 = vmatmul.msk.bf16.vlgmr.msrb.gmra.mxu2 %vm1459_vm8, %v1396_v62 }
 0x390   : > { %5057 = vmatmul.msk.bf16.vlgmr.msrb.gmra.mxu3 %vm1459_vm8, %v1397_v0 }
 0x391   : > { %1587 = vmatpush.bf16.xpose.msra.mxu3 %v1578_v1 }
 0x394   : > { %v1415_v2 = vpop.permute.xlu2 %1414  ;;  %v1387_v6 = vpop.permute.xlu1 %1386 }
 0x395   : > { %v1428_v3 = vpack.c.bf16 %v1415_v2, %v1415_v2  ;;  %v1390_v4 = vpop.permute.xlu0 %1389  ;;  %v1400_v8 = vpack.c.bf16 %v1387_v6, %v1387_v6 }
 0x396   : > { %v1401_v11 = vpack.c.bf16 %v1390_v4, %v1390_v4 }
 0x397   : > { %v1559_v5 = vsel %vm1459_vm8, %v1428_v3, 0 }
 0x398   : > { %1568 = vmatpush.bf16.xpose.msra.mxu2 %v1559_v5 }
 0x39c   : > { %v1383_v7 = vpop.permute.xlu2 %1382 }
 0x39d   : > { %v1398_v9 = vpack.c.bf16 %v1383_v7, %v1383_v7  ;;  %v1421_v10 = vpop.permute.xlu0 %1420 }
 0x39e   : > { %v1430_v12 = vpack.c.bf16 %v1421_v10, %v1421_v10 }
 0x39f   : > { %5058 = vmatmul.msk.bf16.vlgmr.msrb.gmra.mxu0 %vm1459_vm8, %v1398_v9  ;;  %5060 = vmatmul.msk.bf16.vlgmr.msra.gmra.mxu2 %vm1459_vm8, %v1400_v8 }
 0x3a0   : > { %v1597_v13 = vsel %vm1459_vm8, %v1430_v12, 0  ;;  %5061 = vmatmul.msk.bf16.vlgmr.msra.gmra.mxu3 %vm1459_vm8, %v1401_v11 }
 0x3a1   : > { %1606 = vmatpush.bf16.xpose.msra.mxu0 %v1597_v13  ;;  %v1475_v14 = vpop.f32.mrf.mxu1 }
 0x3a2   : > { %v1613_v15 = vsel %vm1612_vm10, %v1475_v14, -inf }
 0x3a3   : > { %1614 = vmax.xlane.f32.xlu0 %v1613_v15 }
 0x3a4   : > { %v1393_v17 = vpop.permute.xlu2 %1392 }
 0x3a5   : > { %v1402_v18 = vpack.c.bf16 %v1393_v17, %v1393_v17 }
 0x3a9   : > { %v1477_v16 = vpop.f32.mrf.mxu1 }
 0x3af   : > { %5062 = vmatmul.msk.bf16.vlgmr.msra.gmra.mxu0 %vm1459_vm8, %v1402_v18 }
 0x3b1   : > { %v1551_v19 = vpop.f32.mrf.mxu1 }
 0x3b2   : > { %v1625_v22 = vsel %vm1612_vm10, %v1551_v19, -inf }
 0x3b3   : > { %1626 = vmax.xlane.f32.xlu2 %v1625_v22 }
 0x3b9   : > { %v1553_v41 = vpop.f32.mrf.mxu1 }
 0x412   : > { %v1494_v23 = vpop.f32.mrf.mxu2 }
 0x413   : > { %v1513_v24 = vpop.f32.mrf.mxu3  ;;  %v1616_v25 = vsel %vm1612_vm10, %v1494_v23, -inf }
 0x414   : > { %1617 = vmax.xlane.f32.xlu2 %v1616_v25  ;;  %v1619_v36 = vsel %vm1612_vm10, %v1513_v24, -inf }
 0x416   : > { %v1615_v26 = vpop.xlane.xlu0 %1614 }
 0x417   : > { %v1637_v28 = vsub.f32 %v1475_v14, %v1615_v26 }
 0x419   : > { %v1645_v31 = vmul.f32 1.442695, %v1637_v28 }
 0x41a   : > { %v1496_v27 = vpop.f32.mrf.mxu2 }
 0x41b   : > { %v1515_v45 = vpop.f32.mrf.mxu3  ;;  %6303 = vpow2.f32 %v1645_v31 }
 0x41c   : > { %v1532_v29 = vpop.f32.mrf.mxu0 }
 0x41d   : > { %v1622_v30 = vsel %vm1612_vm10, %v1532_v29, -inf }
 0x41e   : > { %1623 = vmax.xlane.f32.xlu1 %v1622_v30 }
 0x421   : > { %v6304_v37 = vpop.eup %6303 }
 0x422   : > { %v7336_v33 = vpop.f32.mrf.mxu2  ;;  %v1661_v47 = vsel %vm1612_vm10, %v6304_v37, 0.0 }
 0x423   : > { %v7338_v34 = vpop.f32.mrf.mxu3  ;;  %v1628_v50 = vsel %vm1612_vm10, %v7336_v33, -inf }
 0x424   : > { %v1534_v35 = vpop.f32.mrf.mxu0  ;;  %v1631_v49 = vsel %vm1612_vm10, %v7338_v34, -inf }
 0x426   : > { %1620 = vmax.xlane.f32.xlu1 %v1619_v36  ;;  %v1627_v51 = vpop.xlane.xlu2 %1626 }
 0x427   : > { %v1641_v52 = vsub.f32 %v1551_v19, %v1627_v51 }
 0x429   : > { %v1653_v53 = vmul.f32 1.442695, %v1641_v52 }
 0x42a   : > { %v1572_v39 = vpop.f32.mrf.mxu2 }
 0x42b   : > { %v1591_v42 = vpop.f32.mrf.mxu3  ;;  %6305 = vpow2.f32 %v1653_v53 }
 0x42c   : > { %v7343_v43 = vpop.f32.mrf.mxu0  ;;  %6254 = vrot.lane.b32.xlu2 %v6253_v40, %s6924_s30 }
 0x42d   : > { %v1634_v44 = vsel %vm1612_vm10, %v7343_v43, -inf }
 0x42e   : > { %1635 = vmax.xlane.f32.xlu0 %v1634_v44  ;;  %1662 = vadd.xlane.f32.xlu1 %v1661_v47 }
 0x431   : > { %v7357_v54 = vpop.eup %6305 }
 0x432   : > { %v1673_v55 = vsel %vm1612_vm10, %v7357_v54, 0.0 }
 0x434   : > { %v1610_v48 = vpop.f32.mrf.mxu0 }
 0x436   : > { %1632 = vmax.xlane.f32.xlu0 %v1631_v49  ;;  %1629 = vmax.xlane.f32.xlu1 %v1628_v50 }
 0x44a   : > { %1438 = vrot.lane.b32.xlu0 %v7298_v32, %s6926_s4 }
 0x44f   : > { %1432 = vrot.lane.b32.xlu1 %v7298_v32, %s6925_s11 }
 0x455   : > { %1674 = vadd.xlane.f32.xlu2 %v1673_v55 }
 0x487   : > { %v1618_v56 = vpop.xlane.xlu2 %1617 }
 0x488   : > { %v1638_v0 = vsub.f32 %v1494_v23, %v1618_v56 }
 0x48a   : > { %v1647_v3 = vmul.f32 1.442695, %v1638_v0 }
 0x48f   : > { %v6255_v57 = vpop.permute.xlu2 %6254 }
 0x490   : > { %v6257_v58 = vunpack.i.h.bf16 %v6255_v57  ;;  %v6256_v59 = vunpack.i.l.bf16 %v6255_v57 }
 0x491   : > { %v1624_v60 = vpop.xlane.xlu1 %1623 }
 0x492   : > { %v1457_v61 = vpack.c.bf16 %v6257_v58, %v6257_v58  ;;  %v1453_v62 = vpack.c.bf16 %v6256_v59, %v6256_v59  ;;  %v1640_v63 = vsub.f32 %v1532_v29, %v1624_v60 }
 0x494   : > { %v1651_v1 = vmul.f32 1.442695, %v1640_v63  ;;  %v1752_v2 = vsel %vm1712_vm9, %v1453_v62, 0  ;;  %v1828_v32 = vsel %vm1712_vm9, %v1457_v61, 0 }
 0x495   : > { %1761 = vmatpush.bf16.msrb.mxu3 %v1752_v2 }
 0x496   : > { %6307 = vpow2.f32 %v1651_v1 }
 0x497   : > { %6309 = vpow2.f32 %v1647_v3 }
 0x499   : > { %1837 = vmatpush.bf16.msra.mxu3 %v1828_v32  ;;  %v1621_v4 = vpop.xlane.xlu1 %1620 }
 0x49a   : > { %v1639_v5 = vsub.f32 %v1513_v24, %v1621_v4 }
 0x49c   : > { %v6308_v6 = vpop.eup %6307  ;;  %v1649_v7 = vmul.f32 1.442695, %v1639_v5 }
 0x49d   : > { %v1670_v8 = vsel %vm1612_vm10, %v6308_v6, 0.0  ;;  %v6310_v11 = vpop.eup %6309 }
 0x49e   : > { %6311 = vpow2.f32 %v1649_v7  ;;  %1671 = vadd.xlane.f32.xlu0 %v1670_v8  ;;  %v1664_v14 = vsel %vm1612_vm10, %v6310_v11, 0.0  ;;  %v5884_v7 = vld [vmem:[#allocation14 + $0x8] sm:$0xff] }
 0x4a1   : > { %v1663_v9 = vpop.xlane.xlu1 %1662  ;;  %v1636_v10 = vpop.xlane.xlu0 %1635 }
 0x4a2   : > { %6313 = vrcp.f32 %v1663_v9  ;;  %v1644_v40 = vsub.f32 %v7343_v43, %v1636_v10  ;;  %v5883_v10 = vld [vmem:[#allocation14] sm:$0xff] }
 0x4a4   : > { %v6312_v12 = vpop.eup %6311  ;;  %v1659_v42 = vmul.f32 1.442695, %v1644_v40 }
 0x4a5   : > { %v1667_v13 = vsel %vm1612_vm10, %v6312_v12, 0.0 }
 0x4a6   : > { %1668 = vadd.xlane.f32.xlu2 %v1667_v13  ;;  %1665 = vadd.xlane.f32.xlu0 %v1664_v14  ;;  %v5890_v13 = vld [vmem:[#allocation14 + $0x38] sm:$0xff] }
 0x4a8   : > { %v6314_v15 = vpop.eup %6313 }
 0x4a9   : > { %v1693_v16 = vmul.f32 %v6314_v15, %v6304_v37  ;;  %v1630_v17 = vpop.xlane.xlu1 %1629  ;;  %v1633_v18 = vpop.xlane.xlu0 %1632 }
 0x4aa   : > { %v1642_v19 = vsub.f32 %v7336_v33, %v1630_v17  ;;  %v1643_v22 = vsub.f32 %v7338_v34, %v1633_v18 }
 0x4ab   : > { %v1701_v41 = vpack.c.bf16 %v1693_v16, %v1693_v16 }
 0x4ac   : > { %v1655_v23 = vmul.f32 1.442695, %v1642_v19  ;;  %v1657_v24 = vmul.f32 1.442695, %v1643_v22  ;;  %v5889_v22 = vld [vmem:[#allocation14 + $0x30] sm:$0xff] }
 0x4ad   : > { %5063 = vmatmul.msk.bf16.vlgmr.msra.gmra.mxu1 %vm1612_vm10, %v1701_v41  ;;  %v5886_v41 = vld [vmem:[#allocation14 + $0x18] sm:$0xff] }
 0x4ae   : > { %6315 = vpow2.f32 %v1655_v23  ;;  %v5888_v23 = vld [vmem:[#allocation14 + $0x28] sm:$0xff]  ;;  %1907 = vmatpush.bf16.msra.mxu1 %v5886_v41 }
 0x4af   : > { %6317 = vpow2.f32 %v1657_v24  ;;  %v5885_v24 = vld [vmem:[#allocation14 + $0x10] sm:$0xff] }
 0x4b2   : > { %1908 = vmatpush.bf16.msra.mxu1 %v5885_v24 }
 0x4b4   : > { %v6316_v25 = vpop.eup %6315 }
 0x4b5   : > { %v6318_v26 = vpop.eup %6317  ;;  %v1676_v27 = vsel %vm1612_vm10, %v6316_v25, 0.0 }
 0x4b6   : > { %1677 = vadd.xlane.f32.xlu1 %v1676_v27  ;;  %v1679_v45 = vsel %vm1612_vm10, %v6318_v26, 0.0 }
 0x4b7   : > { %1680 = vadd.xlane.f32.xlu0 %v1679_v45 }
 0x4bc   : > { %v1439_v28 = vpop.permute.xlu0 %1438 }
 0x4bd   : > { %v1454_v29 = vpack.c.bf16 %v1439_v28, %v1439_v28 }
 0x4be   : > { %1448 = vrot.lane.b32.xlu2 %v7310_v46, %s6926_s4 }
 0x4bf   : > { %v1771_v30 = vsel %vm1712_vm9, %v1454_v29, 0 }
 0x4c0   : > { %1780 = vmatpush.bf16.msrb.mxu0 %v1771_v30 }
 0x4c1   : > { %v1433_v31 = vpop.permute.xlu1 %1432 }
 0x4c2   : > { %v1452_v33 = vpack.c.bf16 %v1433_v31, %v1433_v31 }
 0x4c4   : > { %v1733_v34 = vsel %vm1712_vm9, %v1452_v33, 0 }
 0x4c5   : > { %1742 = vmatpush.bf16.msrb.mxu2 %v1733_v34 }
 0x4c8   : > { %v1675_v35 = vpop.xlane.xlu2 %1674 }
 0x4c9   : > { %6319 = vrcp.f32 %v1675_v35 }
 0x4ca   : > { %6321 = vpow2.f32 %v1659_v42 }
 0x4cb   : > { %1442 = vrot.lane.b32.xlu0 %v7310_v46, %s6925_s11 }
 0x4cf   : > { %v6320_v36 = vpop.eup %6319 }
 0x4d0   : > { %v1697_v37 = vmul.f32 %v6320_v36, %v7357_v54  ;;  %v6322_v44 = vpop.eup %6321 }
 0x4d1   : > { %v1682_v47 = vsel %vm1612_vm10, %v6322_v44, 0.0 }
 0x4d2   : > { %v1705_v39 = vpack.c.bf16 %v1697_v37, %v1697_v37 }
 0x4d4   : > { %5067 = vmatmul.msk.bf16.vlgmr.msrb.gmra.mxu1 %vm1612_vm10, %v1705_v39 }
 0x4d5   : > { %2009 = vmatpush.bf16.msrb.mxu1 %v5886_v41  ;;  %v5922_v41 = vld [vmem:[#allocation17 + $0xf4] sm:$0xf0] }
 0x4d9   : > { %2010 = vmatpush.bf16.msrb.mxu1 %v5885_v24 }
 0x4f5   : > { %1683 = vadd.xlane.f32.xlu0 %v1682_v47 }
 0x511   : > { %v1672_v48 = vpop.xlane.xlu0 %1671 }
 0x512   : > { %6323 = vrcp.f32 %v1672_v48 }
 0x518   : > { %v6324_v49 = vpop.eup %6323 }
 0x519   : > { %v1696_v50 = vmul.f32 %v6324_v49, %v6308_v6  ;;  %v1666_v51 = vpop.xlane.xlu0 %1665  ;;  %v1669_v46 = vpop.xlane.xlu2 %1668 }
 0x51a   : > { %6325 = vrcp.f32 %v1666_v51 }
 0x51b   : > { %v1704_v52 = vpack.c.bf16 %v1696_v50, %v1696_v50  ;;  %6327 = vrcp.f32 %v1669_v46 }
 0x51d   : > { %5066 = vmatmul.msk.bf16.vlgmr.msrb.gmra.mxu0 %vm1612_vm10, %v1704_v52 }
 0x520   : > { %v6326_v53 = vpop.eup %6325 }
 0x521   : > { %v6328_v54 = vpop.eup %6327  ;;  %v1694_v43 = vmul.f32 %v6326_v53, %v6310_v11  ;;  %v1449_v55 = vpop.permute.xlu2 %1448 }
 0x522   : > { %v1695_v56 = vmul.f32 %v6328_v54, %v6312_v12  ;;  %v1458_v57 = vpack.c.bf16 %v1449_v55, %v1449_v55 }
 0x523   : > { %v1702_v58 = vpack.c.bf16 %v1694_v43, %v1694_v43 }
 0x524   : > { %v1703_v59 = vpack.c.bf16 %v1695_v56, %v1695_v56  ;;  %v1847_v60 = vsel %vm1712_vm9, %v1458_v57, 0 }
 0x525   : > { %5064 = vmatmul.msk.bf16.vlgmr.msrb.gmra.mxu2 %vm1612_vm10, %v1702_v58  ;;  %1856 = vmatpush.bf16.msra.mxu0 %v1847_v60  ;;  %v6279_v58 = vld [vmem:[%s7738_s12] ss:$0 sm:$0xff] }
 0x526   : > { %5065 = vmatmul.msk.bf16.vlgmr.msrb.gmra.mxu3 %vm1612_vm10, %v1703_v59 }
 0x527   : > { %1963 = vmatpush.bf16.msrb.mxu3 %v5888_v23 }
 0x529   : > { %v1678_v0 = vpop.xlane.xlu1 %1677  ;;  %1992 = vmatpush.bf16.msrb.mxu0 %v5890_v13 }
 0x52a   : > { %v1681_v61 = vpop.xlane.xlu0 %1680  ;;  %v1725_v62 = vpop.f32.mrf.mxu1 }
 0x52b   : > { %6329 = vrcp.f32 %v1681_v61  ;;  %v1878_v12 = vpack.c.bf16 %v1725_v62, %v1725_v62 }
 0x52c   : > { %6331 = vrcp.f32 %v1678_v0 }
 0x52d   : > { %1993 = vmatpush.bf16.msrb.mxu0 %v5889_v22 }
 0x531   : > { %v6330_v63 = vpop.eup %6329 }
 0x532   : > { %v1699_v1 = vmul.f32 %v6330_v63, %v6318_v26  ;;  %v1727_v2 = vpop.f32.mrf.mxu1  ;;  %v6332_v3 = vpop.eup %6331 }
 0x533   : > { %v1698_v5 = vmul.f32 %v6332_v3, %v6316_v25  ;;  %v5887_v25 = vld [vmem:[#allocation14 + $0x20] sm:$0xff] }
 0x534   : > { %v1707_v32 = vpack.c.bf16 %v1699_v1, %v1699_v1  ;;  %1964 = vmatpush.bf16.msrb.mxu3 %v5887_v25 }
 0x535   : > { %v1706_v9 = vpack.c.bf16 %v1698_v5, %v1698_v5 }
 0x536   : > { %5069 = vmatmul.msk.bf16.vlgmr.msra.gmra.mxu3 %vm1612_vm10, %v1707_v32 }
 0x538   : > { %2041 = vmatpush.bf16.msra.mxu3 %v5888_v23 }
 0x53c   : > { %2042 = vmatpush.bf16.msra.mxu3 %v5887_v25  ;;  %v5920_v25 = vld [vmem:[#allocation17 + $0xec] sm:$0xf] }
 0x53d   : > { %v1443_v4 = vpop.permute.xlu0 %1442 }
 0x53e   : > { %v1456_v6 = vpack.c.bf16 %v1443_v4, %v1443_v4 }
 0x540   : > { %v1809_v8 = vsel %vm1712_vm9, %v1456_v6, 0 }
 0x541   : > { %1818 = vmatpush.bf16.msra.mxu2 %v1809_v8 }
 0x544   : > { %5068 = vmatmul.msk.bf16.vlgmr.msra.gmra.mxu2 %vm1612_vm10, %v1706_v9 }
 0x545   : > { %1935 = vmatpush.bf16.msrb.mxu2 %v5884_v7 }
 0x549   : > { %1936 = vmatpush.bf16.msrb.mxu2 %v5883_v10 }
 0x54d   : > { %2025 = vmatpush.bf16.msra.mxu2 %v5884_v7 }
 0x551   : > { %2026 = vmatpush.bf16.msra.mxu2 %v5883_v10  ;;  %v1801_v11 = vpop.f32.mrf.mxu1 }
 0x552   : > { %v1882_v15 = vpack.c.bf16 %v1801_v11, %v1801_v11 }
 0x554   : > { %5088 = vmatmul.msk.bf16.vlgmr.msrb.gmra.mxu2 %vm1459_vm8, %v1878_v12 }
 0x559   : > { %v1803_v14 = vpop.f32.mrf.mxu1 }
 0x564   : > { %5108 = vmatmul.msk.bf16.vlgmr.msra.gmra.mxu2 %vm1459_vm8, %v1882_v15 }
 0x568   : > { %v1684_v16 = vpop.xlane.xlu0 %1683 }
 0x569   : > { %6333 = vrcp.f32 %v1684_v16  ;;  %v5921_v16 = vld [vmem:[#allocation17 + $0xec] sm:$0xf0] }
 0x56f   : > { %v6334_v17 = vpop.eup %6333 }
 0x570   : > { %v1700_v18 = vmul.f32 %v6334_v17, %v6322_v44  ;;  %v5919_v17 = vld [vmem:[#allocation17 + $0xe4] sm:$0xf] }
 0x572   : > { %v1708_v19 = vpack.c.bf16 %v1700_v18, %v1700_v18 }
 0x574   : > { %5070 = vmatmul.msk.bf16.vlgmr.msra.gmra.mxu0 %vm1612_vm10, %v1708_v19  ;;  %v5227_v19 = vld [vmem:[#allocation17 + $0xf0] sm:$0xf0] }
 0x575   : > { %2058 = vmatpush.bf16.msra.mxu0 %v5890_v13  ;;  %v5230_v23 = vor.u32 %v5919_v17, %v5227_v19  ;;  %v5145_v17 = vld [vmem:[#allocation17 + $0x40] sm:$0xf]  ;;  %v5899_v19 = vld [vmem:[#allocation17 + $0x44] sm:$0xf] }
 0x577   : > { %2343 = vmatpush.bf16.msrb.mxu2 %v5230_v23  ;;  %v5153_v23 = vld [vmem:[#allocation17 + $0x48] sm:$0xf] }
 0x579   : > { %2059 = vmatpush.bf16.msra.mxu0 %v5889_v22  ;;  %v5233_v22 = vld [vmem:[#allocation17 + $0xe8] sm:$0xf] }
 0x57a   : > { %v5234_v24 = vor.u32 %v5922_v41, %v5233_v22  ;;  %v5147_v41 = vld [vmem:[#allocation17 + $0x50] sm:$0xf0] }
 0x59a   : > { %v1782_v26 = vpop.f32.mrf.mxu0 }
 0x59b   : > { %v1881_v27 = vpack.c.bf16 %v1782_v26, %v1782_v26  ;;  %v5235_v26 = vld [vmem:[#allocation17 + $0xf8] sm:$0xf0] }
 0x59d   : > { %5106 = vmatmul.msk.bf16.vlgmr.msrb.gmra.mxu0 %vm1459_vm8, %v1881_v27  ;;  %v5238_v27 = vor.u32 %v5920_v25, %v5235_v26  ;;  %v5150_v25 = vor.u32 %v5899_v19, %v5147_v41  ;;  %v5929_v19 = vld [vmem:[#allocation19 + $0x30] sm:$0xff]  ;;  %v5946_v41 = vld [vmem:[#allocation19 + $0xb8] sm:$0xff] }
 0x59f   : > { %2371 = vmatpush.bf16.msrb.mxu0 %v5238_v27  ;;  %v5900_v27 = vld [vmem:[#allocation17 + $0x4c] sm:$0xf] }
 0x5a2   : > { %v1784_v45 = vpop.f32.mrf.mxu0 }
 0x5a3   : > { %v5209_v45 = vld [vmem:[#allocation17 + $0xc0] sm:$0xf] }
 0x5a8   : > { %v1744_v28 = vpop.f32.mrf.mxu2 }
 0x5a9   : > { %v1879_v29 = vpack.c.bf16 %v1744_v28, %v1744_v28  ;;  %v1763_v30 = vpop.f32.mrf.mxu3  ;;  %v5917_v28 = vld [vmem:[#allocation17 + $0xcc] sm:$0xf0] }
 0x5aa   : > { %v1880_v31 = vpack.c.bf16 %v1763_v30, %v1763_v30  ;;  %v5210_v30 = vor.u32 %v5917_v28, %v5209_v45  ;;  %v5155_v45 = vld [vmem:[#allocation17 + $0x58] sm:$0xf0] }
 0x5ab   : > { %5079 = vmatmul.msk.bf16.vlgmr.msra.gmra.mxu1 %vm1459_vm8, %v1879_v29  ;;  %v5915_v29 = vld [vmem:[#allocation17 + $0xc4] sm:$0xf]  ;;  %v5158_v28 = vor.u32 %v5900_v27, %v5155_v45 }
 0x5ac   : > { %5097 = vmatmul.msk.bf16.vlgmr.msrb.gmra.mxu3 %vm1459_vm8, %v1880_v31  ;;  %v5211_v31 = vld [vmem:[#allocation17 + $0xd0] sm:$0xf0]  ;;  %v5927_v27 = vld [vmem:[#allocation19 + $0x20] sm:$0xff] }
 0x5ad   : > { %2357 = vmatpush.bf16.msrb.mxu3 %v5234_v24  ;;  %v5902_v24 = vld [vmem:[#allocation17 + $0x54] sm:$0xf0]  ;;  %v5951_v45 = vld [vmem:[#allocation19 + $0xe0] sm:$0xff] }
 0x5ae   : > { %v5154_v26 = vor.u32 %v5902_v24, %v5153_v23  ;;  %v5928_v23 = vld [vmem:[#allocation19 + $0x28] sm:$0xff] }
 0x5af   : > { %v5952_v24 = vld [vmem:[#allocation19 + $0xe8] sm:$0xff] }
 0x5b0   : > { %v1746_v33 = vpop.f32.mrf.mxu2 }
 0x5b1   : > { %v1765_v34 = vpop.f32.mrf.mxu3  ;;  %v5217_v33 = vld [vmem:[#allocation17 + $0xc8] sm:$0xf] }
 0x5b2   : > { %v5918_v34 = vld [vmem:[#allocation17 + $0xd4] sm:$0xf0] }
 0x5b9   : > { %v1839_v35 = vpop.f32.mrf.mxu3 }
 0x5ba   : > { %v1884_v36 = vpack.c.bf16 %v1839_v35, %v1839_v35  ;;  %v5214_v35 = vor.u32 %v5915_v29, %v5211_v31  ;;  %v5129_v29 = vld [vmem:[#allocation17 + $0x20] sm:$0xf]  ;;  %v5895_v31 = vld [vmem:[#allocation17 + $0x24] sm:$0xf] }
 0x5bc   : > { %5109 = vmatmul.msk.bf16.vlgmr.msra.gmra.mxu3 %vm1459_vm8, %v1884_v36  ;;  %v5218_v36 = vor.u32 %v5918_v34, %v5217_v33  ;;  %2344 = vmatpush.bf16.msrb.mxu2 %v5214_v35  ;;  %v5131_v34 = vld [vmem:[#allocation17 + $0x30] sm:$0xf0]  ;;  %v5137_v35 = vld [vmem:[#allocation17 + $0x28] sm:$0xf] }
 0x5be   : > { %2358 = vmatpush.bf16.msrb.mxu3 %v5218_v36  ;;  %v5898_v36 = vld [vmem:[#allocation17 + $0x34] sm:$0xf0] }
 0x5c1   : > { %v1841_v37 = vpop.f32.mrf.mxu3 }
 0x5c2   : > { %v5916_v37 = vld [vmem:[#allocation17 + $0xcc] sm:$0xf] }
 0x5c7   : > { %v1820_v39 = vpop.f32.mrf.mxu2 }
 0x5c8   : > { %v1883_v40 = vpack.c.bf16 %v1820_v39, %v1820_v39  ;;  %v5219_v39 = vld [vmem:[#allocation17 + $0xd8] sm:$0xf0] }
 0x5ca   : > { %5107 = vmatmul.msk.bf16.vlgmr.msrb.gmra.mxu1 %vm1459_vm8, %v1883_v40  ;;  %v5222_v40 = vor.u32 %v5916_v37, %v5219_v39  ;;  %v5134_v37 = vor.u32 %v5895_v31, %v5131_v34  ;;  %v5138_v39 = vor.u32 %v5898_v36, %v5137_v35  ;;  %v5950_v31 = vld [vmem:[#allocation19 + $0xd8] sm:$0xff]  ;;  %v5943_v34 = vld [vmem:[#allocation19 + $0xa0] sm:$0xff]  ;;  %v5925_v35 = vld [vmem:[#allocation19 + $0x10] sm:$0xff] }
 0x5cb   : > { %v5949_v36 = vld [vmem:[#allocation19 + $0xd0] sm:$0xff] }
 0x5cc   : > { %2372 = vmatpush.bf16.msrb.mxu0 %v5222_v40  ;;  %v5896_v40 = vld [vmem:[#allocation17 + $0x2c] sm:$0xf] }
 0x5cf   : > { %v1822_v42 = vpop.f32.mrf.mxu2 }
 0x5d0   : > { %v5193_v42 = vld [vmem:[#allocation17 + $0xa0] sm:$0xf] }
 0x5d7   : > { %v1938_v44 = vpop.f32.mrf.mxu2 }
 0x5df   : > { %v1940_v47 = vpop.f32.mrf.mxu2 }
 0x5e0   : > { %v5911_v47 = vld [vmem:[#allocation17 + $0xa4] sm:$0xf] }
 0x5e7   : > { %v2028_v48 = vpop.f32.mrf.mxu2 }
 0x5ef   : > { %v2030_v49 = vpop.f32.mrf.mxu2 }
 0x5f0   : > { %v5195_v49 = vld [vmem:[#allocation17 + $0xb0] sm:$0xf0] }
 0x5f1   : > { %v1858_v50 = vpop.f32.mrf.mxu0 }
 0x5f2   : > { %v1885_v51 = vpack.c.bf16 %v1858_v50, %v1858_v50  ;;  %v5201_v50 = vld [vmem:[#allocation17 + $0xa8] sm:$0xf] }
 0x5f4   : > { %5110 = vmatmul.msk.bf16.vlgmr.msra.gmra.mxu0 %vm1459_vm8, %v1885_v51  ;;  %v5914_v51 = vld [vmem:[#allocation17 + $0xb4] sm:$0xf0] }
 0x5f9   : > { %v1860_v46 = vpop.f32.mrf.mxu0 }
 0x5fa   : > { %v5198_v46 = vor.u32 %v5911_v47, %v5195_v49  ;;  %v5891_v49 = vld [vmem:[#allocation17 + $0x4] sm:$0xf] }
 0x5fc   : > { %2345 = vmatpush.bf16.msrb.mxu2 %v5198_v46 }
 0x61a   : > { %v1995_v52 = vpop.f32.mrf.mxu0 }
 0x622   : > { %v1997_v53 = vpop.f32.mrf.mxu0 }
 0x623   : > { %v5912_v53 = vld [vmem:[#allocation17 + $0xac] sm:$0xf] }
 0x628   : > { %v1910_v54 = vpop.f32.mrf.mxu1 }
 0x629   : > { %v1939_v43 = vadd.f32 %v1938_v44, %v1910_v54  ;;  %v5913_v44 = vld [vmem:[#allocation17 + $0xac] sm:$0xf0]  ;;  %v5203_v54 = vld [vmem:[#allocation17 + $0xb8] sm:$0xf0] }
 0x62f   : > { %v1966_v55 = vpop.f32.mrf.mxu3 }
 0x630   : > { %v1970_v56 = vadd.f32 %v1966_v55, %v1939_v43  ;;  %v1912_v57 = vpop.f32.mrf.mxu1  ;;  %v5206_v55 = vor.u32 %v5912_v53, %v5203_v54  ;;  %v5121_v53 = vld [vmem:[#allocation17 + $0x8] sm:$0xf]  ;;  %v5894_v54 = vld [vmem:[#allocation17 + $0x14] sm:$0xf0] }
 0x631   : > { %v5909_v57 = vld [vmem:[#allocation17 + $0x8c] sm:$0xf0] }
 0x632   : > { %v1999_v59 = vadd.f32 %v1995_v52, %v1970_v56  ;;  %v5202_v52 = vor.u32 %v5914_v51, %v5201_v50  ;;  %v5177_v56 = vld [vmem:[#allocation17 + $0x80] sm:$0xf]  ;;  %2373 = vmatpush.bf16.msrb.mxu0 %v5206_v55  ;;  %v5115_v50 = vld [vmem:[#allocation17 + $0x10] sm:$0xf0]  ;;  %v5122_v55 = vor.u32 %v5894_v54, %v5121_v53  ;;  %v5940_v53 = vld [vmem:[#allocation19 + $0x88] sm:$0xff] }
 0x634   : > { %v2070_v60 = vadd.f32 %v6279_v58, %v1999_v59  ;;  %2359 = vmatpush.bf16.msrb.mxu3 %v5202_v52  ;;  %v5178_v59 = vor.u32 %v5909_v57, %v5177_v56  ;;  %v5118_v52 = vor.u32 %v5891_v49, %v5115_v50  ;;  %v5123_v56 = vld [vmem:[#allocation17 + $0x18] sm:$0xf0]  ;;  %v5923_v49 = vld [vmem:[#allocation19] sm:$0xff] }
 0x635   : > { %v5947_v50 = vld [vmem:[#allocation19 + $0xc0] sm:$0xff] }
 0x636   : > { %v2072_v61 = vadd.f32 %v2070_v60, %v7288_v20  ;;  %v5179_v60 = vld [vmem:[#allocation17 + $0x90] sm:$0xf0] }
 0x637   : > { %v1968_v62 = vpop.f32.mrf.mxu3 }
 0x638   : > { %2076 = vadd.xlane.f32.xlu1 %v2072_v61  ;;  %v5910_v62 = vld [vmem:[#allocation17 + $0x94] sm:$0xf0] }
 0x63f   : > { %v2044_v63 = vpop.f32.mrf.mxu3 }
 0x647   : > { %v2012_v0 = vpop.f32.mrf.mxu1  ;;  %v2046_v1 = vpop.f32.mrf.mxu3 }
 0x648   : > { %v2029_v32 = vadd.f32 %v2028_v48, %v2012_v0  ;;  %v5194_v48 = vor.u32 %v5913_v44, %v5193_v42  ;;  %v5139_v42 = vld [vmem:[#allocation17 + $0x38] sm:$0xf0]  ;;  %v5113_v44 = vld [vmem:[#allocation17] sm:$0xf] }
 0x649   : > { %v5142_v47 = vor.u32 %v5896_v40, %v5139_v42  ;;  %v7433_v40 = vld [vmem:[%s7742_s16] sm:$0xf] }
 0x64a   : > { %v2048_v3 = vadd.f32 %v2044_v63, %v2029_v32  ;;  %v5187_v32 = vld [vmem:[#allocation17 + $0x98] sm:$0xf0]  ;;  %v5924_v42 = vld [vmem:[#allocation19 + $0x8] sm:$0xff] }
 0x64f   : > { %v2014_v2 = vpop.f32.mrf.mxu1 }
 0x650   : > { %v5908_v2 = vld [vmem:[#allocation17 + $0x8c] sm:$0xf] }
 0x671   : > { %v2061_v4 = vpop.f32.mrf.mxu0 }
 0x672   : > { %v2065_v5 = vadd.f32 %v2061_v4, %v2048_v3  ;;  %v5190_v3 = vor.u32 %v5908_v2, %v5187_v32  ;;  %v5161_v4 = vld [vmem:[#allocation17 + $0x60] sm:$0xf] }
 0x674   : > { %v2071_v6 = vadd.f32 %v6279_v58, %v2065_v5  ;;  %v5907_v58 = vld [vmem:[#allocation17 + $0x84] sm:$0xf]  ;;  %v5905_v5 = vld [vmem:[#allocation17 + $0x6c] sm:$0xf0]  ;;  %2374 = vmatpush.bf16.msrb.mxu0 %v5190_v3 }
 0x675   : > { %v5182_v0 = vor.u32 %v5907_v58, %v5179_v60 }
 0x676   : > { %v2073_v7 = vadd.f32 %v2071_v6, %v7290_v21  ;;  %v5225_v21 = vld [vmem:[#allocation17 + $0xe0] sm:$0xf]  ;;  %v5903_v6 = vld [vmem:[#allocation17 + $0x64] sm:$0xf] }
 0x677   : > { %v5226_v18 = vor.u32 %v5921_v16, %v5225_v21  ;;  %2346 = vmatpush.bf16.msrb.mxu2 %v5182_v0  ;;  %v5171_v21 = vld [vmem:[#allocation17 + $0x78] sm:$0xf0] }
 0x678   : > { %2078 = vadd.xlane.f32.xlu1 %v2073_v7 }
 0x679   : > { %v2063_v8 = vpop.f32.mrf.mxu0  ;;  %2329 = vmatpush.bf16.msra.mxu1 %v5226_v18  ;;  %v5901_v18 = vld [vmem:[#allocation17 + $0x4c] sm:$0xf0] }
 0x67a   : > { %v5163_v8 = vld [vmem:[#allocation17 + $0x70] sm:$0xf0]  ;;  %v5146_v22 = vor.u32 %v5901_v18, %v5145_v17  ;;  %v5930_v17 = vld [vmem:[#allocation19 + $0x38] sm:$0xff] }
 0x67b   : > { %v5954_v18 = vld [vmem:[#allocation19 + $0xf8] sm:$0xff] }
 0x67d   : > { %2330 = vmatpush.bf16.msra.mxu1 %v5210_v30  ;;  %v5897_v30 = vld [vmem:[#allocation17 + $0x2c] sm:$0xf0] }
 0x67e   : > { %v5130_v33 = vor.u32 %v5897_v30, %v5129_v29  ;;  %v5944_v29 = vld [vmem:[#allocation19 + $0xa8] sm:$0xff]  ;;  %v5926_v30 = vld [vmem:[#allocation19 + $0x18] sm:$0xff] }
 0x681   : > { %2331 = vmatpush.bf16.msra.mxu1 %v5194_v48  ;;  %v5893_v48 = vld [vmem:[#allocation17 + $0xc] sm:$0xf0] }
 0x682   : > { %v5114_v46 = vor.u32 %v5893_v48, %v5113_v44  ;;  %v5948_v44 = vld [vmem:[#allocation19 + $0xc8] sm:$0xff]  ;;  %v5941_v48 = vld [vmem:[#allocation19 + $0x90] sm:$0xff] }
 0x685   : > { %2332 = vmatpush.bf16.msra.mxu1 %v5178_v59 }
 0x6ab   : > { %v2077_v9 = vpop.xlane.xlu1 %2076 }
 0x6ac   : > { %v2080_v10 = vmul.f32 %v2077_v9, %v7272_v38  ;;  %v5169_v9 = vld [vmem:[#allocation17 + $0x68] sm:$0xf] }
 0x6ae   : > { %v7403_v11 = vsub.f32 %v2072_v61, %v2080_v10  ;;  %v5185_v61 = vld [vmem:[#allocation17 + $0x88] sm:$0xf]  ;;  %v5906_v10 = vld [vmem:[#allocation17 + $0x74] sm:$0xf0] }
 0x6af   : > { %v5186_v1 = vor.u32 %v5910_v62, %v5185_v61 }
 0x6b0   : > { %v2084_v20 = vmul.f32 %v7403_v11, %v7403_v11 }
 0x6b1   : > { %2360 = vmatpush.bf16.msrb.mxu3 %v5186_v1 }
 0x6b2   : > { %2086 = vadd.xlane.f32.xlu1 %v2084_v20 }
 0x6eb   : > { %v2079_v12 = vpop.xlane.xlu1 %2078 }
 0x6ec   : > { %v2081_v13 = vmul.f32 %v2079_v12, %v7272_v38  ;;  %v5166_v12 = vor.u32 %v5903_v6, %v5163_v8  ;;  %v6280_v8 = vld [vmem:[%s7739_s13] ss:$0 sm:$0xff] }
 0x6ee   : > { %v7408_v14 = vsub.f32 %v2073_v7, %v2081_v13  ;;  %v5162_v7 = vor.u32 %v5905_v5, %v5161_v4  ;;  %v5170_v13 = vor.u32 %v5906_v10, %v5169_v9  ;;  %2347 = vmatpush.bf16.msrb.mxu2 %v5166_v12 }
 0x6f0   : > { %v2085_v15 = vmul.f32 %v7408_v14, %v7408_v14  ;;  %2333 = vmatpush.bf16.msra.mxu1 %v5162_v7  ;;  %2361 = vmatpush.bf16.msrb.mxu3 %v5170_v13 }
 0x6f2   : > { %2088 = vadd.xlane.f32.xlu2 %v2085_v15  ;;  %v5904_v15 = vld [vmem:[#allocation17 + $0x6c] sm:$0xf]  ;;  %2348 = vmatpush.bf16.msrb.mxu2 %v5150_v25  ;;  %v5937_v25 = vld [vmem:[#allocation19 + $0x70] sm:$0xff] }
 0x6f3   : > { %v5174_v16 = vor.u32 %v5904_v15, %v5171_v21 }
 0x6f4   : > { %2334 = vmatpush.bf16.msra.mxu1 %v5146_v22  ;;  %2362 = vmatpush.bf16.msrb.mxu3 %v5154_v26  ;;  %v5938_v22 = vld [vmem:[#allocation19 + $0x78] sm:$0xff]  ;;  %v5945_v26 = vld [vmem:[#allocation19 + $0xb0] sm:$0xff] }
 0x6f5   : > { %2375 = vmatpush.bf16.msrb.mxu0 %v5174_v16 }
 0x6f6   : > { %2349 = vmatpush.bf16.msrb.mxu2 %v5134_v37  ;;  %v5934_v37 = vld [vmem:[#allocation19 + $0x58] sm:$0xff] }
 0x6f8   : > { %2335 = vmatpush.bf16.msra.mxu1 %v5130_v33  ;;  %2363 = vmatpush.bf16.msrb.mxu3 %v5138_v39  ;;  %v5935_v33 = vld [vmem:[#allocation19 + $0x60] sm:$0xff]  ;;  %v5942_v39 = vld [vmem:[#allocation19 + $0x98] sm:$0xff] }
 0x6f9   : > { %2376 = vmatpush.bf16.msrb.mxu0 %v5158_v28  ;;  %v5936_v28 = vld [vmem:[#allocation19 + $0x68] sm:$0xff] }
 0x6fa   : > { %2350 = vmatpush.bf16.msrb.mxu2 %v5118_v52  ;;  %v5932_v52 = vld [vmem:[#allocation19 + $0x48] sm:$0xff] }
 0x6fc   : > { %2336 = vmatpush.bf16.msra.mxu1 %v5114_v46  ;;  %2364 = vmatpush.bf16.msrb.mxu3 %v5122_v55  ;;  %v2164_v46 = vperm.slane %v7433_v40, 3 }
 0x6fd   : > { %2377 = vmatpush.bf16.msrb.mxu0 %v5142_v47  ;;  %v5933_v47 = vld [vmem:[#allocation19 + $0x50] sm:$0xff] }
 0x6fe   : > { %2735 = vmatpush.bf16.msra.mxu2 %v5938_v22 }
 0x700   : > { %2721 = vmatpush.bf16.msrb.mxu1 %v5930_v17  ;;  %2749 = vmatpush.bf16.msra.mxu3 %v5946_v41 }
 0x702   : > { %2736 = vmatpush.bf16.msra.mxu2 %v5937_v25 }
 0x704   : > { %2722 = vmatpush.bf16.msrb.mxu1 %v5929_v19  ;;  %2750 = vmatpush.bf16.msra.mxu3 %v5945_v26 }
 0x706   : > { %2737 = vmatpush.bf16.msra.mxu2 %v5936_v28 }
 0x708   : > { %2723 = vmatpush.bf16.msrb.mxu1 %v5928_v23  ;;  %2751 = vmatpush.bf16.msra.mxu3 %v5944_v29 }
 0x70a   : > { %2738 = vmatpush.bf16.msra.mxu2 %v5935_v33 }
 0x70c   : > { %2724 = vmatpush.bf16.msrb.mxu1 %v5927_v27  ;;  %2752 = vmatpush.bf16.msra.mxu3 %v5943_v34 }
 0x70e   : > { %2739 = vmatpush.bf16.msra.mxu2 %v5934_v37 }
 0x710   : > { %2725 = vmatpush.bf16.msrb.mxu1 %v5926_v30  ;;  %2753 = vmatpush.bf16.msra.mxu3 %v5942_v39 }
 0x712   : > { %2740 = vmatpush.bf16.msra.mxu2 %v5933_v47 }
 0x714   : > { %2726 = vmatpush.bf16.msrb.mxu1 %v5925_v35  ;;  %2754 = vmatpush.bf16.msra.mxu3 %v5941_v48 }
 0x716   : > { %2741 = vmatpush.bf16.msra.mxu2 %v5932_v52 }
 0x718   : > { %2727 = vmatpush.bf16.msrb.mxu1 %v5924_v42  ;;  %2755 = vmatpush.bf16.msra.mxu3 %v5940_v53 }
 0x71c   : > { %2728 = vmatpush.bf16.msrb.mxu1 %v5923_v49 }
 0x725   : > { %v2087_v43 = vpop.xlane.xlu1 %2086 }
 0x726   : > { %v2090_v63 = vmul.f32 %v2087_v43, %v7272_v38  ;;  %v5892_v43 = vld [vmem:[#allocation17 + $0xc] sm:$0xf] }
 0x727   : > { %v5126_v57 = vor.u32 %v5892_v43, %v5123_v56 }
 0x728   : > { %v7413_v20 = vadd.f32 1e-12, %v2090_v63 }
 0x729   : > { %2378 = vmatpush.bf16.msrb.mxu0 %v5126_v57 }
 0x72a   : > { %6335 = vrsqrt.f32 %v7413_v20  ;;  %vm2100_vm12 = vweird.f32 %v7413_v20 }
 0x72d   : > { %2763 = vmatpush.bf16.msra.mxu0 %v5954_v18 }
 0x730   : > { %v6336_v51 = vpop.eup %6335 }
 0x731   : > { %v2095_v58 = vmul.f32 %v6336_v51, %v7413_v20  ;;  %vm2101_vm11 = vweird.f32 %v6336_v51  ;;  %v6281_v20 = vld [vmem:[#allocation16] ss:$0 sm:$0xff] }
 0x732   : > { %vm2102_vm13 = vmor %vm2100_vm12, %vm2101_vm11 }
 0x733   : > { %v2096_v59 = vmul.f32 %v6336_v51, %v2095_v58  ;;  %v2162_v58 = vperm.slane %v7433_v40, 1 }
 0x735   : > { %v2097_v63 = vmul.f32 0.5, %v2096_v59  ;;  %v5931_v59 = vld [vmem:[#allocation19 + $0x40] sm:$0xff] }
 0x736   : > { %2742 = vmatpush.bf16.msra.mxu2 %v5931_v59 }
 0x737   : > { %v2098_v0 = vsub.f32 1.5, %v2097_v63 }
 0x739   : > { %v2099_v2 = vmul.f32 %v6336_v51, %v2098_v0 }
 0x73b   : > { %v2103_v4 = vsel %vm2102_vm13, %v6336_v51, %v2099_v2  ;;  %v2161_v51 = vperm.slane %v7433_v40, 0 }
 0x73c   : > { %v2114_v7 = vmul.f32 %v2103_v4, %v7403_v11 }
 0x73e   : > { %v2119_v13 = vmul.f32 %v6280_v8, %v2114_v7 }
 0x740   : > { %v7424_v21 = vadd.f32 %v6281_v20, %v2119_v13 }
 0x765   : > { %v2089_v60 = vpop.xlane.xlu2 %2088 }
 0x766   : > { %v2091_v61 = vmul.f32 %v2089_v60, %v7272_v38  ;;  %v5939_v60 = vld [vmem:[#allocation19 + $0x80] sm:$0xff] }
 0x767   : > { %2756 = vmatpush.bf16.msra.mxu3 %v5939_v60 }
 0x768   : > { %v2093_v62 = vadd.f32 1e-12, %v2091_v61 }
 0x76a   : > { %6337 = vrsqrt.f32 %v2093_v62  ;;  %vm2110_vm15 = vweird.f32 %v2093_v62 }
 0x770   : > { %v6338_v1 = vpop.eup %6337 }
 0x771   : > { %v2105_v32 = vmul.f32 %v6338_v1, %v2093_v62  ;;  %vm2111_vm14 = vweird.f32 %v6338_v1  ;;  %v2163_v62 = vperm.slane %v7433_v40, 2 }
 0x772   : > { %vm2112_vm0 = vmor %vm2110_vm15, %vm2111_vm14 }
 0x773   : > { %v2106_v3 = vmul.f32 %v6338_v1, %v2105_v32 }
 0x775   : > { %v2107_v5 = vmul.f32 0.5, %v2106_v3 }
 0x777   : > { %v2108_v6 = vsub.f32 1.5, %v2107_v5 }
 0x779   : > { %v2109_v9 = vmul.f32 %v6338_v1, %v2108_v6 }
 0x77b   : > { %v2113_v10 = vsel %vm2112_vm0, %v6338_v1, %v2109_v9 }
 0x77c   : > { %v2115_v12 = vmul.f32 %v2113_v10, %v7408_v14  ;;  %v5953_v14 = vld [vmem:[#allocation19 + $0xf0] sm:$0xff] }
 0x77d   : > { %2764 = vmatpush.bf16.msra.mxu0 %v5953_v14 }
 0x77e   : > { %v2120_v15 = vmul.f32 %v6280_v8, %v2115_v12 }
 0x780   : > { %v7426_v16 = vadd.f32 %v6281_v20, %v2120_v15 }
 0x781   : > { %2765 = vmatpush.bf16.msra.mxu0 %v5952_v24 }
 0x782   : > { %v2158_v11 = vpack.c.bf16 %v7426_v16, %v7424_v21 }
 0x784   : > { %2337 = vmatmul.bf16.vlgmr.msra.gmra.mxu1 %v2158_v11  ;;  %2351 = vmatmul.bf16.vlgmr.msrb.gmra.mxu2 %v2158_v11 }
 0x785   : > { %2365 = vmatmul.bf16.vlgmr.msrb.gmra.mxu3 %v2158_v11  ;;  %2379 = vmatmul.bf16.vlgmr.msrb.gmra.mxu0 %v2158_v11 }
 0x786   : > { %2766 = vmatpush.bf16.msra.mxu0 %v5951_v45 }
 0x78a   : > { %2767 = vmatpush.bf16.msra.mxu0 %v5950_v31 }
 0x78e   : > { %2768 = vmatpush.bf16.msra.mxu0 %v5949_v36 }
 0x792   : > { %2769 = vmatpush.bf16.msra.mxu0 %v5948_v44 }
 0x796   : > { %2770 = vmatpush.bf16.msra.mxu0 %v5947_v50 }
 0x801   : > { %v2338_v54 = vpop.f32.mrf.mxu1 }
 0x802   : > { %v7437_v43 = vadd.f32 %v2338_v54, %v2161_v51  ;;  %v2380_v55 = vpop.f32.mrf.mxu0 }
 0x803   : > { %v7439_v56 = vadd.f32 %v2380_v55, %v2164_v46 }
 0x804   : > { %v2393_v57 = vmul.f32 0.044715, %v7437_v43  ;;  %v2385_v60 = vmul.f32 0.5, %v7437_v43 }
 0x805   : > { %v2396_v61 = vmul.f32 0.044715, %v7439_v56 }
 0x806   : > { %v2401_v63 = vmul.f32 %v2393_v57, %v7437_v43 }
 0x807   : > { %v2404_v0 = vmul.f32 %v2396_v61, %v7439_v56  ;;  %v2352_v1 = vpop.f32.mrf.mxu2 }
 0x808   : > { %v2409_v2 = vmul.f32 %v2401_v63, %v7437_v43  ;;  %v7448_v32 = vadd.f32 %v2352_v1, %v2162_v58  ;;  %v2366_v3 = vpop.f32.mrf.mxu3 }
 0x809   : > { %v2412_v4 = vmul.f32 %v2404_v0, %v7439_v56  ;;  %v7451_v5 = vadd.f32 %v2366_v3, %v2163_v62  ;;  %v2340_v6 = vpop.f32.mrf.mxu1  ;;  %v2388_v0 = vmul.f32 0.5, %v7439_v56 }
 0x80a   : > { %v2417_v7 = vadd.f32 %v2409_v2, %v7437_v43  ;;  %v2394_v8 = vmul.f32 0.044715, %v7448_v32  ;;  %v2341_v9 = vadd.f32 %v2340_v6, %v2161_v51  ;;  %v2382_v10 = vpop.f32.mrf.mxu0  ;;  %v2386_v43 = vmul.f32 0.5, %v7448_v32 }
 0x80b   : > { %v2420_v12 = vadd.f32 %v2412_v4, %v7439_v56  ;;  %v2395_v13 = vmul.f32 0.044715, %v7451_v5  ;;  %v2383_v20 = vadd.f32 %v2382_v10, %v2164_v46  ;;  %v2387_v56 = vmul.f32 0.5, %v7451_v5 }
 0x80c   : > { %v2402_v15 = vmul.f32 %v2394_v8, %v7448_v32  ;;  %v2397_v11 = vmul.f32 0.044715, %v2341_v9  ;;  %v2425_v19 = vmul.f32 0.7978846, %v2417_v7  ;;  %v2389_v61 = vmul.f32 0.5, %v2341_v9 }
 0x80d   : > { %v2403_v17 = vmul.f32 %v2395_v13, %v7451_v5  ;;  %v2400_v18 = vmul.f32 0.044715, %v2383_v20  ;;  %v2428_v41 = vmul.f32 0.7978846, %v2420_v12  ;;  %v2392_v1 = vmul.f32 0.5, %v2383_v20 }
 0x80e   : > { %v2410_v14 = vmul.f32 %v2402_v15, %v7448_v32  ;;  %v2405_v22 = vmul.f32 %v2397_v11, %v2341_v9  ;;  %6339 = vtanh.f32 %v2425_v19 }
 0x80f   : > { %v2411_v23 = vmul.f32 %v2403_v17, %v7451_v5  ;;  %v2408_v24 = vmul.f32 %v2400_v18, %v2383_v20  ;;  %v2354_v25 = vpop.f32.mrf.mxu2  ;;  %6341 = vtanh.f32 %v2428_v41 }
 0x810   : > { %v2418_v26 = vadd.f32 %v2410_v14, %v7448_v32  ;;  %v2413_v27 = vmul.f32 %v2405_v22, %v2341_v9  ;;  %v2355_v45 = vadd.f32 %v2354_v25, %v2162_v58  ;;  %v2368_v28 = vpop.f32.mrf.mxu3  ;;  %v6282_v32 = vld [vmem:[%s7744_s18] ss:$0 sm:$0xff] }
 0x811   : > { %v2419_v29 = vadd.f32 %v2411_v23, %v7451_v5  ;;  %v2416_v30 = vmul.f32 %v2408_v24, %v2383_v20  ;;  %v2369_v31 = vadd.f32 %v2368_v28, %v2163_v62 }
 0x812   : > { %v2421_v33 = vadd.f32 %v2413_v27, %v2341_v9  ;;  %v2398_v34 = vmul.f32 0.044715, %v2355_v45  ;;  %v2426_v37 = vmul.f32 0.7978846, %v2418_v26  ;;  %v2390_v9 = vmul.f32 0.5, %v2355_v45 }
 0x813   : > { %v2424_v35 = vadd.f32 %v2416_v30, %v2383_v20  ;;  %v2399_v36 = vmul.f32 0.044715, %v2369_v31  ;;  %v2427_v42 = vmul.f32 0.7978846, %v2419_v29  ;;  %v2391_v20 = vmul.f32 0.5, %v2369_v31 }
 0x814   : > { %v2429_v39 = vmul.f32 0.7978846, %v2421_v33  ;;  %v2406_v40 = vmul.f32 %v2398_v34, %v2355_v45  ;;  %v6340_v50 = vpop.eup %6339 }
 0x815   : > { %v2432_v44 = vmul.f32 0.7978846, %v2424_v35  ;;  %v2407_v47 = vmul.f32 %v2399_v36, %v2369_v31  ;;  %v6342_v46 = vpop.eup %6341  ;;  %v2441_v55 = vadd.f32 1.0, %v6340_v50 }
 0x816   : > { %v2414_v48 = vmul.f32 %v2406_v40, %v2355_v45  ;;  %6343 = vtanh.f32 %v2429_v39  ;;  %v2444_v58 = vadd.f32 1.0, %v6342_v46 }
 0x817   : > { %v2415_v49 = vmul.f32 %v2407_v47, %v2369_v31  ;;  %6345 = vtanh.f32 %v2432_v44  ;;  %v2449_v4 = vmul.f32 %v2441_v55, %v2385_v60  ;;  %v5976_v55 = vld [vmem:[#allocation11 + $0x16c] sm:$0xf]  ;;  %v5978_v60 = vld [vmem:[#allocation11 + $0x178] sm:$0xf0] }
 0x818   : > { %v2422_v51 = vadd.f32 %v2414_v48, %v2355_v45  ;;  %6347 = vtanh.f32 %v2426_v37  ;;  %v2452_v7 = vmul.f32 %v2444_v58, %v2388_v0  ;;  %v5455_v58 = vld [vmem:[#allocation11 + $0x174] sm:$0xf0]  ;;  %v5974_v0 = vld [vmem:[#allocation11 + $0x158] sm:$0xf0] }
 0x819   : > { %v2423_v52 = vadd.f32 %v2415_v49, %v2369_v31  ;;  %6349 = vtanh.f32 %v2427_v42 }
 0x81a   : > { %v2430_v53 = vmul.f32 0.7978846, %v2422_v51 }
 0x81b   : > { %v2431_v54 = vmul.f32 0.7978846, %v2423_v52 }
 0x81c   : > { %v6344_v57 = vpop.eup %6343  ;;  %6351 = vtanh.f32 %v2430_v53 }
 0x81d   : > { %v6346_v59 = vpop.eup %6345  ;;  %v2445_v62 = vadd.f32 1.0, %v6344_v57  ;;  %6353 = vtanh.f32 %v2431_v54  ;;  %v5977_v54 = vld [vmem:[#allocation11 + $0x170] sm:$0xf0] }
 0x81e   : > { %v6348_v63 = vpop.eup %6347  ;;  %v2448_v2 = vadd.f32 1.0, %v6346_v59  ;;  %v5461_v59 = vld [vmem:[#allocation11 + $0x170] sm:$0xf] }
 0x81f   : > { %v6350_v3 = vpop.eup %6349  ;;  %v2453_v6 = vmul.f32 %v2445_v62, %v2389_v61  ;;  %v2442_v12 = vadd.f32 1.0, %v6348_v63  ;;  %v5458_v61 = vor.u32 %v5976_v55, %v5455_v58  ;;  %v5462_v62 = vor.u32 %v5978_v60, %v5461_v59  ;;  %v5441_v63 = vld [vmem:[#allocation11 + $0x150] sm:$0xf]  ;;  %v5956_v58 = vld [vmem:[#allocation11 + $0xc8] sm:$0xf0] }
 0x820   : > { %v2456_v8 = vmul.f32 %v2448_v2, %v2392_v1  ;;  %v2443_v11 = vadd.f32 1.0, %v6350_v3  ;;  %v5973_v1 = vld [vmem:[#allocation11 + $0x154] sm:$0xf]  ;;  %v5442_v2 = vor.u32 %v5974_v0, %v5441_v63  ;;  %v5443_v3 = vld [vmem:[#allocation11 + $0x15c] sm:$0xf0] }
 0x821   : > { %v2521_v10 = vpack.c.bf16 %v2453_v6, %v2449_v4  ;;  %v2450_v14 = vmul.f32 %v2442_v12, %v2386_v43  ;;  %3016 = vmatpush.bf16.msrb.mxu2 %v5458_v61  ;;  %3030 = vmatpush.bf16.msrb.mxu3 %v5462_v62  ;;  %v5449_v4 = vld [vmem:[#allocation11 + $0x158] sm:$0xf]  ;;  %v5975_v6 = vld [vmem:[#allocation11 + $0x160] sm:$0xf0]  ;;  %v5972_v43 = vld [vmem:[#allocation11 + $0x148] sm:$0xf0] }
 0x822   : > { %v6352_v13 = vpop.eup %6351  ;;  %v2524_v15 = vpack.c.bf16 %v2456_v8, %v2452_v7  ;;  %v2451_v41 = vmul.f32 %v2443_v11, %v2387_v56  ;;  %v5446_v7 = vor.u32 %v5973_v1, %v5443_v3  ;;  %v5450_v8 = vor.u32 %v5975_v6, %v5449_v4  ;;  %v5971_v12 = vld [vmem:[#allocation11 + $0x140] sm:$0xf0]  ;;  %v5431_v11 = vld [vmem:[#allocation11 + $0x144] sm:$0xf0]  ;;  %v5417_v56 = vld [vmem:[#allocation11 + $0x120] sm:$0xf] }
 0x823   : > { %v6354_v17 = vpop.eup %6353  ;;  %2729 = vmatmul.bf16.vlgmr.msrb.gmra.mxu1 %v2521_v10  ;;  %v2446_v18 = vadd.f32 1.0, %v6352_v13  ;;  %v5429_v10 = vld [vmem:[#allocation11 + $0x138] sm:$0xf]  ;;  %v5970_v13 = vld [vmem:[#allocation11 + $0x13c] sm:$0xf] }
 0x824   : > { %2771 = vmatmul.bf16.vlgmr.msra.gmra.mxu0 %v2524_v15  ;;  %v2447_v19 = vadd.f32 1.0, %v6354_v17  ;;  %v5430_v15 = vor.u32 %v5971_v12, %v5429_v10  ;;  %v5437_v17 = vld [vmem:[#allocation11 + $0x140] sm:$0xf]  ;;  %v5955_v59 = vld [vmem:[#allocation11 + $0xc4] sm:$0xf] }
 0x825   : > { %v2454_v22 = vmul.f32 %v2446_v18, %v2390_v9  ;;  %3017 = vmatpush.bf16.msrb.mxu2 %v5446_v7  ;;  %3031 = vmatpush.bf16.msrb.mxu3 %v5450_v8  ;;  %v5434_v9 = vor.u32 %v5970_v13, %v5431_v11  ;;  %v5438_v18 = vor.u32 %v5972_v43, %v5437_v17  ;;  %v5371_v62 = vld [vmem:[#allocation11 + $0xcc] sm:$0xf0]  ;;  %v5377_v63 = vld [vmem:[#allocation11 + $0xc8] sm:$0xf]  ;;  %v5957_v0 = vld [vmem:[#allocation11 + $0xd0] sm:$0xf0] }
 0x826   : > { %v2455_v23 = vmul.f32 %v2447_v19, %v2391_v20  ;;  %v5968_v20 = vld [vmem:[#allocation11 + $0x128] sm:$0xf0]  ;;  %v5967_v19 = vld [vmem:[#allocation11 + $0x124] sm:$0xf]  ;;  %v5374_v1 = vor.u32 %v5955_v59, %v5371_v62 }
 0x827   : > { %v2522_v24 = vpack.c.bf16 %v2454_v22, %v2450_v14  ;;  %v5418_v14 = vor.u32 %v5968_v20, %v5417_v56  ;;  %v5419_v22 = vld [vmem:[#allocation11 + $0x12c] sm:$0xf0] }
 0x828   : > { %v2523_v25 = vpack.c.bf16 %v2455_v23, %v2451_v41  ;;  %v5425_v41 = vld [vmem:[#allocation11 + $0x128] sm:$0xf]  ;;  %v5969_v23 = vld [vmem:[#allocation11 + $0x130] sm:$0xf0] }
 0x829   : > { %2743 = vmatmul.bf16.vlgmr.msra.gmra.mxu2 %v2522_v24  ;;  %3032 = vmatpush.bf16.msrb.mxu3 %v5438_v18  ;;  %v5422_v24 = vor.u32 %v5967_v19, %v5419_v22 }
 0x82a   : > { %2757 = vmatmul.bf16.vlgmr.msra.gmra.mxu3 %v2523_v25  ;;  %3018 = vmatpush.bf16.msrb.mxu2 %v5434_v9  ;;  %v5426_v25 = vor.u32 %v5969_v23, %v5425_v41 }
 0x82d   : > { %3033 = vmatpush.bf16.msrb.mxu3 %v5426_v25  ;;  %v6284_v25 = vld [vmem:[%s7746_s20] ss:$0 sm:$0xff] }
 0x82e   : > { %3019 = vmatpush.bf16.msrb.mxu2 %v5422_v24 }
 0x8a0   : > { %v2730_v26 = vpop.f32.mrf.mxu1 }
 0x8a1   : > { %v2731_v27 = vadd.f32 %v6282_v32, %v2730_v26  ;;  %v2772_v5 = vpop.f32.mrf.mxu0  ;;  %v5405_v26 = vld [vmem:[#allocation11 + $0x108] sm:$0xf] }
 0x8a8   : > { %v2732_v31 = vpop.f32.mrf.mxu1 }
 0x8a9   : > { %v2733_v34 = vadd.f32 %v6282_v32, %v2732_v31  ;;  %v2774_v42 = vpop.f32.mrf.mxu0  ;;  %v5965_v32 = vld [vmem:[#allocation11 + $0x110] sm:$0xf0] }
 0x8ac   : > { %v2744_v45 = vpop.f32.mrf.mxu2 }
 0x8ad   : > { %v2745_v28 = vadd.f32 %v2744_v45, %v2731_v27  ;;  %v2758_v29 = vpop.f32.mrf.mxu3  ;;  %v5964_v27 = vld [vmem:[#allocation11 + $0x10c] sm:$0xf]  ;;  %v5406_v45 = vor.u32 %v5965_v32, %v5405_v26 }
 0x8af   : > { %v2759_v30 = vadd.f32 %v2758_v29, %v2745_v28  ;;  %v5407_v28 = vld [vmem:[#allocation11 + $0x114] sm:$0xf0]  ;;  %v5413_v29 = vld [vmem:[#allocation11 + $0x110] sm:$0xf] }
 0x8b1   : > { %v2773_v33 = vadd.f32 %v2772_v5, %v2759_v30  ;;  %v5966_v5 = vld [vmem:[#allocation11 + $0x118] sm:$0xf0]  ;;  %v5410_v30 = vor.u32 %v5964_v27, %v5407_v28 }
 0x8b2   : > { %v5414_v31 = vor.u32 %v5966_v5, %v5413_v29 }
 0x8b3   : > { %v2777_v35 = vadd.f32 %v2773_v33, %v7424_v21  ;;  %3020 = vmatpush.bf16.msrb.mxu2 %v5410_v30  ;;  %v5393_v33 = vld [vmem:[#allocation11 + $0xf0] sm:$0xf] }
 0x8b4   : > { %v2746_v36 = vpop.f32.mrf.mxu2  ;;  %3034 = vmatpush.bf16.msrb.mxu3 %v5414_v31 }
 0x8b5   : > { %v2747_v37 = vadd.f32 %v2746_v36, %v2733_v34  ;;  %2781 = vadd.xlane.f32.xlu0 %v2777_v35  ;;  %v2760_v39 = vpop.f32.mrf.mxu3  ;;  %v5962_v34 = vld [vmem:[#allocation11 + $0xf8] sm:$0xf0] }
 0x8b6   : > { %v5394_v36 = vor.u32 %v5962_v34, %v5393_v33 }
 0x8b7   : > { %v2761_v40 = vadd.f32 %v2760_v39, %v2747_v37  ;;  %v5395_v37 = vld [vmem:[#allocation11 + $0xfc] sm:$0xf0]  ;;  %v5401_v39 = vld [vmem:[#allocation11 + $0xf8] sm:$0xf] }
 0x8b9   : > { %v2775_v44 = vadd.f32 %v2774_v42, %v2761_v40  ;;  %v5963_v40 = vld [vmem:[#allocation11 + $0x100] sm:$0xf0] }
 0x8bb   : > { %v2778_v47 = vadd.f32 %v2775_v44, %v7426_v16  ;;  %v5453_v16 = vld [vmem:[#allocation11 + $0x168] sm:$0xf]  ;;  %v5402_v44 = vor.u32 %v5963_v40, %v5401_v39 }
 0x8bc   : > { %v5454_v57 = vor.u32 %v5977_v54, %v5453_v16 }
 0x8bd   : > { %2783 = vadd.xlane.f32.xlu1 %v2778_v47  ;;  %3035 = vmatpush.bf16.msrb.mxu3 %v5402_v44 }
 0x8be   : > { %3002 = vmatpush.bf16.msra.mxu1 %v5454_v57  ;;  %v5369_v57 = vld [vmem:[#allocation11 + $0xc0] sm:$0xf] }
 0x8bf   : > { %v5370_v61 = vor.u32 %v5956_v58, %v5369_v57 }
 0x8c2   : > { %3003 = vmatpush.bf16.msra.mxu1 %v5442_v2  ;;  %v5378_v2 = vor.u32 %v5957_v0, %v5377_v63 }
 0x8c6   : > { %3004 = vmatpush.bf16.msra.mxu1 %v5430_v15 }
 0x8ca   : > { %3005 = vmatpush.bf16.msra.mxu1 %v5418_v14  ;;  %v6283_v14 = vld [vmem:[%s7745_s19] ss:$0 sm:$0xff] }
 0x8ce   : > { %3006 = vmatpush.bf16.msra.mxu1 %v5406_v45  ;;  %v2866_v45 = vld [vmem:[#allocation13 + $0x3] sm:$0x7] }
 0x8cf   : > { %v2868_v28 = vperm.slane %v2866_v45, 0  ;;  %v2869_v5 = vperm.slane %v2866_v45, 1  ;;  %v2870_v34 = vperm.slane %v2866_v45, 2 }
 0x8d2   : > { %3007 = vmatpush.bf16.msra.mxu1 %v5394_v36 }
 0x928   : > { %v2782_v48 = vpop.xlane.xlu0 %2781 }
 0x929   : > { %v2785_v49 = vmul.f32 %v2782_v48, %v7272_v38  ;;  %v5959_v48 = vld [vmem:[#allocation11 + $0xe0] sm:$0xf0] }
 0x92b   : > { %v7473_v50 = vsub.f32 %v2777_v35, %v2785_v49  ;;  %v5961_v35 = vld [vmem:[#allocation11 + $0xf4] sm:$0xf]  ;;  %v5958_v49 = vld [vmem:[#allocation11 + $0xdc] sm:$0xf] }
 0x92c   : > { %v5398_v42 = vor.u32 %v5961_v35, %v5395_v37 }
 0x92d   : > { %v2789_v51 = vmul.f32 %v7473_v50, %v7473_v50 }
 0x92e   : > { %3021 = vmatpush.bf16.msrb.mxu2 %v5398_v42 }
 0x92f   : > { %2791 = vadd.xlane.f32.xlu0 %v2789_v51 }
 0x930   : > { %v2784_v21 = vpop.xlane.xlu1 %2783 }
 0x931   : > { %v2786_v46 = vmul.f32 %v2784_v21, %v7272_v38  ;;  %v5383_v21 = vld [vmem:[#allocation11 + $0xe4] sm:$0xf0] }
 0x932   : > { %v5386_v54 = vor.u32 %v5958_v49, %v5383_v21 }
 0x933   : > { %v7478_v52 = vsub.f32 %v2778_v47, %v2786_v46  ;;  %v5381_v47 = vld [vmem:[#allocation11 + $0xd8] sm:$0xf]  ;;  %v5389_v46 = vld [vmem:[#allocation11 + $0xe0] sm:$0xf] }
 0x934   : > { %v5382_v51 = vor.u32 %v5959_v48, %v5381_v47  ;;  %3022 = vmatpush.bf16.msrb.mxu2 %v5386_v54 }
 0x935   : > { %v2790_v53 = vmul.f32 %v7478_v52, %v7478_v52 }
 0x936   : > { %3008 = vmatpush.bf16.msra.mxu1 %v5382_v51 }
 0x937   : > { %2793 = vadd.xlane.f32.xlu1 %v2790_v53  ;;  %v5960_v53 = vld [vmem:[#allocation11 + $0xe8] sm:$0xf0] }
 0x938   : > { %v5390_v55 = vor.u32 %v5960_v53, %v5389_v46  ;;  %3023 = vmatpush.bf16.msrb.mxu2 %v5374_v1 }
 0x93a   : > { %3036 = vmatpush.bf16.msrb.mxu3 %v5390_v55  ;;  %3009 = vmatpush.bf16.msra.mxu1 %v5370_v61 }
 0x93e   : > { %3037 = vmatpush.bf16.msrb.mxu3 %v5378_v2 }
 0x9a2   : > { %v2792_v16 = vpop.xlane.xlu0 %2791 }
 0x9a3   : > { %v2795_v60 = vmul.f32 %v2792_v16, %v7272_v38 }
 0x9a5   : > { %v2797_v3 = vadd.f32 1e-12, %v2795_v60 }
 0x9a7   : > { %6355 = vrsqrt.f32 %v2797_v3  ;;  %vm2805_vm2 = vweird.f32 %v2797_v3 }
 0x9aa   : > { %v2794_v4 = vpop.xlane.xlu1 %2793 }
 0x9ab   : > { %v2796_v6 = vmul.f32 %v2794_v4, %v7272_v38 }
 0x9ad   : > { %v6356_v7 = vpop.eup %6355  ;;  %v2798_v8 = vadd.f32 1e-12, %v2796_v6 }
 0x9ae   : > { %v2800_v10 = vmul.f32 %v6356_v7, %v2797_v3  ;;  %vm2806_vm1 = vweird.f32 %v6356_v7 }
 0x9af   : > { %6357 = vrsqrt.f32 %v2798_v8  ;;  %vm2807_vm3 = vmor %vm2805_vm2, %vm2806_vm1  ;;  %vm2815_vm5 = vweird.f32 %v2798_v8 }
 0x9b0   : > { %v2801_v12 = vmul.f32 %v6356_v7, %v2800_v10 }
 0x9b2   : > { %v2802_v13 = vmul.f32 0.5, %v2801_v12 }
 0x9b4   : > { %v2803_v15 = vsub.f32 1.5, %v2802_v13 }
 0x9b5   : > { %v6358_v11 = vpop.eup %6357 }
 0x9b6   : > { %v2804_v17 = vmul.f32 %v6356_v7, %v2803_v15  ;;  %v2810_v43 = vmul.f32 %v6358_v11, %v2798_v8  ;;  %vm2816_vm4 = vweird.f32 %v6358_v11 }
 0x9b7   : > { %vm2817_vm6 = vmor %vm2815_vm5, %vm2816_vm4 }
 0x9b8   : > { %v2811_v9 = vmul.f32 %v6358_v11, %v2810_v43  ;;  %v2808_v18 = vsel %vm2807_vm3, %v6356_v7, %v2804_v17 }
 0x9b9   : > { %v2819_v19 = vmul.f32 %v2808_v18, %v7473_v50 }
 0x9ba   : > { %v2812_v56 = vmul.f32 0.5, %v2811_v9 }
 0x9bb   : > { %v2824_v24 = vmul.f32 %v6283_v14, %v2819_v19 }
 0x9bc   : > { %v2813_v20 = vsub.f32 1.5, %v2812_v56 }
 0x9bd   : > { %v7492_v32 = vadd.f32 %v6284_v25, %v2824_v24 }
 0x9be   : > { %v2814_v22 = vmul.f32 %v6358_v11, %v2813_v20 }
 0x9c0   : > { %v2818_v41 = vsel %vm2817_vm6, %v6358_v11, %v2814_v22 }
 0x9c1   : > { %v2820_v23 = vmul.f32 %v2818_v41, %v7478_v52 }
 0x9c3   : > { %v2825_v26 = vmul.f32 %v6283_v14, %v2820_v23 }
 0x9c5   : > { %v7494_v27 = vadd.f32 %v6284_v25, %v2825_v26 }
 0x9c7   : > { %v2864_v50 = vpack.c.bf16 %v7494_v27, %v7492_v32 }
 0x9c9   : > { %3010 = vmatmul.bf16.vlgmr.msra.gmra.mxu1 %v2864_v50  ;;  %3024 = vmatmul.bf16.vlgmr.msrb.gmra.mxu2 %v2864_v50 }
 0x9ca   : > { %3038 = vmatmul.bf16.vlgmr.msrb.gmra.mxu3 %v2864_v50 }
 0xa46   : > { %v3011_v29 = vpop.f32.mrf.mxu1 }
 0xa47   : > { %v3012_v52 = vadd.f32 %v3011_v29, %v2868_v28 }
 0xa49   : > { %3051 = vrot.lane.b32.xlu1 %v3012_v52, %s6926_s4  ;;  %v3064_v48 = vpack.c.bf16 %v3012_v52, %v3012_v52 }
 0xa4c   : > { %v3025_v30 = vpop.f32.mrf.mxu2 }
 0xa4d   : > { %v3026_v31 = vadd.f32 %v3025_v30, %v2869_v5  ;;  %v3039_v33 = vpop.f32.mrf.mxu3 }
 0xa4e   : > { %v7502_v39 = vadd.f32 %v3039_v33, %v2870_v34  ;;  %v3013_v51 = vpop.f32.mrf.mxu1 }
 0xa4f   : > { %3079 = vrot.lane.b32.xlu0 %v3026_v31, %s6926_s4  ;;  %v6263_v35 = vpack.i.bf16 %v3012_v52, %v3026_v31  ;;  %v3092_v36 = vpack.c.bf16 %v3026_v31, %v3026_v31  ;;  %v3014_v16 = vadd.f32 %v3013_v51, %v2868_v28 }
 0xa50   : > { %v3120_v47 = vpack.c.bf16 %v7502_v39, %v7502_v39 }
 0xa51   : > { %6264 = vrot.lane.b32.xlu2 %v6263_v35, %s6924_s30  ;;  %v3132_v37 = vsel %vm1459_vm8, %v3092_v36, 0  ;;  %v3068_v55 = vpack.c.bf16 %v3014_v16, %v3014_v16 }
 0xa52   : > { %3141 = vmatpush.bf16.xpose.msrb.mxu0 %v3132_v37  ;;  %v3380_v53 = vsel %vm1712_vm9, %v3120_v47, 0 }
 0xa54   : > { %v3027_v40 = vpop.f32.mrf.mxu2 }
 0xa55   : > { %v3028_v42 = vadd.f32 %v3027_v40, %v2869_v5  ;;  %v3041_v44 = vpop.f32.mrf.mxu3 }
 0xa56   : > { %v7508_v21 = vadd.f32 %v3041_v44, %v2870_v34 }
 0xa57   : > { %6259 = vrot.lane.b32.xlu0 %v6263_v35, %s6925_s11  ;;  %3089 = vrot.lane.b32.xlu1 %v3028_v42, %s6926_s4  ;;  %v3096_v49 = vpack.c.bf16 %v3028_v42, %v3028_v42 }
 0xa58   : > { %v3124_v54 = vpack.c.bf16 %v7508_v21, %v7508_v21 }
 0xa59   : > { %5463 = vmatmul.msk.bf16.vlgmr.msrb.gmra.mxu0 %vm1459_vm8, %v3064_v48  ;;  %v3208_v46 = vsel %vm1459_vm8, %v3096_v49, 0 }
 0xa5a   : > { %3217 = vmatpush.bf16.xpose.msra.mxu3 %v3208_v46  ;;  %v3456_v57 = vsel %vm1712_vm9, %v3124_v54, 0 }
 0xa5f   : > { %3061 = vrot.lane.b32.xlu0 %v3014_v16, %s6926_s4  ;;  %3083 = vrot.lane.b32.xlu1 %v3028_v42, %s6925_s11 }
 0xa61   : > { %5467 = vmatmul.msk.bf16.vlgmr.msra.gmra.mxu3 %vm1459_vm8, %v3068_v55 }
 0xa62   : > { %3389 = vmatpush.bf16.msrb.mxu3 %v3380_v53 }
 0xa66   : > { %3465 = vmatpush.bf16.msra.mxu3 %v3456_v57  ;;  %v6268_v57 = vpack.i.bf16 %v7508_v21, %v7502_v39 }
 0xa67   : > { %3055 = vrot.lane.b32.xlu0 %v3014_v16, %s6925_s11  ;;  %3086 = vrot.lane.b32.xlu1 %v3028_v42, %s6924_s30 }
 0xa6f   : > { %3058 = vrot.lane.b32.xlu0 %v3014_v16, %s6924_s30 }
 0xaab   : > { %v6265_v58 = vpop.permute.xlu2 %6264 }
 0xaac   : > { %v6266_v59 = vunpack.i.l.bf16 %v6265_v58  ;;  %v6267_v62 = vunpack.i.h.bf16 %v6265_v58 }
 0xaae   : > { %v3094_v60 = vpack.c.bf16 %v6266_v59, %v6266_v59  ;;  %v3066_v63 = vpack.c.bf16 %v6267_v62, %v6267_v62 }
 0xab0   : > { %v3170_v61 = vsel %vm1459_vm8, %v3094_v60, 0 }
 0xab1   : > { %3179 = vmatpush.bf16.xpose.msrb.mxu1 %v3170_v61 }
 0xab8   : > { %5465 = vmatmul.msk.bf16.vlgmr.msrb.gmra.mxu1 %vm1459_vm8, %v3066_v63 }
 0xabb   : > { %v3052_v0 = vpop.permute.xlu1 %3051 }
 0xabc   : > { %v3067_v7 = vpack.c.bf16 %v3052_v0, %v3052_v0 }
 0xac1   : > { %v3080_v1 = vpop.permute.xlu0 %3079 }
 0xac2   : > { %v3095_v2 = vpack.c.bf16 %v3080_v1, %v3080_v1 }
 0xac4   : > { %v3189_v3 = vsel %vm1459_vm8, %v3095_v2, 0 }
 0xac5   : > { %3198 = vmatpush.bf16.xpose.msra.mxu2 %v3189_v3 }
 0xac9   : > { %v6260_v4 = vpop.permute.xlu0 %6259  ;;  %v3090_v6 = vpop.permute.xlu1 %3089 }
 0xaca   : > { %v6261_v8 = vunpack.i.l.bf16 %v6260_v4  ;;  %v3099_v10 = vpack.c.bf16 %v3090_v6, %v3090_v6  ;;  %v6262_v11 = vunpack.i.h.bf16 %v6260_v4 }
 0xacc   : > { %v3093_v12 = vpack.c.bf16 %v6261_v8, %v6261_v8  ;;  %v3265_v13 = vsel %vm1459_vm8, %v3099_v10, 0  ;;  %5466 = vmatmul.msk.bf16.vlgmr.msra.gmra.mxu2 %vm1459_vm8, %v3067_v7  ;;  %v3065_v18 = vpack.c.bf16 %v6262_v11, %v6262_v11 }
 0xacd   : > { %3274 = vmatpush.bf16.xpose.msrb.mxu2 %v3265_v13 }
 0xace   : > { %v3151_v15 = vsel %vm1459_vm8, %v3093_v12, 0 }
 0xacf   : > { %3160 = vmatpush.bf16.xpose.msra.mxu0 %v3151_v15 }
 0xad1   : > { %v3062_v17 = vpop.permute.xlu0 %3061  ;;  %v3084_v43 = vpop.permute.xlu1 %3083 }
 0xad2   : > { %v3097_v9 = vpack.c.bf16 %v3084_v43, %v3084_v43  ;;  %v3071_v41 = vpack.c.bf16 %v3062_v17, %v3062_v17 }
 0xad4   : > { %v3227_v56 = vsel %vm1459_vm8, %v3097_v9, 0 }
 0xad6   : > { %v3143_v20 = vpop.f32.mrf.mxu0  ;;  %5464 = vmatmul.msk.bf16.vlgmr.msra.gmra.mxu0 %vm1459_vm8, %v3065_v18 }
 0xad7   : > { %3236 = vmatpush.bf16.xpose.msrb.mxu0 %v3227_v56  ;;  %v3280_v19 = vsel %vm1612_vm10, %v3143_v20, -inf }
 0xad8   : > { %3281 = vmax.xlane.f32.xlu1 %v3280_v19 }
 0xad9   : > { %v3056_v14 = vpop.permute.xlu0 %3055  ;;  %v3087_v22 = vpop.permute.xlu1 %3086 }
 0xada   : > { %v3098_v23 = vpack.c.bf16 %v3087_v22, %v3087_v22  ;;  %v3069_v45 = vpack.c.bf16 %v3056_v14, %v3056_v14 }
 0xadc   : > { %v3246_v24 = vsel %vm1459_vm8, %v3098_v23, 0  ;;  %5470 = vmatmul.msk.bf16.vlgmr.msrb.gmra.mxu2 %vm1459_vm8, %v3071_v41 }
 0xadd   : > { %3255 = vmatpush.bf16.xpose.msra.mxu1 %v3246_v24 }
 0xade   : > { %v3145_v25 = vpop.f32.mrf.mxu0 }
 0xae1   : > { %v3059_v26 = vpop.permute.xlu0 %3058 }
 0xae2   : > { %v3070_v50 = vpack.c.bf16 %v3059_v26, %v3059_v26 }
 0xae4   : > { %v3219_v28 = vpop.f32.mrf.mxu3  ;;  %5469 = vmatmul.msk.bf16.vlgmr.msra.gmra.mxu1 %vm1459_vm8, %v3070_v50 }
 0xae5   : > { %v3292_v29 = vsel %vm1612_vm10, %v3219_v28, -inf }
 0xae6   : > { %3293 = vmax.xlane.f32.xlu0 %v3292_v29  ;;  %5468 = vmatmul.msk.bf16.vlgmr.msrb.gmra.mxu0 %vm1459_vm8, %v3069_v45 }
 0xaec   : > { %v3221_v52 = vpop.f32.mrf.mxu3 }
 0xb35   : > { %v3181_v5 = vpop.f32.mrf.mxu1 }
 0xb36   : > { %v3286_v30 = vsel %vm1612_vm10, %v3181_v5, -inf }
 0xb37   : > { %3287 = vmax.xlane.f32.xlu2 %v3286_v30 }
 0xb3d   : > { %v3183_v31 = vpop.f32.mrf.mxu1 }
 0xb4b   : > { %v3282_v33 = vpop.xlane.xlu1 %3281 }
 0xb4c   : > { %v3304_v34 = vsub.f32 %v3143_v20, %v3282_v33 }
 0xb4e   : > { %v3312_v35 = vmul.f32 1.442695, %v3304_v34 }
 0xb4f   : > { %v3200_v36 = vpop.f32.mrf.mxu2 }
 0xb50   : > { %6359 = vpow2.f32 %v3312_v35  ;;  %v3289_v37 = vsel %vm1612_vm10, %v3200_v36, -inf }
 0xb51   : > { %3290 = vmax.xlane.f32.xlu2 %v3289_v37 }
 0xb53   : > { %v3162_v40 = vpop.f32.mrf.mxu0 }
 0xb54   : > { %v3283_v42 = vsel %vm1612_vm10, %v3162_v40, -inf }
 0xb55   : > { %3284 = vmax.xlane.f32.xlu0 %v3283_v42 }
 0xb56   : > { %v6360_v44 = vpop.eup %6359 }
 0xb57   : > { %v3202_v47 = vpop.f32.mrf.mxu2  ;;  %v3328_v48 = vsel %vm1612_vm10, %v6360_v44, 0.0 }
 0xb59   : > { %3329 = vadd.xlane.f32.xlu2 %v3328_v48  ;;  %v3294_v61 = vpop.xlane.xlu0 %3293 }
 0xb5a   : > { %v3308_v62 = vsub.f32 %v3219_v28, %v3294_v61 }
 0xb5b   : > { %v3164_v49 = vpop.f32.mrf.mxu0 }
 0xb5c   : > { %v3320_v63 = vmul.f32 1.442695, %v3308_v62 }
 0xb5e   : > { %6361 = vpow2.f32 %v3320_v63 }
 0xb5f   : > { %v7540_v51 = vpop.f32.mrf.mxu2 }
 0xb60   : > { %v3301_v59 = vsel %vm1612_vm10, %v7540_v51, -inf }
 0xb61   : > { %v3257_v46 = vpop.f32.mrf.mxu1 }
 0xb62   : > { %v3298_v53 = vsel %vm1612_vm10, %v3257_v46, -inf }
 0xb63   : > { %3299 = vmax.xlane.f32.xlu1 %v3298_v53  ;;  %v3238_v16 = vpop.f32.mrf.mxu0 }
 0xb64   : > { %v3295_v54 = vsel %vm1612_vm10, %v3238_v16, -inf  ;;  %v7553_v0 = vpop.eup %6361 }
 0xb65   : > { %3296 = vmax.xlane.f32.xlu2 %v3295_v54  ;;  %v3340_v1 = vsel %vm1612_vm10, %v7553_v0, 0.0 }
 0xb67   : > { %v3278_v55 = vpop.f32.mrf.mxu2 }
 0xb69   : > { %v3259_v58 = vpop.f32.mrf.mxu1  ;;  %6269 = vrot.lane.b32.xlu0 %v6268_v57, %s6926_s4  ;;  %s965_s4 = scalar_lea.vmem [#allocation23], %s4916_s2  ;;  %s6829_s2 = scalar_lea.hbm %s7807_s9, 64 }
 0xb6a   : > { %s4690_s8 = sshll.u32 %s965_s4, 4  ;;  %s4691_s8 = int_to_ptr.vmem [resolvable:$true] %s4690_s8 }
 0xb6b   : > { %3302 = vmax.xlane.f32.xlu1 %v3301_v59  ;;  %v3240_v60 = vpop.f32.mrf.mxu0 }
 0xb7d   : > { %3101 = vrot.lane.b32.xlu2 %v7502_v39, %s6925_s11 }
 0xb84   : > { %3104 = vrot.lane.b32.xlu1 %v7502_v39, %s6924_s30 }
 0xba6   : > { %3341 = vadd.xlane.f32.xlu2 %v3340_v1 }
 0xbaa   : > { %v3288_v2 = vpop.xlane.xlu2 %3287 }
 0xbab   : > { %v3306_v10 = vsub.f32 %v3181_v5, %v3288_v2 }
 0xbad   : > { %v3316_v15 = vmul.f32 1.442695, %v3306_v10 }
 0xbc4   : > { %v3291_v3 = vpop.xlane.xlu2 %3290 }
 0xbc5   : > { %v3307_v4 = vsub.f32 %v3200_v36, %v3291_v3 }
 0xbc7   : > { %v3318_v6 = vmul.f32 1.442695, %v3307_v4 }
 0xbc8   : > { %v3285_v7 = vpop.xlane.xlu0 %3284 }
 0xbc9   : > { %6363 = vpow2.f32 %v3318_v6  ;;  %v3305_v8 = vsub.f32 %v3162_v40, %v3285_v7 }
 0xbcb   : > { %v3314_v12 = vmul.f32 1.442695, %v3305_v8 }
 0xbcc   : > { %v3330_v39 = vpop.xlane.xlu2 %3329 }
 0xbcd   : > { %6365 = vpow2.f32 %v3314_v12 }
 0xbce   : > { %6367 = vrcp.f32 %v3330_v39 }
 0xbcf   : > { %v7557_v13 = vpop.eup %6363  ;;  %6369 = vpow2.f32 %v3316_v15 }
 0xbd0   : > { %v3337_v11 = vsel %vm1612_vm10, %v7557_v13, 0.0 }
 0xbd1   : > { %3338 = vadd.xlane.f32.xlu0 %v3337_v11 }
 0xbd3   : > { %v7561_v17 = vpop.eup %6365 }
 0xbd4   : > { %v6368_v43 = vpop.eup %6367  ;;  %v3331_v9 = vsel %vm1612_vm10, %v7561_v17, 0.0 }
 0xbd5   : > { %v3360_v18 = vmul.f32 %v6368_v43, %v6360_v44  ;;  %3332 = vadd.xlane.f32.xlu1 %v3331_v9  ;;  %v7565_v22 = vpop.eup %6369 }
 0xbd6   : > { %v3300_v56 = vpop.xlane.xlu1 %3299  ;;  %v3334_v45 = vsel %vm1612_vm10, %v7565_v22, 0.0 }
 0xbd7   : > { %v3368_v20 = vpack.c.bf16 %v3360_v18, %v3360_v18  ;;  %v3310_v19 = vsub.f32 %v3257_v46, %v3300_v56 }
 0xbd8   : > { %v3297_v14 = vpop.xlane.xlu2 %3296 }
 0xbd9   : > { %v3324_v41 = vmul.f32 1.442695, %v3310_v19  ;;  %5471 = vmatmul.msk.bf16.vlgmr.msrb.gmra.mxu3 %vm1612_vm10, %v3368_v20  ;;  %v3309_v23 = vsub.f32 %v3238_v16, %v3297_v14 }
 0xbdb   : > { %6371 = vpow2.f32 %v3324_v41  ;;  %v3322_v24 = vmul.f32 1.442695, %v3309_v23  ;;  %v6270_v25 = vpop.permute.xlu0 %6269 }
 0xbdc   : > { %v6272_v26 = vunpack.i.h.bf16 %v6270_v25  ;;  %v6271_v50 = vunpack.i.l.bf16 %v6270_v25 }
 0xbdd   : > { %6373 = vpow2.f32 %v3322_v24  ;;  %3335 = vadd.xlane.f32.xlu1 %v3334_v45  ;;  %v5979_v24 = vld [vmem:[#allocation14 + $0x40] sm:$0xff] }
 0xbde   : > { %v3127_v28 = vpack.c.bf16 %v6272_v26, %v6272_v26  ;;  %v3123_v29 = vpack.c.bf16 %v6271_v50, %v6271_v50  ;;  %v3303_v52 = vpop.xlane.xlu1 %3302  ;;  %v5982_v26 = vld [vmem:[#allocation14 + $0x58] sm:$0xff] }
 0xbdf   : > { %v3311_v5 = vsub.f32 %v7540_v51, %v3303_v52  ;;  %v5986_v50 = vld [vmem:[#allocation14 + $0x78] sm:$0xff]  ;;  %3574 = vmatpush.bf16.msrb.mxu3 %v5982_v26  ;;  %v5981_v52 = vld [vmem:[#allocation14 + $0x50] sm:$0xff] }
 0xbe0   : > { %v3102_v30 = vpop.permute.xlu2 %3101  ;;  %v3437_v31 = vsel %vm1712_vm9, %v3123_v29, 0  ;;  %v3513_v33 = vsel %vm1712_vm9, %v3127_v28, 0 }
 0xbe1   : > { %v6372_v34 = vpop.eup %6371  ;;  %v3326_v35 = vmul.f32 1.442695, %v3311_v5  ;;  %v3121_v36 = vpack.c.bf16 %v3102_v30, %v3102_v30  ;;  %3446 = vmatpush.bf16.msra.mxu2 %v3437_v31  ;;  %v5985_v5 = vld [vmem:[#allocation14 + $0x70] sm:$0xff]  ;;  %v5984_v30 = vld [vmem:[#allocation14 + $0x68] sm:$0xff]  ;;  %v5983_v31 = vld [vmem:[#allocation14 + $0x60] sm:$0xff] }
 0xbe2   : > { %v3346_v37 = vsel %vm1612_vm10, %v6372_v34, 0.0 }
 0xbe3   : > { %v6374_v40 = vpop.eup %6373  ;;  %6375 = vpow2.f32 %v3326_v35  ;;  %v3399_v42 = vsel %vm1712_vm9, %v3121_v36, 0  ;;  %3347 = vadd.xlane.f32.xlu2 %v3346_v37  ;;  %3575 = vmatpush.bf16.msrb.mxu3 %v5981_v52 }
 0xbe4   : > { %3408 = vmatpush.bf16.msra.mxu0 %v3399_v42  ;;  %v3343_v44 = vsel %vm1612_vm10, %v6374_v40, 0.0 }
 0xbe5   : > { %3522 = vmatpush.bf16.msrb.mxu2 %v3513_v33  ;;  %3344 = vadd.xlane.f32.xlu1 %v3343_v44 }
 0xbe9   : > { %v6376_v47 = vpop.eup %6375 }
 0xbea   : > { %v3349_v48 = vsel %vm1612_vm10, %v6376_v47, 0.0 }
 0xbeb   : > { %3350 = vadd.xlane.f32.xlu0 %v3349_v48 }
 0xbf6   : > { %v3105_v49 = vpop.permute.xlu1 %3104 }
 0xbf7   : > { %v3122_v51 = vpack.c.bf16 %v3105_v49, %v3105_v49 }
 0xbf9   : > { %v3418_v46 = vsel %vm1712_vm9, %v3122_v51, 0 }
 0xbfa   : > { %3427 = vmatpush.bf16.msrb.mxu1 %v3418_v46 }
 0xbfb   : > { %3114 = vrot.lane.b32.xlu2 %v7508_v21, %s6924_s30  ;;  %s6067_s30 = sshll.u32 %s7080_s7, 4 }
 0xbfc   : > { %s4689_s3 = scalar_lea.hbm %s7807_s9, %s6067_s30 }
 0xbfd   : > { %s4692_s26 = sshll.u32 %s4689_s3, 4  ;;  %s4693_s26 = int_to_ptr.hbm [resolvable:$true] %s4692_s26 }
 0xbfe   : > { %s6823_s5 = sshra.s32 %s4693_s26, 4  ;;  %s6824_s5 = int_to_ptr.hbm [resolvable:$true] %s6823_s5 }
 0xbff   : > { %3111 = vrot.lane.b32.xlu0 %v7508_v21, %s6925_s11  ;;  %s6825_s1 = scalar_lea.hbm %s6824_s5, 16  ;;  %p6830_p3 = scmp.lt.s32.totalorder %s6824_s5, %s7807_s9 }
 0xc00   : > { %p6826_p0 = scmp.ne.s32.totalorder %s6824_s5, %s6825_s1  ;;  %p6831_p4 = scmp.lt.s32.totalorder %s6829_s2, %s6825_s1 }
 0xc02   : > { %p6827_p1 = pnand %p6826_p0, %p7097_p5  ;;  %p6832_p7 = por %p6831_p4, %p6830_p3 }
 0xc04   : > { %p6828_p2 = pneg %p6827_p1 }
 0xc06   : > { %p6833_p8 = pnand %p6832_p7, %p6828_p2 }
 0xc19   : > { %v3342_v53 = vpop.xlane.xlu2 %3341 }
 0xc1a   : > { %6377 = vrcp.f32 %v3342_v53 }
 0xc20   : > { %v6378_v16 = vpop.eup %6377 }
 0xc21   : > { %v3364_v54 = vmul.f32 %v6378_v16, %v7553_v0 }
 0xc23   : > { %v3372_v55 = vpack.c.bf16 %v3364_v54, %v3364_v54 }
 0xc25   : > { %5475 = vmatmul.msk.bf16.vlgmr.msra.gmra.mxu3 %vm1612_vm10, %v3372_v55 }
 0xc26   : > { %3676 = vmatpush.bf16.msra.mxu3 %v5982_v26  ;;  %v6017_v26 = vld [vmem:[#allocation17 + $0x1ec] sm:$0xf0] }
 0xc2a   : > { %3677 = vmatpush.bf16.msra.mxu3 %v5981_v52  ;;  %v6018_v52 = vld [vmem:[#allocation17 + $0x1f4] sm:$0xf0] }
 0xc44   : > { %v3339_v57 = vpop.xlane.xlu0 %3338 }
 0xc45   : > { %6379 = vrcp.f32 %v3339_v57 }
 0xc48   : > { %v3333_v58 = vpop.xlane.xlu1 %3332 }
 0xc49   : > { %6381 = vrcp.f32 %v3333_v58 }
 0xc4b   : > { %v6380_v59 = vpop.eup %6379 }
 0xc4c   : > { %v3363_v60 = vmul.f32 %v6380_v59, %v7557_v13 }
 0xc4e   : > { %v3371_v61 = vpack.c.bf16 %v3363_v60, %v3363_v60 }
 0xc4f   : > { %v6382_v62 = vpop.eup %6381 }
 0xc50   : > { %v3361_v63 = vmul.f32 %v6382_v62, %v7561_v17  ;;  %v3336_v21 = vpop.xlane.xlu1 %3335  ;;  %5474 = vmatmul.msk.bf16.vlgmr.msra.gmra.mxu2 %vm1612_vm10, %v3371_v61 }
 0xc51   : > { %6383 = vrcp.f32 %v3336_v21  ;;  %3659 = vmatpush.bf16.msra.mxu2 %v5986_v50 }
 0xc52   : > { %v3369_v1 = vpack.c.bf16 %v3361_v63, %v3361_v63 }
 0xc54   : > { %5472 = vmatmul.msk.bf16.vlgmr.msra.gmra.mxu0 %vm1612_vm10, %v3369_v1 }
 0xc55   : > { %3660 = vmatpush.bf16.msra.mxu2 %v5985_v5 }
 0xc56   : > { %v3348_v0 = vpop.xlane.xlu2 %3347 }
 0xc57   : > { %v6384_v2 = vpop.eup %6383  ;;  %6385 = vrcp.f32 %v3348_v0 }
 0xc58   : > { %v3362_v3 = vmul.f32 %v6384_v2, %v7565_v22  ;;  %v3345_v17 = vpop.xlane.xlu1 %3344  ;;  %v5980_v22 = vld [vmem:[#allocation14 + $0x48] sm:$0xff] }
 0xc59   : > { %v6285_v2 = vld [vmem:[%s7738_s12 + $0x1] ss:$0 sm:$0xff] }
 0xc5a   : > { %v3370_v4 = vpack.c.bf16 %v3362_v3, %v3362_v3 }
 0xc5c   : > { %v3391_v6 = vpop.f32.mrf.mxu3  ;;  %5473 = vmatmul.msk.bf16.vlgmr.msrb.gmra.mxu1 %vm1612_vm10, %v3370_v4 }
 0xc5d   : > { %v6386_v39 = vpop.eup %6385  ;;  %v3545_v25 = vpack.c.bf16 %v3391_v6, %v3391_v6 }
 0xc5e   : > { %v3351_v7 = vpop.xlane.xlu0 %3350  ;;  %v3115_v8 = vpop.permute.xlu2 %3114  ;;  %v3366_v11 = vmul.f32 %v6386_v39, %v6372_v34 }
 0xc5f   : > { %6387 = vrcp.f32 %v3351_v7  ;;  %v3126_v10 = vpack.c.bf16 %v3115_v8, %v3115_v8 }
 0xc60   : > { %6389 = vrcp.f32 %v3345_v17  ;;  %v3374_v18 = vpack.c.bf16 %v3366_v11, %v3366_v11 }
 0xc61   : > { %v3494_v12 = vsel %vm1712_vm9, %v3126_v10, 0 }
 0xc62   : > { %3503 = vmatpush.bf16.msra.mxu1 %v3494_v12 }
 0xc64   : > { %v3393_v13 = vpop.f32.mrf.mxu3 }
 0xc65   : > { %v6388_v15 = vpop.eup %6387 }
 0xc66   : > { %v3367_v43 = vmul.f32 %v6388_v15, %v6376_v47  ;;  %v6390_v56 = vpop.eup %6389  ;;  %3630 = vmatpush.bf16.msrb.mxu1 %v5984_v30 }
 0xc67   : > { %v3365_v19 = vmul.f32 %v6390_v56, %v6374_v40 }
 0xc68   : > { %v3375_v9 = vpack.c.bf16 %v3367_v43, %v3367_v43 }
 0xc69   : > { %v3373_v23 = vpack.c.bf16 %v3365_v19, %v3365_v19 }
 0xc6a   : > { %5478 = vmatmul.msk.bf16.vlgmr.msrb.gmra.mxu2 %vm1612_vm10, %v3375_v9  ;;  %3631 = vmatpush.bf16.msrb.mxu1 %v5983_v31 }
 0xc6b   : > { %3725 = vmatpush.bf16.msrb.mxu2 %v5986_v50  ;;  %v6015_v50 = vld [vmem:[#allocation17 + $0x1e4] sm:$0xf] }
 0xc6c   : > { %5477 = vmatmul.msk.bf16.vlgmr.msra.gmra.mxu1 %vm1612_vm10, %v3374_v18 }
 0xc6e   : > { %3708 = vmatpush.bf16.msra.mxu1 %v5984_v30 }
 0xc6f   : > { %3726 = vmatpush.bf16.msrb.mxu2 %v5985_v5 }
 0xc71   : > { %v3112_v20 = vpop.permute.xlu0 %3111 }
 0xc72   : > { %v3125_v14 = vpack.c.bf16 %v3112_v20, %v3112_v20  ;;  %3709 = vmatpush.bf16.msra.mxu1 %v5983_v31  ;;  %v6016_v31 = vld [vmem:[#allocation17 + $0x1ec] sm:$0xf] }
 0xc74   : > { %v3475_v41 = vsel %vm1712_vm9, %v3125_v14, 0 }
 0xc75   : > { %3484 = vmatpush.bf16.msrb.mxu0 %v3475_v41 }
 0xc78   : > { %5476 = vmatmul.msk.bf16.vlgmr.msrb.gmra.mxu0 %vm1612_vm10, %v3373_v23 }
 0xc79   : > { %3602 = vmatpush.bf16.msra.mxu0 %v5980_v22 }
 0xc7d   : > { %3603 = vmatpush.bf16.msra.mxu0 %v5979_v24 }
 0xc81   : > { %3692 = vmatpush.bf16.msrb.mxu0 %v5980_v22 }
 0xc85   : > { %3693 = vmatpush.bf16.msrb.mxu0 %v5979_v24 }
 0xc88   : > { %5496 = vmatmul.msk.bf16.vlgmr.msra.gmra.mxu0 %vm1459_vm8, %v3545_v25 }
 0xca8   : > { %v3467_v45 = vpop.f32.mrf.mxu3 }
 0xca9   : > { %v3549_v28 = vpack.c.bf16 %v3467_v45, %v3467_v45 }
 0xcab   : > { %5516 = vmatmul.msk.bf16.vlgmr.msrb.gmra.mxu0 %vm1459_vm8, %v3549_v28  ;;  %v5638_v28 = vld [vmem:[#allocation17 + $0x1f0] sm:$0xf0] }
 0xcac   : > { %v5641_v5 = vor.u32 %v6015_v50, %v5638_v28  ;;  %v5556_v50 = vld [vmem:[#allocation17 + $0x140] sm:$0xf]  ;;  %v5995_v28 = vld [vmem:[#allocation17 + $0x144] sm:$0xf] }
 0xcae   : > { %4015 = vmatpush.bf16.msra.mxu0 %v5641_v5  ;;  %v5564_v5 = vld [vmem:[#allocation17 + $0x148] sm:$0xf] }
 0xcb0   : > { %v3469_v29 = vpop.f32.mrf.mxu3 }
 0xcb1   : > { %v5644_v29 = vld [vmem:[#allocation17 + $0x1e8] sm:$0xf] }
 0xcb2   : > { %v5645_v30 = vor.u32 %v6018_v52, %v5644_v29  ;;  %v5558_v52 = vld [vmem:[#allocation17 + $0x150] sm:$0xf0] }
 0xcd1   : > { %v3410_v33 = vpop.f32.mrf.mxu0 }
 0xcd2   : > { %v3546_v34 = vpack.c.bf16 %v3410_v33, %v3410_v33  ;;  %v5646_v33 = vld [vmem:[#allocation17 + $0x1f8] sm:$0xf0] }
 0xcd3   : > { %v3448_v35 = vpop.f32.mrf.mxu2 }
 0xcd4   : > { %v3548_v36 = vpack.c.bf16 %v3448_v35, %v3448_v35  ;;  %5487 = vmatmul.msk.bf16.vlgmr.msrb.gmra.mxu3 %vm1459_vm8, %v3546_v34  ;;  %v5649_v34 = vor.u32 %v6016_v31, %v5646_v33  ;;  %v5620_v35 = vld [vmem:[#allocation17 + $0x1c0] sm:$0xf]  ;;  %v5561_v31 = vor.u32 %v5995_v28, %v5558_v52  ;;  %v6033_v28 = vld [vmem:[#allocation19 + $0x170] sm:$0xff]  ;;  %v6050_v52 = vld [vmem:[#allocation19 + $0x1f8] sm:$0xff] }
 0xcd6   : > { %5514 = vmatmul.msk.bf16.vlgmr.msra.gmra.mxu2 %vm1459_vm8, %v3548_v36  ;;  %v6013_v36 = vld [vmem:[#allocation17 + $0x1cc] sm:$0xf0] }
 0xcd7   : > { %4043 = vmatpush.bf16.msra.mxu2 %v5649_v34  ;;  %v5996_v34 = vld [vmem:[#allocation17 + $0x14c] sm:$0xf] }
 0xcd9   : > { %v3412_v37 = vpop.f32.mrf.mxu0  ;;  %v3429_v40 = vpop.f32.mrf.mxu1 }
 0xcda   : > { %v3547_v42 = vpack.c.bf16 %v3429_v40, %v3429_v40  ;;  %v6011_v37 = vld [vmem:[#allocation17 + $0x1c4] sm:$0xf]  ;;  %v5621_v40 = vor.u32 %v6013_v36, %v5620_v35  ;;  %v5566_v35 = vld [vmem:[#allocation17 + $0x158] sm:$0xf0] }
 0xcdb   : > { %v3450_v44 = vpop.f32.mrf.mxu2  ;;  %v5569_v36 = vor.u32 %v5996_v34, %v5566_v35  ;;  %v6031_v34 = vld [vmem:[#allocation19 + $0x160] sm:$0xff] }
 0xcdc   : > { %5505 = vmatmul.msk.bf16.vlgmr.msrb.gmra.mxu1 %vm1459_vm8, %v3547_v42  ;;  %v5622_v42 = vld [vmem:[#allocation17 + $0x1d0] sm:$0xf0]  ;;  %v5628_v44 = vld [vmem:[#allocation17 + $0x1c8] sm:$0xf]  ;;  %v6039_v35 = vld [vmem:[#allocation19 + $0x1a0] sm:$0xff] }
 0xcdd   : > { %4029 = vmatpush.bf16.msrb.mxu1 %v5645_v30  ;;  %v5998_v30 = vld [vmem:[#allocation17 + $0x154] sm:$0xf0] }
 0xcde   : > { %v5565_v33 = vor.u32 %v5998_v30, %v5564_v5  ;;  %v6032_v5 = vld [vmem:[#allocation19 + $0x168] sm:$0xff] }
 0xcdf   : > { %v6040_v30 = vld [vmem:[#allocation19 + $0x1a8] sm:$0xff] }
 0xce1   : > { %v3431_v47 = vpop.f32.mrf.mxu1 }
 0xce2   : > { %v6014_v47 = vld [vmem:[#allocation17 + $0x1d4] sm:$0xf0] }
 0xce9   : > { %v3505_v48 = vpop.f32.mrf.mxu1 }
 0xcea   : > { %v3551_v49 = vpack.c.bf16 %v3505_v48, %v3505_v48  ;;  %v5625_v48 = vor.u32 %v6011_v37, %v5622_v42  ;;  %v5540_v37 = vld [vmem:[#allocation17 + $0x120] sm:$0xf]  ;;  %v5991_v42 = vld [vmem:[#allocation17 + $0x124] sm:$0xf] }
 0xcec   : > { %5517 = vmatmul.msk.bf16.vlgmr.msra.gmra.mxu1 %vm1459_vm8, %v3551_v49  ;;  %v5629_v49 = vor.u32 %v6014_v47, %v5628_v44  ;;  %4016 = vmatpush.bf16.msra.mxu0 %v5625_v48  ;;  %v5542_v47 = vld [vmem:[#allocation17 + $0x130] sm:$0xf0]  ;;  %v5548_v48 = vld [vmem:[#allocation17 + $0x128] sm:$0xf] }
 0xced   : > { %v3524_v51 = vpop.f32.mrf.mxu2 }
 0xcee   : > { %v3552_v46 = vpack.c.bf16 %v3524_v51, %v3524_v51  ;;  %v6012_v51 = vld [vmem:[#allocation17 + $0x1cc] sm:$0xf]  ;;  %4030 = vmatpush.bf16.msrb.mxu1 %v5629_v49  ;;  %v5994_v49 = vld [vmem:[#allocation17 + $0x134] sm:$0xf0] }
 0xcf0   : > { %5518 = vmatmul.msk.bf16.vlgmr.msrb.gmra.mxu2 %vm1459_vm8, %v3552_v46  ;;  %v5630_v46 = vld [vmem:[#allocation17 + $0x1d8] sm:$0xf0] }
 0xcf1   : > { %v3507_v53 = vpop.f32.mrf.mxu1 }
 0xcf2   : > { %v5633_v53 = vor.u32 %v6012_v51, %v5630_v46  ;;  %v5545_v51 = vor.u32 %v5991_v42, %v5542_v47  ;;  %v5549_v46 = vor.u32 %v5994_v49, %v5548_v48  ;;  %v6038_v42 = vld [vmem:[#allocation19 + $0x198] sm:$0xff]  ;;  %v6047_v47 = vld [vmem:[#allocation19 + $0x1e0] sm:$0xff]  ;;  %v6029_v48 = vld [vmem:[#allocation19 + $0x150] sm:$0xff] }
 0xcf3   : > { %v6037_v49 = vld [vmem:[#allocation19 + $0x190] sm:$0xff] }
 0xcf4   : > { %4044 = vmatpush.bf16.msra.mxu2 %v5633_v53  ;;  %v5992_v53 = vld [vmem:[#allocation17 + $0x12c] sm:$0xf] }
 0xcf5   : > { %v3486_v16 = vpop.f32.mrf.mxu0  ;;  %v3526_v54 = vpop.f32.mrf.mxu2 }
 0xcf6   : > { %v3550_v55 = vpack.c.bf16 %v3486_v16, %v3486_v16  ;;  %v5604_v16 = vld [vmem:[#allocation17 + $0x1a0] sm:$0xf]  ;;  %v6009_v54 = vld [vmem:[#allocation17 + $0x1ac] sm:$0xf0] }
 0xcf8   : > { %5515 = vmatmul.msk.bf16.vlgmr.msra.gmra.mxu3 %vm1459_vm8, %v3550_v55  ;;  %v6007_v55 = vld [vmem:[#allocation17 + $0x1a4] sm:$0xf] }
 0xcfd   : > { %v3488_v57 = vpop.f32.mrf.mxu0 }
 0xd05   : > { %v3605_v58 = vpop.f32.mrf.mxu0 }
 0xd0d   : > { %v3607_v59 = vpop.f32.mrf.mxu0 }
 0xd0e   : > { %v5606_v59 = vld [vmem:[#allocation17 + $0x1b0] sm:$0xf0] }
 0xd28   : > { %v3695_v60 = vpop.f32.mrf.mxu0 }
 0xd30   : > { %v3697_v61 = vpop.f32.mrf.mxu0 }
 0xd31   : > { %v6010_v61 = vld [vmem:[#allocation17 + $0x1b4] sm:$0xf0] }
 0xd57   : > { %v3577_v62 = vpop.f32.mrf.mxu3 }
 0xd58   : > { %v3606_v63 = vadd.f32 %v3605_v58, %v3577_v62  ;;  %v5605_v58 = vor.u32 %v6009_v54, %v5604_v16  ;;  %v5609_v62 = vor.u32 %v6007_v55, %v5606_v59  ;;  %v5550_v16 = vld [vmem:[#allocation17 + $0x138] sm:$0xf0]  ;;  %v5987_v59 = vld [vmem:[#allocation17 + $0x104] sm:$0xf] }
 0xd59   : > { %v3633_v21 = vpop.f32.mrf.mxu1  ;;  %v3662_v1 = vpop.f32.mrf.mxu2  ;;  %v5553_v55 = vor.u32 %v5992_v53, %v5550_v16  ;;  %v7639_v53 = vld [vmem:[%s7742_s16 + $0x4] sm:$0xf] }
 0xd5a   : > { %v3637_v0 = vadd.f32 %v3633_v21, %v3606_v63  ;;  %v6008_v21 = vld [vmem:[#allocation17 + $0x1ac] sm:$0xf]  ;;  %4017 = vmatpush.bf16.msra.mxu0 %v5609_v62  ;;  %v5532_v62 = vld [vmem:[#allocation17 + $0x108] sm:$0xf] }
 0xd5b   : > { %v6028_v16 = vld [vmem:[#allocation19 + $0x148] sm:$0xff] }
 0xd5c   : > { %v3666_v3 = vadd.f32 %v3662_v1, %v3637_v0  ;;  %v5614_v1 = vld [vmem:[#allocation17 + $0x1b8] sm:$0xf0] }
 0xd5d   : > { %v5617_v0 = vor.u32 %v6008_v21, %v5614_v1 }
 0xd5e   : > { %v3738_v4 = vadd.f32 %v6285_v2, %v3666_v3  ;;  %v5588_v3 = vld [vmem:[#allocation17 + $0x180] sm:$0xf] }
 0xd5f   : > { %v3579_v6 = vpop.f32.mrf.mxu3  ;;  %4045 = vmatpush.bf16.msra.mxu2 %v5617_v0 }
 0xd60   : > { %v3740_v7 = vadd.f32 %v3738_v4, %v7492_v32  ;;  %v6005_v4 = vld [vmem:[#allocation17 + $0x18c] sm:$0xf0]  ;;  %v6003_v6 = vld [vmem:[#allocation17 + $0x184] sm:$0xf] }
 0xd61   : > { %v3635_v8 = vpop.f32.mrf.mxu1  ;;  %v3664_v10 = vpop.f32.mrf.mxu2 }
 0xd62   : > { %3746 = vadd.xlane.f32.xlu0 %v3740_v7  ;;  %v5590_v8 = vld [vmem:[#allocation17 + $0x190] sm:$0xf0]  ;;  %v5596_v10 = vld [vmem:[#allocation17 + $0x188] sm:$0xf] }
 0xd69   : > { %v3711_v12 = vpop.f32.mrf.mxu1 }
 0xd71   : > { %v3713_v39 = vpop.f32.mrf.mxu1 }
 0xd72   : > { %v5593_v39 = vor.u32 %v6003_v6, %v5590_v8 }
 0xd73   : > { %v3728_v13 = vpop.f32.mrf.mxu2 }
 0xd74   : > { %4018 = vmatpush.bf16.msra.mxu0 %v5593_v39 }
 0xd7b   : > { %v3679_v15 = vpop.f32.mrf.mxu3  ;;  %v3730_v11 = vpop.f32.mrf.mxu2 }
 0xd7c   : > { %v3696_v17 = vadd.f32 %v3695_v60, %v3679_v15  ;;  %v5612_v60 = vld [vmem:[#allocation17 + $0x1a8] sm:$0xf]  ;;  %v6004_v15 = vld [vmem:[#allocation17 + $0x18c] sm:$0xf]  ;;  %v5598_v11 = vld [vmem:[#allocation17 + $0x198] sm:$0xf0] }
 0xd7d   : > { %v5613_v63 = vor.u32 %v6010_v61, %v5612_v60  ;;  %v5526_v61 = vld [vmem:[#allocation17 + $0x110] sm:$0xf0] }
 0xd7e   : > { %v3715_v43 = vadd.f32 %v3711_v12, %v3696_v17  ;;  %v6006_v12 = vld [vmem:[#allocation17 + $0x194] sm:$0xf0]  ;;  %v5601_v17 = vor.u32 %v6004_v15, %v5598_v11  ;;  %v5529_v1 = vor.u32 %v5987_v59, %v5526_v61  ;;  %v3835_v59 = vperm.slane %v7639_v53, 2  ;;  %v6035_v61 = vld [vmem:[#allocation19 + $0x180] sm:$0xff] }
 0xd7f   : > { %4031 = vmatpush.bf16.msrb.mxu1 %v5613_v63  ;;  %v5990_v63 = vld [vmem:[#allocation17 + $0x114] sm:$0xf0] }
 0xd80   : > { %v3732_v9 = vadd.f32 %v3728_v13, %v3715_v43  ;;  %v5597_v13 = vor.u32 %v6006_v12, %v5596_v10  ;;  %4046 = vmatpush.bf16.msra.mxu2 %v5601_v17  ;;  %v5533_v0 = vor.u32 %v5990_v63, %v5532_v62  ;;  %v6020_v63 = vld [vmem:[#allocation19 + $0x108] sm:$0xff] }
 0xd82   : > { %v3739_v18 = vadd.f32 %v6285_v2, %v3732_v9  ;;  %v5572_v9 = vld [vmem:[#allocation17 + $0x160] sm:$0xf] }
 0xd83   : > { %v3681_v56 = vpop.f32.mrf.mxu3  ;;  %4032 = vmatpush.bf16.msrb.mxu1 %v5597_v13 }
 0xd84   : > { %v3741_v20 = vadd.f32 %v3739_v18, %v7494_v27  ;;  %v5636_v27 = vld [vmem:[#allocation17 + $0x1e0] sm:$0xf]  ;;  %v6001_v18 = vld [vmem:[#allocation17 + $0x16c] sm:$0xf0] }
 0xd85   : > { %v5637_v45 = vor.u32 %v6017_v26, %v5636_v27  ;;  %v5573_v56 = vor.u32 %v6001_v18, %v5572_v9 }
 0xd86   : > { %3748 = vadd.xlane.f32.xlu1 %v3741_v20 }
 0xd87   : > { %4001 = vmatpush.bf16.msrb.mxu3 %v5637_v45  ;;  %v5997_v45 = vld [vmem:[#allocation17 + $0x14c] sm:$0xf0] }
 0xd88   : > { %v5557_v29 = vor.u32 %v5997_v45, %v5556_v50  ;;  %v6042_v45 = vld [vmem:[#allocation19 + $0x1b8] sm:$0xff] }
 0xd8b   : > { %4002 = vmatpush.bf16.msrb.mxu3 %v5621_v40  ;;  %v5993_v40 = vld [vmem:[#allocation17 + $0x12c] sm:$0xf0] }
 0xd8c   : > { %v5541_v44 = vor.u32 %v5993_v40, %v5540_v37  ;;  %v6048_v37 = vld [vmem:[#allocation19 + $0x1e8] sm:$0xff]  ;;  %v6030_v40 = vld [vmem:[#allocation19 + $0x158] sm:$0xff] }
 0xd8f   : > { %4003 = vmatpush.bf16.msrb.mxu3 %v5605_v58  ;;  %v5989_v58 = vld [vmem:[#allocation17 + $0x10c] sm:$0xf0] }
 0xdd5   : > { %v3747_v19 = vpop.xlane.xlu0 %3746 }
 0xdd6   : > { %v3750_v14 = vmul.f32 %v3747_v19, %v7272_v38  ;;  %v5574_v19 = vld [vmem:[#allocation17 + $0x170] sm:$0xf0] }
 0xdd8   : > { %v7609_v32 = vsub.f32 %v3740_v7, %v3750_v14  ;;  %v5589_v7 = vor.u32 %v6005_v4, %v5588_v3  ;;  %v5580_v14 = vld [vmem:[#allocation17 + $0x168] sm:$0xf]  ;;  %v5534_v3 = vld [vmem:[#allocation17 + $0x118] sm:$0xf0] }
 0xdda   : > { %v3754_v22 = vmul.f32 %v7609_v32, %v7609_v32  ;;  %4004 = vmatpush.bf16.msrb.mxu3 %v5589_v7 }
 0xddc   : > { %3756 = vadd.xlane.f32.xlu1 %v3754_v22 }
 0xdde   : > { %4005 = vmatpush.bf16.msrb.mxu3 %v5573_v56 }
 0xde2   : > { %4006 = vmatpush.bf16.msrb.mxu3 %v5557_v29  ;;  %v6041_v29 = vld [vmem:[#allocation19 + $0x1b0] sm:$0xff] }
 0xde6   : > { %4007 = vmatpush.bf16.msrb.mxu3 %v5541_v44  ;;  %v6023_v44 = vld [vmem:[#allocation19 + $0x120] sm:$0xff] }
 0xdf9   : > { %v3749_v41 = vpop.xlane.xlu1 %3748 }
 0xdfa   : > { %v3751_v23 = vmul.f32 %v3749_v41, %v7272_v38  ;;  %v6002_v41 = vld [vmem:[#allocation17 + $0x174] sm:$0xf0] }
 0xdfb   : > { %v5581_v27 = vor.u32 %v6002_v41, %v5580_v14  ;;  %v6287_v41 = vld [vmem:[#allocation16 + $0x1] ss:$0 sm:$0xff] }
 0xdfc   : > { %v7614_v24 = vsub.f32 %v3741_v20, %v3751_v23  ;;  %v5999_v20 = vld [vmem:[#allocation17 + $0x164] sm:$0xf]  ;;  %v6000_v23 = vld [vmem:[#allocation17 + $0x16c] sm:$0xf] }
 0xdfd   : > { %v5577_v22 = vor.u32 %v5999_v20, %v5574_v19  ;;  %4033 = vmatpush.bf16.msrb.mxu1 %v5581_v27  ;;  %v6286_v20 = vld [vmem:[%s7739_s13 + $0x1] ss:$0 sm:$0xff] }
 0xdfe   : > { %v3755_v25 = vmul.f32 %v7614_v24, %v7614_v24 }
 0xdff   : > { %4019 = vmatpush.bf16.msra.mxu0 %v5577_v22 }
 0xe00   : > { %3758 = vadd.xlane.f32.xlu1 %v3755_v25  ;;  %v5582_v25 = vld [vmem:[#allocation17 + $0x178] sm:$0xf0] }
 0xe01   : > { %v5585_v26 = vor.u32 %v6000_v23, %v5582_v25  ;;  %4034 = vmatpush.bf16.msrb.mxu1 %v5565_v33  ;;  %v6049_v33 = vld [vmem:[#allocation19 + $0x1f0] sm:$0xff] }
 0xe03   : > { %4047 = vmatpush.bf16.msra.mxu2 %v5585_v26  ;;  %4020 = vmatpush.bf16.msra.mxu0 %v5561_v31  ;;  %v6025_v31 = vld [vmem:[#allocation19 + $0x130] sm:$0xff] }
 0xe05   : > { %4035 = vmatpush.bf16.msrb.mxu1 %v5549_v46  ;;  %v6046_v46 = vld [vmem:[#allocation19 + $0x1d8] sm:$0xff] }
 0xe07   : > { %4048 = vmatpush.bf16.msra.mxu2 %v5569_v36  ;;  %4021 = vmatpush.bf16.msra.mxu0 %v5545_v51  ;;  %v6024_v36 = vld [vmem:[#allocation19 + $0x128] sm:$0xff]  ;;  %v6022_v51 = vld [vmem:[#allocation19 + $0x118] sm:$0xff] }
 0xe09   : > { %4036 = vmatpush.bf16.msrb.mxu1 %v5533_v0 }
 0xe0b   : > { %4049 = vmatpush.bf16.msra.mxu2 %v5553_v55  ;;  %4022 = vmatpush.bf16.msra.mxu0 %v5529_v1  ;;  %v6021_v55 = vld [vmem:[#allocation19 + $0x110] sm:$0xff] }
 0xe0d   : > { %4423 = vmatpush.bf16.msra.mxu1 %v6042_v45 }
 0xe11   : > { %4424 = vmatpush.bf16.msra.mxu1 %v6041_v29 }
 0xe15   : > { %4425 = vmatpush.bf16.msra.mxu1 %v6040_v30 }
 0xe19   : > { %4426 = vmatpush.bf16.msra.mxu1 %v6039_v35 }
 0xe1d   : > { %4427 = vmatpush.bf16.msra.mxu1 %v6038_v42 }
 0xe21   : > { %4428 = vmatpush.bf16.msra.mxu1 %v6037_v49 }
 0xe4f   : > { %v3757_v57 = vpop.xlane.xlu1 %3756 }
 0xe50   : > { %v3760_v2 = vmul.f32 %v3757_v57, %v7272_v38  ;;  %v5524_v57 = vld [vmem:[#allocation17 + $0x100] sm:$0xf] }
 0xe51   : > { %v5525_v60 = vor.u32 %v5989_v58, %v5524_v57  ;;  %v6045_v57 = vld [vmem:[#allocation19 + $0x1d0] sm:$0xff]  ;;  %v3834_v58 = vperm.slane %v7639_v53, 1 }
 0xe52   : > { %v7619_v43 = vadd.f32 1e-12, %v3760_v2  ;;  %v5988_v2 = vld [vmem:[#allocation17 + $0x10c] sm:$0xf] }
 0xe53   : > { %4008 = vmatpush.bf16.msrb.mxu3 %v5525_v60  ;;  %v5537_v4 = vor.u32 %v5988_v2, %v5534_v3  ;;  %v6027_v60 = vld [vmem:[#allocation19 + $0x140] sm:$0xff] }
 0xe54   : > { %6391 = vrsqrt.f32 %v7619_v43  ;;  %vm3770_vm8 = vweird.f32 %v7619_v43 }
 0xe55   : > { %4050 = vmatpush.bf16.msra.mxu2 %v5537_v4  ;;  %v3833_v4 = vperm.slane %v7639_v53, 0 }
 0xe59   : > { %4437 = vmatpush.bf16.msrb.mxu2 %v6050_v52 }
 0xe5a   : > { %v6392_v54 = vpop.eup %6391 }
 0xe5b   : > { %v3765_v21 = vmul.f32 %v6392_v54, %v7619_v43  ;;  %vm3771_vm7 = vweird.f32 %v6392_v54 }
 0xe5c   : > { %vm3772_vm9 = vmor %vm3770_vm8, %vm3771_vm7 }
 0xe5d   : > { %v3766_v6 = vmul.f32 %v6392_v54, %v3765_v21  ;;  %4438 = vmatpush.bf16.msrb.mxu2 %v6049_v33  ;;  %v6044_v21 = vld [vmem:[#allocation19 + $0x1c8] sm:$0xff] }
 0xe5f   : > { %v3767_v12 = vmul.f32 0.5, %v3766_v6  ;;  %v6019_v6 = vld [vmem:[#allocation19 + $0x100] sm:$0xff] }
 0xe61   : > { %v3768_v39 = vsub.f32 1.5, %v3767_v12  ;;  %4439 = vmatpush.bf16.msrb.mxu2 %v6048_v37 }
 0xe63   : > { %v3769_v15 = vmul.f32 %v6392_v54, %v3768_v39 }
 0xe65   : > { %v3773_v9 = vsel %vm3772_vm9, %v6392_v54, %v3769_v15  ;;  %4440 = vmatpush.bf16.msrb.mxu2 %v6047_v47  ;;  %v6036_v54 = vld [vmem:[#allocation19 + $0x188] sm:$0xff] }
 0xe66   : > { %v3784_v19 = vmul.f32 %v3773_v9, %v7609_v32  ;;  %v6034_v32 = vld [vmem:[#allocation19 + $0x178] sm:$0xff]  ;;  %4429 = vmatpush.bf16.msra.mxu1 %v6036_v54 }
 0xe67   : > { %4409 = vmatpush.bf16.msrb.mxu0 %v6034_v32 }
 0xe68   : > { %v3789_v23 = vmul.f32 %v6286_v20, %v3784_v19 }
 0xe69   : > { %4441 = vmatpush.bf16.msrb.mxu2 %v6046_v46 }
 0xe6a   : > { %v7630_v27 = vadd.f32 %v6287_v41, %v3789_v23  ;;  %4430 = vmatpush.bf16.msra.mxu1 %v6035_v61 }
 0xe6b   : > { %4410 = vmatpush.bf16.msrb.mxu0 %v6033_v28 }
 0xe6d   : > { %4442 = vmatpush.bf16.msrb.mxu2 %v6045_v57 }
 0xe6f   : > { %4411 = vmatpush.bf16.msrb.mxu0 %v6032_v5 }
 0xe71   : > { %4443 = vmatpush.bf16.msrb.mxu2 %v6044_v21 }
 0xe73   : > { %v3759_v7 = vpop.xlane.xlu1 %3758  ;;  %4412 = vmatpush.bf16.msrb.mxu0 %v6031_v34 }
 0xe74   : > { %v3761_v8 = vmul.f32 %v3759_v7, %v7272_v38  ;;  %v6043_v7 = vld [vmem:[#allocation19 + $0x1c0] sm:$0xff] }
 0xe75   : > { %4444 = vmatpush.bf16.msrb.mxu2 %v6043_v7 }
 0xe76   : > { %v3763_v10 = vadd.f32 1e-12, %v3761_v8 }
 0xe77   : > { %4413 = vmatpush.bf16.msrb.mxu0 %v6030_v40 }
 0xe78   : > { %6393 = vrsqrt.f32 %v3763_v10  ;;  %vm3780_vm11 = vweird.f32 %v3763_v10 }
 0xe7b   : > { %4414 = vmatpush.bf16.msrb.mxu0 %v6029_v48 }
 0xe7e   : > { %v6394_v13 = vpop.eup %6393 }
 0xe7f   : > { %v3775_v11 = vmul.f32 %v6394_v13, %v3763_v10  ;;  %vm3781_vm10 = vweird.f32 %v6394_v13  ;;  %4415 = vmatpush.bf16.msrb.mxu0 %v6028_v16  ;;  %v3836_v10 = vperm.slane %v7639_v53, 3 }
 0xe80   : > { %vm3782_vm12 = vmor %vm3780_vm11, %vm3781_vm10 }
 0xe81   : > { %v3776_v17 = vmul.f32 %v6394_v13, %v3775_v11 }
 0xe83   : > { %v3777_v18 = vmul.f32 0.5, %v3776_v17  ;;  %4416 = vmatpush.bf16.msrb.mxu0 %v6027_v60 }
 0xe85   : > { %v3778_v56 = vsub.f32 1.5, %v3777_v18 }
 0xe87   : > { %v3779_v14 = vmul.f32 %v6394_v13, %v3778_v56 }
 0xe89   : > { %v3783_v22 = vsel %vm3782_vm12, %v6394_v13, %v3779_v14 }
 0xe8a   : > { %v3785_v43 = vmul.f32 %v3783_v22, %v7614_v24  ;;  %v6026_v24 = vld [vmem:[#allocation19 + $0x138] sm:$0xff] }
 0xe8b   : > { %4395 = vmatpush.bf16.msra.mxu3 %v6026_v24 }
 0xe8c   : > { %v3790_v25 = vmul.f32 %v6286_v20, %v3785_v43 }
 0xe8e   : > { %v7632_v26 = vadd.f32 %v6287_v41, %v3790_v25 }
 0xe8f   : > { %4396 = vmatpush.bf16.msra.mxu3 %v6025_v31 }
 0xe90   : > { %v3829_v50 = vpack.c.bf16 %v7632_v26, %v7630_v27 }
 0xe92   : > { %4009 = vmatmul.bf16.vlgmr.msrb.gmra.mxu3 %v3829_v50  ;;  %4023 = vmatmul.bf16.vlgmr.msra.gmra.mxu0 %v3829_v50 }
 0xe93   : > { %4037 = vmatmul.bf16.vlgmr.msrb.gmra.mxu1 %v3829_v50  ;;  %4051 = vmatmul.bf16.vlgmr.msra.gmra.mxu2 %v3829_v50 }
 0xe94   : > { %4397 = vmatpush.bf16.msra.mxu3 %v6024_v36 }
 0xe98   : > { %4398 = vmatpush.bf16.msra.mxu3 %v6023_v44 }
 0xe9c   : > { %4399 = vmatpush.bf16.msra.mxu3 %v6022_v51 }
 0xea0   : > { %4400 = vmatpush.bf16.msra.mxu3 %v6021_v55 }
 0xea4   : > { %4401 = vmatpush.bf16.msra.mxu3 %v6020_v63 }
 0xea8   : > { %4402 = vmatpush.bf16.msra.mxu3 %v6019_v6 }
 0xf0f   : > { %v4024_v62 = vpop.f32.mrf.mxu0 }
 0xf10   : > { %v7643_v1 = vadd.f32 %v4024_v62, %v3834_v58  ;;  %v4038_v0 = vpop.f32.mrf.mxu1 }
 0xf11   : > { %v7645_v2 = vadd.f32 %v4038_v0, %v3835_v59 }
 0xf12   : > { %v4066_v3 = vmul.f32 0.044715, %v7643_v1  ;;  %v4058_v7 = vmul.f32 0.5, %v7643_v1 }
 0xf13   : > { %v4067_v8 = vmul.f32 0.044715, %v7645_v2 }
 0xf14   : > { %v4074_v12 = vmul.f32 %v4066_v3, %v7643_v1 }
 0xf15   : > { %v4075_v39 = vmul.f32 %v4067_v8, %v7645_v2  ;;  %v4010_v13 = vpop.f32.mrf.mxu3 }
 0xf16   : > { %v4082_v15 = vmul.f32 %v4074_v12, %v7643_v1  ;;  %v7654_v11 = vadd.f32 %v4010_v13, %v3833_v4  ;;  %v4052_v17 = vpop.f32.mrf.mxu2 }
 0xf17   : > { %v4083_v9 = vmul.f32 %v4075_v39, %v7645_v2  ;;  %v7657_v18 = vadd.f32 %v4052_v17, %v3836_v10  ;;  %v4026_v56 = vpop.f32.mrf.mxu0  ;;  %v4059_v39 = vmul.f32 0.5, %v7645_v2 }
 0xf18   : > { %v4090_v20 = vadd.f32 %v4082_v15, %v7643_v1  ;;  %v4065_v19 = vmul.f32 0.044715, %v7654_v11  ;;  %v4027_v14 = vadd.f32 %v4026_v56, %v3834_v58  ;;  %v4040_v22 = vpop.f32.mrf.mxu1  ;;  %v4057_v1 = vmul.f32 0.5, %v7654_v11 }
 0xf19   : > { %v4091_v41 = vadd.f32 %v4083_v9, %v7645_v2  ;;  %v4068_v23 = vmul.f32 0.044715, %v7657_v18  ;;  %v4041_v43 = vadd.f32 %v4040_v22, %v3835_v59  ;;  %v4060_v2 = vmul.f32 0.5, %v7657_v18 }
 0xf1a   : > { %v4073_v25 = vmul.f32 %v4065_v19, %v7654_v11  ;;  %v4070_v50 = vmul.f32 0.044715, %v4027_v14  ;;  %v4098_v28 = vmul.f32 0.7978846, %v4090_v20  ;;  %v4062_v8 = vmul.f32 0.5, %v4027_v14 }
 0xf1b   : > { %v4076_v32 = vmul.f32 %v4068_v23, %v7657_v18  ;;  %v4071_v45 = vmul.f32 0.044715, %v4041_v43  ;;  %v4099_v52 = vmul.f32 0.7978846, %v4091_v41  ;;  %v4063_v13 = vmul.f32 0.5, %v4041_v43 }
 0xf1c   : > { %v4081_v29 = vmul.f32 %v4073_v25, %v7654_v11  ;;  %v4078_v24 = vmul.f32 %v4070_v50, %v4027_v14  ;;  %6395 = vtanh.f32 %v4098_v28 }
 0xf1d   : > { %v4084_v5 = vmul.f32 %v4076_v32, %v7657_v18  ;;  %v4079_v30 = vmul.f32 %v4071_v45, %v4041_v43  ;;  %v4012_v31 = vpop.f32.mrf.mxu3  ;;  %6397 = vtanh.f32 %v4099_v52 }
 0xf1e   : > { %v4089_v33 = vadd.f32 %v4081_v29, %v7654_v11  ;;  %v4086_v34 = vmul.f32 %v4078_v24, %v4027_v14  ;;  %v4013_v35 = vadd.f32 %v4012_v31, %v3833_v4  ;;  %v4054_v36 = vpop.f32.mrf.mxu2  ;;  %v6288_v11 = vld [vmem:[%s7744_s18 + $0x1] ss:$0 sm:$0xff] }
 0xf1f   : > { %v4092_v37 = vadd.f32 %v4084_v5, %v7657_v18  ;;  %v4087_v40 = vmul.f32 %v4079_v30, %v4041_v43  ;;  %v4055_v42 = vadd.f32 %v4054_v36, %v3836_v10 }
 0xf20   : > { %v4094_v44 = vadd.f32 %v4086_v34, %v4027_v14  ;;  %v4069_v47 = vmul.f32 0.044715, %v4013_v35  ;;  %v4097_v51 = vmul.f32 0.7978846, %v4089_v33  ;;  %v4061_v14 = vmul.f32 0.5, %v4013_v35 }
 0xf21   : > { %v4095_v48 = vadd.f32 %v4087_v40, %v4041_v43  ;;  %v4072_v49 = vmul.f32 0.044715, %v4055_v42  ;;  %v4100_v16 = vmul.f32 0.7978846, %v4092_v37  ;;  %v4064_v43 = vmul.f32 0.5, %v4055_v42 }
 0xf22   : > { %v4102_v46 = vmul.f32 0.7978846, %v4094_v44  ;;  %v4077_v53 = vmul.f32 %v4069_v47, %v4013_v35  ;;  %v6396_v59 = vpop.eup %6395 }
 0xf23   : > { %v4103_v54 = vmul.f32 0.7978846, %v4095_v48  ;;  %v4080_v55 = vmul.f32 %v4072_v49, %v4055_v42  ;;  %v6398_v61 = vpop.eup %6397  ;;  %v4114_v21 = vadd.f32 1.0, %v6396_v59 }
 0xf24   : > { %6399 = vtanh.f32 %v4102_v46  ;;  %v4085_v57 = vmul.f32 %v4077_v53, %v4013_v35  ;;  %v4115_v4 = vadd.f32 1.0, %v6398_v61 }
 0xf25   : > { %6401 = vtanh.f32 %v4103_v54  ;;  %v4088_v58 = vmul.f32 %v4080_v55, %v4055_v42  ;;  %v4122_v9 = vmul.f32 %v4114_v21, %v4058_v7  ;;  %v6058_v21 = vld [vmem:[#allocation20 + $0x38] sm:$0xff]  ;;  %v6052_v7 = vld [vmem:[#allocation20 + $0x8] sm:$0xff] }
 0xf26   : > { %6403 = vtanh.f32 %v4097_v51  ;;  %v4093_v60 = vadd.f32 %v4085_v57, %v4013_v35  ;;  %v4123_v20 = vmul.f32 %v4115_v4, %v4059_v39  ;;  %4576 = vmatpush.bf16.msrb.mxu3 %v6058_v21  ;;  %v6054_v4 = vld [vmem:[#allocation20 + $0x18] sm:$0xff]  ;;  %v6051_v39 = vld [vmem:[#allocation20] sm:$0xff] }
 0xf27   : > { %6405 = vtanh.f32 %v4100_v16  ;;  %v4096_v62 = vadd.f32 %v4088_v58, %v4055_v42 }
 0xf28   : > { %v4101_v63 = vmul.f32 0.7978846, %v4093_v60 }
 0xf29   : > { %v4104_v0 = vmul.f32 0.7978846, %v4096_v62 }
 0xf2a   : > { %v6400_v3 = vpop.eup %6399  ;;  %6407 = vtanh.f32 %v4101_v63 }
 0xf2b   : > { %v6402_v6 = vpop.eup %6401  ;;  %v4118_v10 = vadd.f32 1.0, %v6400_v3  ;;  %6409 = vtanh.f32 %v4104_v0  ;;  %v6057_v0 = vld [vmem:[#allocation20 + $0x30] sm:$0xff]  ;;  %v6056_v3 = vld [vmem:[#allocation20 + $0x28] sm:$0xff] }
 0xf2c   : > { %v6404_v12 = vpop.eup %6403  ;;  %v4119_v15 = vadd.f32 1.0, %v6402_v6  ;;  %4577 = vmatpush.bf16.msrb.mxu3 %v6057_v0  ;;  %v6053_v6 = vld [vmem:[#allocation20 + $0x10] sm:$0xff] }
 0xf2d   : > { %v6406_v17 = vpop.eup %6405  ;;  %v4126_v56 = vmul.f32 %v4118_v10, %v4062_v8  ;;  %v4113_v22 = vadd.f32 1.0, %v6404_v12 }
 0xf2e   : > { %v4127_v19 = vmul.f32 %v4119_v15, %v4063_v13  ;;  %v4116_v25 = vadd.f32 1.0, %v6406_v17  ;;  %v6066_v13 = vld [vmem:[#allocation22 + $0x38] sm:$0xff] }
 0xf2f   : > { %v4195_v41 = vpack.c.bf16 %v4126_v56, %v4122_v9  ;;  %v4121_v29 = vmul.f32 %v4113_v22, %v4057_v1  ;;  %4661 = vmatpush.bf16.msra.mxu0 %v6066_v13  ;;  %v6065_v9 = vld [vmem:[#allocation22 + $0x30] sm:$0xff]  ;;  %v6064_v22 = vld [vmem:[#allocation22 + $0x28] sm:$0xff] }
 0xf30   : > { %v6408_v23 = vpop.eup %6407  ;;  %v4196_v50 = vpack.c.bf16 %v4127_v19, %v4123_v20  ;;  %v4124_v52 = vmul.f32 %v4116_v25, %v4060_v2  ;;  %4578 = vmatpush.bf16.msrb.mxu3 %v6056_v3 }
 0xf31   : > { %v6410_v32 = vpop.eup %6409  ;;  %v4117_v45 = vadd.f32 1.0, %v6408_v23  ;;  %4417 = vmatmul.bf16.vlgmr.msrb.gmra.mxu0 %v4195_v41 }
 0xf32   : > { %v4120_v28 = vadd.f32 1.0, %v6410_v32  ;;  %4431 = vmatmul.bf16.vlgmr.msra.gmra.mxu1 %v4196_v50 }
 0xf33   : > { %v4125_v24 = vmul.f32 %v4117_v45, %v4061_v14  ;;  %4662 = vmatpush.bf16.msra.mxu0 %v6065_v9 }
 0xf34   : > { %v4128_v5 = vmul.f32 %v4120_v28, %v4064_v43  ;;  %v6289_v43 = vld [vmem:[%s7745_s19 + $0x1] ss:$0 sm:$0xff] }
 0xf35   : > { %v4194_v30 = vpack.c.bf16 %v4125_v24, %v4121_v29 }
 0xf36   : > { %v4197_v31 = vpack.c.bf16 %v4128_v5, %v4124_v52  ;;  %v6290_v52 = vld [vmem:[%s7746_s20 + $0x1] ss:$0 sm:$0xff] }
 0xf37   : > { %4403 = vmatmul.bf16.vlgmr.msra.gmra.mxu3 %v4194_v30  ;;  %4663 = vmatpush.bf16.msra.mxu0 %v6064_v22 }
 0xf38   : > { %4445 = vmatmul.bf16.vlgmr.msrb.gmra.mxu2 %v4197_v31 }
 0xfae   : > { %v4418_v33 = vpop.f32.mrf.mxu0 }
 0xfaf   : > { %v4432_v36 = vpop.f32.mrf.mxu1 }
 0xfb6   : > { %v4420_v49 = vpop.f32.mrf.mxu0 }
 0xfb7   : > { %v4434_v46 = vpop.f32.mrf.mxu1 }
 0xfba   : > { %v4404_v34 = vpop.f32.mrf.mxu3 }
 0xfbb   : > { %v4405_v35 = vadd.f32 %v6288_v11, %v4404_v34  ;;  %v4446_v37 = vpop.f32.mrf.mxu2 }
 0xfbd   : > { %v4419_v18 = vadd.f32 %v4418_v33, %v4405_v35  ;;  %v6063_v35 = vld [vmem:[#allocation22 + $0x20] sm:$0xff] }
 0xfbe   : > { %4664 = vmatpush.bf16.msra.mxu0 %v6063_v35 }
 0xfbf   : > { %v4433_v40 = vadd.f32 %v4432_v36, %v4419_v18  ;;  %v6062_v36 = vld [vmem:[#allocation22 + $0x18] sm:$0xff]  ;;  %v6061_v18 = vld [vmem:[#allocation22 + $0x10] sm:$0xff] }
 0xfc1   : > { %v4447_v42 = vadd.f32 %v4446_v37, %v4433_v40  ;;  %v6060_v37 = vld [vmem:[#allocation22 + $0x8] sm:$0xff]  ;;  %v6059_v40 = vld [vmem:[#allocation22] sm:$0xff] }
 0xfc2   : > { %v4406_v44 = vpop.f32.mrf.mxu3  ;;  %4665 = vmatpush.bf16.msra.mxu0 %v6062_v36 }
 0xfc3   : > { %v4407_v47 = vadd.f32 %v6288_v11, %v4406_v44  ;;  %v4451_v48 = vadd.f32 %v4447_v42, %v7630_v27  ;;  %v4448_v16 = vpop.f32.mrf.mxu2  ;;  %v6291_v44 = vld [vmem:[%s7804_s22] ss:$0 sm:$0xff] }
 0xfc5   : > { %v4421_v51 = vadd.f32 %v4420_v49, %v4407_v47  ;;  %4457 = vadd.xlane.f32.xlu2 %v4451_v48 }
 0xfc6   : > { %4666 = vmatpush.bf16.msra.mxu0 %v6061_v18 }
 0xfc7   : > { %v4435_v53 = vadd.f32 %v4434_v46, %v4421_v51 }
 0xfc9   : > { %v4449_v54 = vadd.f32 %v4448_v16, %v4435_v53  ;;  %v6292_v16 = vld [vmem:[%s7805_s24] ss:$0 sm:$0xff] }
 0xfca   : > { %4667 = vmatpush.bf16.msra.mxu0 %v6060_v37 }
 0xfcb   : > { %v4452_v55 = vadd.f32 %v4449_v54, %v7632_v26  ;;  %v6055_v26 = vld [vmem:[#allocation20 + $0x20] sm:$0xff] }
 0xfcc   : > { %4579 = vmatpush.bf16.msrb.mxu3 %v6055_v26 }
 0xfcd   : > { %4459 = vadd.xlane.f32.xlu1 %v4452_v55 }
 0xfce   : > { %4668 = vmatpush.bf16.msra.mxu0 %v6059_v40 }
 0xfd0   : > { %4580 = vmatpush.bf16.msrb.mxu3 %v6054_v4 }
 0xfd4   : > { %4581 = vmatpush.bf16.msrb.mxu3 %v6053_v6 }
 0xfd8   : > { %4582 = vmatpush.bf16.msrb.mxu3 %v6052_v7 }
 0xfdc   : > { %4583 = vmatpush.bf16.msrb.mxu3 %v6051_v39 }
0x1038   : > { %v4458_v57 = vpop.xlane.xlu2 %4457 }
0x1039   : > { %v4461_v58 = vmul.f32 %v4458_v57, %v7272_v38 }
0x103b   : > { %v4463_v59 = vsub.f32 %v4451_v48, %v4461_v58 }
0x103d   : > { %v4465_v60 = vmul.f32 %v4463_v59, %v4463_v59 }
0x103f   : > { %4467 = vadd.xlane.f32.xlu1 %v4465_v60 }
0x1040   : > { %v4460_v61 = vpop.xlane.xlu1 %4459 }
0x1041   : > { %v4462_v62 = vmul.f32 %v4460_v61, %v7272_v38 }
0x1043   : > { %v4464_v27 = vsub.f32 %v4452_v55, %v4462_v62 }
0x1045   : > { %v4466_v63 = vmul.f32 %v4464_v27, %v4464_v27 }
0x1047   : > { %4469 = vadd.xlane.f32.xlu1 %v4466_v63 }
0x10b2   : > { %v4468_v8 = vpop.xlane.xlu1 %4467 }
0x10b3   : > { %v4471_v10 = vmul.f32 %v4468_v8, %v7272_v38 }
0x10b5   : > { %v4473_v12 = vadd.f32 1e-12, %v4471_v10 }
0x10b7   : > { %6411 = vrsqrt.f32 %v4473_v12  ;;  %vm4481_vm14 = vweird.f32 %v4473_v12 }
0x10ba   : > { %v4470_v15 = vpop.xlane.xlu1 %4469 }
0x10bb   : > { %v4472_v17 = vmul.f32 %v4470_v15, %v7272_v38 }
0x10bd   : > { %v6412_v56 = vpop.eup %6411  ;;  %v4474_v20 = vadd.f32 1e-12, %v4472_v17 }
0x10be   : > { %v4476_v19 = vmul.f32 %v6412_v56, %v4473_v12  ;;  %vm4482_vm13 = vweird.f32 %v6412_v56 }
0x10bf   : > { %6413 = vrsqrt.f32 %v4474_v20  ;;  %vm4483_vm15 = vmor %vm4481_vm14, %vm4482_vm13  ;;  %vm4491_vm1 = vweird.f32 %v4474_v20 }
0x10c0   : > { %v4477_v41 = vmul.f32 %v6412_v56, %v4476_v19 }
0x10c2   : > { %v4478_v23 = vmul.f32 0.5, %v4477_v41 }
0x10c4   : > { %v4479_v25 = vsub.f32 1.5, %v4478_v23 }
0x10c5   : > { %v6414_v50 = vpop.eup %6413 }
0x10c6   : > { %v4480_v32 = vmul.f32 %v6412_v56, %v4479_v25  ;;  %v4486_v1 = vmul.f32 %v6414_v50, %v4474_v20  ;;  %vm4492_vm0 = vweird.f32 %v6414_v50 }
0x10c7   : > { %vm4493_vm2 = vmor %vm4491_vm1, %vm4492_vm0 }
0x10c8   : > { %v4487_v14 = vmul.f32 %v6414_v50, %v4486_v1  ;;  %v4484_v38 = vsel %vm4483_vm15, %v6412_v56, %v4480_v32 }
0x10c9   : > { %v4495_v28 = vmul.f32 %v4484_v38, %v4463_v59 }
0x10ca   : > { %v4488_v45 = vmul.f32 0.5, %v4487_v14 }
0x10cb   : > { %v4500_v5 = vmul.f32 %v6289_v43, %v4495_v28 }
0x10cc   : > { %v4489_v2 = vsub.f32 1.5, %v4488_v45 }
0x10cd   : > { %v4505_v11 = vadd.f32 %v6290_v52, %v4500_v5 }
0x10ce   : > { %v4490_v29 = vmul.f32 %v6414_v50, %v4489_v2 }
0x10d0   : > { %v4494_v24 = vsel %vm4493_vm2, %v6414_v50, %v4490_v29 }
0x10d1   : > { %v4496_v30 = vmul.f32 %v4494_v24, %v4464_v27 }
0x10d3   : > { %v4501_v31 = vmul.f32 %v6289_v43, %v4496_v30 }
0x10d5   : > { %v4506_v33 = vadd.f32 %v6290_v52, %v4501_v31 }
0x10d7   : > { %v4523_v34 = vpack.c.bf16 %v4506_v33, %v4505_v11 }
0x10d9   : > { %4584 = vmatmul.bf16.vlgmr.msrb.gmra.mxu3 %v4523_v34 }
0x115c   : > { %v4585_v42 = vpop.f32.mrf.mxu3 }
0x115d   : > { %v4586_v47 = vadd.f32 %v6291_v44, %v4585_v42 }
0x115f   : > { %6415 = vtanh.f32 %v4586_v47 }
0x1164   : > { %v4587_v48 = vpop.f32.mrf.mxu3 }
0x1165   : > { %v4588_v49 = vadd.f32 %v6291_v44, %v4587_v48  ;;  %v6416_v51 = vpop.eup %6415 }
0x1167   : > { %6417 = vtanh.f32 %v4588_v49 }
0x116d   : > { %v6418_v46 = vpop.eup %6417 }
0x116e   : > { %v4608_v53 = vpack.c.bf16 %v6418_v46, %v6416_v51 }
0x1170   : > { %4669 = vmatmul.bf16.vlgmr.msra.gmra.mxu0 %v4608_v53 }
0x11ed   : > { %v4670_v54 = vpop.f32.mrf.mxu0 }
0x11ee   : > { %v4671_v55 = vadd.f32 %v6292_v16, %v4670_v54 }
0x11f0   : > { %4675 = vst [vmem:[%s965_s4] sm:$0xff] %v4671_v55 }
0x11f5   : > { %v4672_v57 = vpop.f32.mrf.mxu0 }
0x11f6   : > { %v4673_v58 = vadd.f32 %v6292_v16, %v4672_v57 }
0x11f8   : > { %4676 = vst [vmem:[%s965_s4 + $0x8] sm:$0xff] %v4673_v58 }
0x11f9   : > { %6836 = shalt.err (!%p6833_p8)
}
0x11fa   : > { %s6927_s6 = smov 128   ;;  %s6928_s24 = smov 8  }
0x11fb   : > { %6120 = dma.vmem_to_hbm [thread:$0]  (%p7097_p5), %s4691_s8, 256, %s4693_s26, %s4678_s0, %s6927_s6, %s6927_s6, %s6928_s24  }
0x11fc PF: > { %s7808_s30 = sld [smem:[#allocation35_spill]] }
0x11fd   : > { %s7809_s4 = sld [smem:[#allocation32_spill]] }
0x1202   : > { %p6192_p9 = scmp.ge.s32.totalorder %s7808_s30, 2 }
0x1203   : > { %s4707_s28 = sand.u32 1, %s7809_s4  }
0x1204   : > { %p6163_p10 = pnand %p6192_p9, %p7101_p6  ;;  %s4708_s3 = scalar_lea.sflag [#allocation4], %s4707_s28 }
0x1206   : > { %p6164_p11 = pneg %p6163_p10 }
0x1208   : > { %6882 = dma.done.wait (%p6164_p11), %s4708_s3, 256  }
0x1209   : > { %6884 = vsyncadd (%p6164_p11), %s4708_s3, 4294967040  ;;  %s7811_s30 = sld [smem:[#allocation36_spill]] }
0x120a   : > { %s7812_s29 = sld [smem:[#allocation33_spill]] }
0x120b   : > { %s7813_s2 = sld [smem:[#allocation34_spill]] }
0x120c   : > { %s7814_s6 = sld [smem:[#allocation37_spill]] }
0x120f   : > { %p42_p12 = scmp.ge.s32.totalorder %s7811_s30, 6  }
0x1211   :  { %44 = sbr.rel (!%p42_p12) target bundleno = 26 (0x1a), region = 222 }
0x1216   :  { %4714 = vsyncpa [#allocation3], 1 }
0x1217   :  { %4716 = vsyncpa [#allocation3 + $0x1], 1 }
0x1218   :  { %4717 = vsyncpa [#allocation6], 1 }
0x1219   :  { %4718 = vsyncpa [#allocation9], 1 }
0x121a   :  { %4719 = vsyncpa [#allocation12], 1 }
0x121b   :  { %4720 = vsyncpa [#allocation15], 1 }
0x121c   :  { %4721 = vsyncpa [#allocation18], 1 }
0x121d   :  { %4722 = vsyncpa [#allocation21], 1 }
0x121e   :  { %4723 = vsyncpa [#allocation4], 1 }
0x121f   :  { %4725 = vsyncpa [#allocation4 + $0x1], 1 }

</bundles_post_ra>
